<compile_context>
chip_gen: v6e
topology: v6e:2x2x1
jax: 0.10.0
libtpu: 0.0.40
codegen_flags: <defaults>
</compile_context>

<pallas_src>
import jax
import jax.numpy as jnp
from jax.experimental import pallas as pl
from jax.experimental.pallas import tpu as pltpu

# Problem sizes from the PyTorch module.
C = 440          # in/out channels
G = 55           # groups
CPG = C // G     # channels per group = 8
H = W = 7        # spatial
KH = KW = 3      # kernel taps
PAD = 1
PH = H + 2 * PAD  # padded spatial = 9
PW = W + 2 * PAD

CP = 512         # channels padded to a lane multiple
CB = 128         # channels per weight slab (16 whole 8-channel groups)
NB = CP // CB    # 4 slabs


def _detect_nsteps():
    # v7x has 2 TensorCores per chip -> 2 "parallel" 256-channel steps;
    # v5e/v6e have 1 TC -> a single step (grid overhead dominates otherwise).
    try:
        kind = jax.devices()[0].device_kind.lower().replace(" ", "")
        if "v7" in kind or "tpu7" in kind:
            return 2
    except Exception:
        pass
    return 1


NSTEPS = _detect_nsteps()
SPS = NB // NSTEPS     # 128-channel weight slabs handled per grid step
CPS = CP // NSTEPS     # output/input channels per grid step

assert CB % CPG == 0 and CPS % CPG == 0, (
    "channel slabs must contain whole groups for the block-diagonal trick")


def _conv_kernel(x_ref, w_ref, o_ref):
    # x_ref: (PH, PW, CPS)         bf16  padded NHWC input slab for this step
    # w_ref: (SPS, KH*KW*CB, CB)   bf16  folded-K block-diagonal weight slabs
    # o_ref: (H*W, CPS)            f32   flattened NHWC output slab
    #
    # One window load per tap (9 total), shared by all slabs of this step.
    windows = [
        x_ref[kh:kh + H, kw:kw + W, :].reshape(H * W, CPS)
        for kh in range(KH) for kw in range(KW)
    ]
    cols = []
    for s in range(SPS):
        # (49, KH*KW*CB) patch: lane-aligned 128-wide column selects + concat.
        patch = jnp.concatenate(
            [win[:, s * CB:(s + 1) * CB] for win in windows], axis=1)
        # Single long-K matmul per slab; accumulation stays inside the MXU.
        cols.append(jnp.dot(patch, w_ref[s],
                            preferred_element_type=jnp.float32))
    # One lane-dense store for the whole step.
    o_ref[...] = jnp.concatenate(cols, axis=1)


def prepare_weights(w_oihw):
    """One-time weight prep (hoisted out of the hot path).

    w_oihw: (Cout=440, Cin_per_group=8, 3, 3) f32 (PyTorch layout)
    returns: (NB=4, KH*KW*CB=1152, CB=128) bf16 folded-K block-diagonal slabs.
    """
    w_g = w_oihw.reshape(G, CPG, CPG, KH, KW)            # (g, o, i, kh, kw)
    w_t = jnp.transpose(w_g, (3, 4, 0, 2, 1))            # (kh, kw, g, i, o)
    eye = jnp.eye(G, dtype=w_oihw.dtype)
    dense = jnp.einsum('hwgio,gj->hwgijo', w_t, eye)     # (kh,kw,g,i,g2,o)
    dense = dense.reshape(KH, KW, C, C)                  # rows=cin, cols=cout
    dense = jnp.pad(dense, ((0, 0), (0, 0), (0, CP - C), (0, CP - C)))
    # Keep only the diagonal 128x128-channel blocks (groups never straddle).
    blocks = jnp.stack(
        [dense[:, :, i * CB:(i + 1) * CB, i * CB:(i + 1) * CB]
         for i in range(NB)])                            # (4, 3, 3, 128, 128)
    w_fold = blocks.reshape(NB, KH * KW * CB, CB)        # K = tap-major, then ci
    return w_fold.astype(jnp.bfloat16)


@jax.jit
def grouped_conv2d(x_nchw, w_fold):
    """x_nchw: (1, 440, 7, 7) f32; w_fold: prepare_weights output.

    Returns (1, 440, 7, 7) f32 (NCHW, matching the PyTorch module)."""
    # Input glue (kept inside one jit so XLA fuses it): NCHW -> padded NHWC.
    x_nhwc = jnp.transpose(x_nchw[0], (1, 2, 0))                       # (7,7,440)
    x_pad = jnp.pad(x_nhwc, ((PAD, PAD), (PAD, PAD), (0, CP - C)))
    x_pad = x_pad.astype(jnp.bfloat16)                                 # (9,9,512)

    out_flat = pl.pallas_call(
        _conv_kernel,
        out_shape=jax.ShapeDtypeStruct((H * W, CP), jnp.float32),
        grid=(NSTEPS,),
        in_specs=[
            pl.BlockSpec((PH, PW, CPS), lambda i: (0, 0, i)),
            pl.BlockSpec((SPS, KH * KW * CB, CB), lambda i: (i, 0, 0)),
        ],
        out_specs=pl.BlockSpec((H * W, CPS), lambda i: (0, i)),
        compiler_params=pltpu.CompilerParams(
            dimension_semantics=("parallel",)),
    )(x_pad, w_fold)

    out_nhwc = out_flat[:, :C].reshape(H, W, C)
    return jnp.transpose(out_nhwc, (2, 0, 1))[None]                    # NCHW


if __name__ == "__main__":
    key = jax.random.PRNGKey(0)
    kx, kw = jax.random.split(key)
    x = jax.random.normal(kx, (1, C, H, W), dtype=jnp.float32)
    w = jax.random.normal(kw, (C, CPG, KH, KW), dtype=jnp.float32) * 0.1

    w_prep = jax.block_until_ready(prepare_weights(w))   # one-time weight prep
    out = jax.block_until_ready(grouped_conv2d(x, w_prep))

    # Reference: XLA grouped convolution with bf16-rounded operands
    # (kernel uses bf16 operands + f32 accumulation).
    x_bf = x.astype(jnp.bfloat16).astype(jnp.float32)
    w_bf = w.astype(jnp.bfloat16).astype(jnp.float32)
    ref = jax.lax.conv_general_dilated(
        x_bf, w_bf, window_strides=(1, 1), padding=((PAD, PAD), (PAD, PAD)),
        dimension_numbers=('NCHW', 'OIHW', 'NCHW'), feature_group_count=G)
    ref = jax.block_until_ready(ref)

    assert out.shape == (1, C, H, W), out.shape
    max_err = float(jnp.max(jnp.abs(out - ref)))
    assert jnp.allclose(out, ref, atol=2e-2, rtol=2e-2), max_err
    print("KERNEL_OK")
</pallas_src>

<mosaic_0001>
module attributes {stable_mosaic.version = 11 : i64} {
  func.func @_conv_kernel(%arg0: i32, %arg1: memref<9x9x512xbf16, #tpu.memory_space<vmem>>, %arg2: memref<4x1152x128xbf16, #tpu.memory_space<vmem>>, %arg3: memref<49x512xf32, #tpu.memory_space<vmem>>) attributes {dimension_semantics = [#tpu.dimension_semantics<parallel>], iteration_bounds = array<i64: 1>, scalar_prefetch = 0 : i64, scratch_operands = 0 : i64, tpu.core_type = #tpu.core_type<tc>, window_params = [{transform_indices = @transform_0, window_bounds = array<i64: 9, 9, 512>}, {transform_indices = @transform_1, window_bounds = array<i64: 4, 1152, 128>}, {transform_indices = @transform_2, window_bounds = array<i64: 49, 512>}]} {
    %c0 = arith.constant 0 : index
    %c0_0 = arith.constant 0 : index
    %c0_1 = arith.constant 0 : index
    %0 = vector.load %arg1[%c0, %c0_0, %c0_1] : memref<9x9x512xbf16, #tpu.memory_space<vmem>>, vector<7x7x512xbf16>
    %1 = vector.shape_cast %0 : vector<7x7x512xbf16> to vector<49x512xbf16>
    %c0_2 = arith.constant 0 : index
    %c1 = arith.constant 1 : index
    %c0_3 = arith.constant 0 : index
    %2 = vector.load %arg1[%c0_2, %c1, %c0_3] : memref<9x9x512xbf16, #tpu.memory_space<vmem>>, vector<7x7x512xbf16>
    %3 = vector.shape_cast %2 : vector<7x7x512xbf16> to vector<49x512xbf16>
    %c0_4 = arith.constant 0 : index
    %c2 = arith.constant 2 : index
    %c0_5 = arith.constant 0 : index
    %4 = vector.load %arg1[%c0_4, %c2, %c0_5] : memref<9x9x512xbf16, #tpu.memory_space<vmem>>, vector<7x7x512xbf16>
    %5 = vector.shape_cast %4 : vector<7x7x512xbf16> to vector<49x512xbf16>
    %c1_6 = arith.constant 1 : index
    %c0_7 = arith.constant 0 : index
    %c0_8 = arith.constant 0 : index
    %6 = vector.load %arg1[%c1_6, %c0_7, %c0_8] : memref<9x9x512xbf16, #tpu.memory_space<vmem>>, vector<7x7x512xbf16>
    %7 = vector.shape_cast %6 : vector<7x7x512xbf16> to vector<49x512xbf16>
    %c1_9 = arith.constant 1 : index
    %c1_10 = arith.constant 1 : index
    %c0_11 = arith.constant 0 : index
    %8 = vector.load %arg1[%c1_9, %c1_10, %c0_11] : memref<9x9x512xbf16, #tpu.memory_space<vmem>>, vector<7x7x512xbf16>
    %9 = vector.shape_cast %8 : vector<7x7x512xbf16> to vector<49x512xbf16>
    %c1_12 = arith.constant 1 : index
    %c2_13 = arith.constant 2 : index
    %c0_14 = arith.constant 0 : index
    %10 = vector.load %arg1[%c1_12, %c2_13, %c0_14] : memref<9x9x512xbf16, #tpu.memory_space<vmem>>, vector<7x7x512xbf16>
    %11 = vector.shape_cast %10 : vector<7x7x512xbf16> to vector<49x512xbf16>
    %c2_15 = arith.constant 2 : index
    %c0_16 = arith.constant 0 : index
    %c0_17 = arith.constant 0 : index
    %12 = vector.load %arg1[%c2_15, %c0_16, %c0_17] : memref<9x9x512xbf16, #tpu.memory_space<vmem>>, vector<7x7x512xbf16>
    %13 = vector.shape_cast %12 : vector<7x7x512xbf16> to vector<49x512xbf16>
    %c2_18 = arith.constant 2 : index
    %c1_19 = arith.constant 1 : index
    %c0_20 = arith.constant 0 : index
    %14 = vector.load %arg1[%c2_18, %c1_19, %c0_20] : memref<9x9x512xbf16, #tpu.memory_space<vmem>>, vector<7x7x512xbf16>
    %15 = vector.shape_cast %14 : vector<7x7x512xbf16> to vector<49x512xbf16>
    %c2_21 = arith.constant 2 : index
    %c2_22 = arith.constant 2 : index
    %c0_23 = arith.constant 0 : index
    %16 = vector.load %arg1[%c2_21, %c2_22, %c0_23] : memref<9x9x512xbf16, #tpu.memory_space<vmem>>, vector<7x7x512xbf16>
    %17 = vector.shape_cast %16 : vector<7x7x512xbf16> to vector<49x512xbf16>
    %18 = vector.extract_strided_slice %1 {offsets = [0, 0], sizes = [49, 128], strides = [1, 1]} : vector<49x512xbf16> to vector<49x128xbf16>
    %19 = vector.extract_strided_slice %3 {offsets = [0, 0], sizes = [49, 128], strides = [1, 1]} : vector<49x512xbf16> to vector<49x128xbf16>
    %20 = vector.extract_strided_slice %5 {offsets = [0, 0], sizes = [49, 128], strides = [1, 1]} : vector<49x512xbf16> to vector<49x128xbf16>
    %21 = vector.extract_strided_slice %7 {offsets = [0, 0], sizes = [49, 128], strides = [1, 1]} : vector<49x512xbf16> to vector<49x128xbf16>
    %22 = vector.extract_strided_slice %9 {offsets = [0, 0], sizes = [49, 128], strides = [1, 1]} : vector<49x512xbf16> to vector<49x128xbf16>
    %23 = vector.extract_strided_slice %11 {offsets = [0, 0], sizes = [49, 128], strides = [1, 1]} : vector<49x512xbf16> to vector<49x128xbf16>
    %24 = vector.extract_strided_slice %13 {offsets = [0, 0], sizes = [49, 128], strides = [1, 1]} : vector<49x512xbf16> to vector<49x128xbf16>
    %25 = vector.extract_strided_slice %15 {offsets = [0, 0], sizes = [49, 128], strides = [1, 1]} : vector<49x512xbf16> to vector<49x128xbf16>
    %26 = vector.extract_strided_slice %17 {offsets = [0, 0], sizes = [49, 128], strides = [1, 1]} : vector<49x512xbf16> to vector<49x128xbf16>
    %27 = tpu.concatenate %18, %19, %20, %21, %22, %23, %24, %25, %26 in 1 : vector<49x128xbf16>, vector<49x128xbf16>, vector<49x128xbf16>, vector<49x128xbf16>, vector<49x128xbf16>, vector<49x128xbf16>, vector<49x128xbf16>, vector<49x128xbf16>, vector<49x128xbf16> -> vector<49x1152xbf16>
    %c0_24 = arith.constant 0 : index
    %c0_25 = arith.constant 0 : index
    %c0_26 = arith.constant 0 : index
    %28 = vector.load %arg2[%c0_24, %c0_25, %c0_26] : memref<4x1152x128xbf16, #tpu.memory_space<vmem>>, vector<1x1152x128xbf16>
    %29 = vector.shape_cast %28 : vector<1x1152x128xbf16> to vector<1152x128xbf16>
    %cst = arith.constant dense<0.000000e+00> : vector<49x128xf32>
    %30 = tpu.matmul %27, %29, %cst {dimension_numbers = #tpu.dot_dimension_numbers<[1], [0], [0], [1], [0, 0, 1, 1], [], []>} : vector<49x1152xbf16>, vector<1152x128xbf16>, vector<49x128xf32> -> vector<49x128xf32>
    %31 = vector.extract_strided_slice %1 {offsets = [0, 128], sizes = [49, 128], strides = [1, 1]} : vector<49x512xbf16> to vector<49x128xbf16>
    %32 = vector.extract_strided_slice %3 {offsets = [0, 128], sizes = [49, 128], strides = [1, 1]} : vector<49x512xbf16> to vector<49x128xbf16>
    %33 = vector.extract_strided_slice %5 {offsets = [0, 128], sizes = [49, 128], strides = [1, 1]} : vector<49x512xbf16> to vector<49x128xbf16>
    %34 = vector.extract_strided_slice %7 {offsets = [0, 128], sizes = [49, 128], strides = [1, 1]} : vector<49x512xbf16> to vector<49x128xbf16>
    %35 = vector.extract_strided_slice %9 {offsets = [0, 128], sizes = [49, 128], strides = [1, 1]} : vector<49x512xbf16> to vector<49x128xbf16>
    %36 = vector.extract_strided_slice %11 {offsets = [0, 128], sizes = [49, 128], strides = [1, 1]} : vector<49x512xbf16> to vector<49x128xbf16>
    %37 = vector.extract_strided_slice %13 {offsets = [0, 128], sizes = [49, 128], strides = [1, 1]} : vector<49x512xbf16> to vector<49x128xbf16>
    %38 = vector.extract_strided_slice %15 {offsets = [0, 128], sizes = [49, 128], strides = [1, 1]} : vector<49x512xbf16> to vector<49x128xbf16>
    %39 = vector.extract_strided_slice %17 {offsets = [0, 128], sizes = [49, 128], strides = [1, 1]} : vector<49x512xbf16> to vector<49x128xbf16>
    %40 = tpu.concatenate %31, %32, %33, %34, %35, %36, %37, %38, %39 in 1 : vector<49x128xbf16>, vector<49x128xbf16>, vector<49x128xbf16>, vector<49x128xbf16>, vector<49x128xbf16>, vector<49x128xbf16>, vector<49x128xbf16>, vector<49x128xbf16>, vector<49x128xbf16> -> vector<49x1152xbf16>
    %c1_27 = arith.constant 1 : index
    %c0_28 = arith.constant 0 : index
    %c0_29 = arith.constant 0 : index
    %41 = vector.load %arg2[%c1_27, %c0_28, %c0_29] : memref<4x1152x128xbf16, #tpu.memory_space<vmem>>, vector<1x1152x128xbf16>
    %42 = vector.shape_cast %41 : vector<1x1152x128xbf16> to vector<1152x128xbf16>
    %cst_30 = arith.constant dense<0.000000e+00> : vector<49x128xf32>
    %43 = tpu.matmul %40, %42, %cst_30 {dimension_numbers = #tpu.dot_dimension_numbers<[1], [0], [0], [1], [0, 0, 1, 1], [], []>} : vector<49x1152xbf16>, vector<1152x128xbf16>, vector<49x128xf32> -> vector<49x128xf32>
    %44 = vector.extract_strided_slice %1 {offsets = [0, 256], sizes = [49, 128], strides = [1, 1]} : vector<49x512xbf16> to vector<49x128xbf16>
    %45 = vector.extract_strided_slice %3 {offsets = [0, 256], sizes = [49, 128], strides = [1, 1]} : vector<49x512xbf16> to vector<49x128xbf16>
    %46 = vector.extract_strided_slice %5 {offsets = [0, 256], sizes = [49, 128], strides = [1, 1]} : vector<49x512xbf16> to vector<49x128xbf16>
    %47 = vector.extract_strided_slice %7 {offsets = [0, 256], sizes = [49, 128], strides = [1, 1]} : vector<49x512xbf16> to vector<49x128xbf16>
    %48 = vector.extract_strided_slice %9 {offsets = [0, 256], sizes = [49, 128], strides = [1, 1]} : vector<49x512xbf16> to vector<49x128xbf16>
    %49 = vector.extract_strided_slice %11 {offsets = [0, 256], sizes = [49, 128], strides = [1, 1]} : vector<49x512xbf16> to vector<49x128xbf16>
    %50 = vector.extract_strided_slice %13 {offsets = [0, 256], sizes = [49, 128], strides = [1, 1]} : vector<49x512xbf16> to vector<49x128xbf16>
    %51 = vector.extract_strided_slice %15 {offsets = [0, 256], sizes = [49, 128], strides = [1, 1]} : vector<49x512xbf16> to vector<49x128xbf16>
    %52 = vector.extract_strided_slice %17 {offsets = [0, 256], sizes = [49, 128], strides = [1, 1]} : vector<49x512xbf16> to vector<49x128xbf16>
    %53 = tpu.concatenate %44, %45, %46, %47, %48, %49, %50, %51, %52 in 1 : vector<49x128xbf16>, vector<49x128xbf16>, vector<49x128xbf16>, vector<49x128xbf16>, vector<49x128xbf16>, vector<49x128xbf16>, vector<49x128xbf16>, vector<49x128xbf16>, vector<49x128xbf16> -> vector<49x1152xbf16>
    %c2_31 = arith.constant 2 : index
    %c0_32 = arith.constant 0 : index
    %c0_33 = arith.constant 0 : index
    %54 = vector.load %arg2[%c2_31, %c0_32, %c0_33] : memref<4x1152x128xbf16, #tpu.memory_space<vmem>>, vector<1x1152x128xbf16>
    %55 = vector.shape_cast %54 : vector<1x1152x128xbf16> to vector<1152x128xbf16>
    %cst_34 = arith.constant dense<0.000000e+00> : vector<49x128xf32>
    %56 = tpu.matmul %53, %55, %cst_34 {dimension_numbers = #tpu.dot_dimension_numbers<[1], [0], [0], [1], [0, 0, 1, 1], [], []>} : vector<49x1152xbf16>, vector<1152x128xbf16>, vector<49x128xf32> -> vector<49x128xf32>
    %57 = vector.extract_strided_slice %1 {offsets = [0, 384], sizes = [49, 128], strides = [1, 1]} : vector<49x512xbf16> to vector<49x128xbf16>
    %58 = vector.extract_strided_slice %3 {offsets = [0, 384], sizes = [49, 128], strides = [1, 1]} : vector<49x512xbf16> to vector<49x128xbf16>
    %59 = vector.extract_strided_slice %5 {offsets = [0, 384], sizes = [49, 128], strides = [1, 1]} : vector<49x512xbf16> to vector<49x128xbf16>
    %60 = vector.extract_strided_slice %7 {offsets = [0, 384], sizes = [49, 128], strides = [1, 1]} : vector<49x512xbf16> to vector<49x128xbf16>
    %61 = vector.extract_strided_slice %9 {offsets = [0, 384], sizes = [49, 128], strides = [1, 1]} : vector<49x512xbf16> to vector<49x128xbf16>
    %62 = vector.extract_strided_slice %11 {offsets = [0, 384], sizes = [49, 128], strides = [1, 1]} : vector<49x512xbf16> to vector<49x128xbf16>
    %63 = vector.extract_strided_slice %13 {offsets = [0, 384], sizes = [49, 128], strides = [1, 1]} : vector<49x512xbf16> to vector<49x128xbf16>
    %64 = vector.extract_strided_slice %15 {offsets = [0, 384], sizes = [49, 128], strides = [1, 1]} : vector<49x512xbf16> to vector<49x128xbf16>
    %65 = vector.extract_strided_slice %17 {offsets = [0, 384], sizes = [49, 128], strides = [1, 1]} : vector<49x512xbf16> to vector<49x128xbf16>
    %66 = tpu.concatenate %57, %58, %59, %60, %61, %62, %63, %64, %65 in 1 : vector<49x128xbf16>, vector<49x128xbf16>, vector<49x128xbf16>, vector<49x128xbf16>, vector<49x128xbf16>, vector<49x128xbf16>, vector<49x128xbf16>, vector<49x128xbf16>, vector<49x128xbf16> -> vector<49x1152xbf16>
    %c3 = arith.constant 3 : index
    %c0_35 = arith.constant 0 : index
    %c0_36 = arith.constant 0 : index
    %67 = vector.load %arg2[%c3, %c0_35, %c0_36] : memref<4x1152x128xbf16, #tpu.memory_space<vmem>>, vector<1x1152x128xbf16>
    %68 = vector.shape_cast %67 : vector<1x1152x128xbf16> to vector<1152x128xbf16>
    %cst_37 = arith.constant dense<0.000000e+00> : vector<49x128xf32>
    %69 = tpu.matmul %66, %68, %cst_37 {dimension_numbers = #tpu.dot_dimension_numbers<[1], [0], [0], [1], [0, 0, 1, 1], [], []>} : vector<49x1152xbf16>, vector<1152x128xbf16>, vector<49x128xf32> -> vector<49x128xf32>
    %70 = tpu.concatenate %30, %43, %56, %69 in 1 : vector<49x128xf32>, vector<49x128xf32>, vector<49x128xf32>, vector<49x128xf32> -> vector<49x512xf32>
    %c0_38 = arith.constant 0 : index
    %c0_39 = arith.constant 0 : index
    %71 = vector.load %arg3[%c0_38, %c0_39] : memref<49x512xf32, #tpu.memory_space<vmem>>, vector<49x512xf32>
    tpu.vector_store %arg3[%c0_38, %c0_39], %70 {strides = array<i32>} : memref<49x512xf32, #tpu.memory_space<vmem>>, vector<49x512xf32>,
    return
  }
  func.func @transform_0(%arg0: i32) -> (i32, i32, i32) {
    %c0_i32 = arith.constant 0 : i32
    %c0_i32_0 = arith.constant 0 : i32
    %c0_i32_1 = arith.constant 0 : i32
    return %c0_i32, %c0_i32_0, %arg0 : i32, i32, i32
  }
  func.func @transform_1(%arg0: i32) -> (i32, i32, i32) {
    %c0_i32 = arith.constant 0 : i32
    %c0_i32_0 = arith.constant 0 : i32
    %c0_i32_1 = arith.constant 0 : i32
    return %arg0, %c0_i32, %c0_i32_0 : i32, i32, i32
  }
  func.func @transform_2(%arg0: i32) -> (i32, i32) {
    %c0_i32 = arith.constant 0 : i32
    %c0_i32_0 = arith.constant 0 : i32
    return %c0_i32, %arg0 : i32, i32
  }
}

</mosaic_0001>

<bundles_post_ra>
// kernel: grouped_conv2d.1
= control target key start
LH: loop header
LB: loop body
LE: loop exit
PB: predicated region body
PF: predicated region fallthrough
CT: control target
= control target key end

     0   :  { %7 = vsyncpa [#allocation3], 0  ;;  %s10155_s9 = smov [#allocation2]   ;;  %s12589_s0 = inlined_call_operand.vmem [shape: bf16[9,9,512], index: 0, kind: input, shape index: {}]   ;;  %s12590_s1 = inlined_call_operand.hbm [shape: bf16[4,1152,128], index: 1, kind: input, shape index: {}]   ;;  %s12591_s2 = inlined_call_operand.vmem [shape: f32[49,512], index: 2, kind: output, shape index: {}]  }
   0x1   :  { %s15_s10 = sshll.u32 %s10155_s9, 4  ;;  %s16_s10 = int_to_ptr.vmem [resolvable:$true] %s15_s10 }
   0x2   :  { %s10141_s11 = scalar_lea.vmem %s16_s10, 36864  ;;  %p10146_p1 = scmp.lt.s32.totalorder %s16_s10, %s16_s10 }
   0x3   :  { %p10142_p0 = scmp.ne.s32.totalorder %s16_s10, %s10141_s11  ;;  %p10147_p2 = scmp.lt.s32.totalorder %s10141_s11, %s10141_s11 }
   0x5   :  { %p10148_p3 = por %p10147_p2, %p10146_p1 }
   0x7   :  { %p10149_p4 = pnand %p10148_p3, %p10142_p0 }
   0x9   :  { %10152 = shalt.err (!%p10149_p4)
}
   0xa   :  { %s10156_s12 = smov 64   ;;  %s10157_s13 = smov 4  }
   0xb   :  { %21 = dma.hbm_to_vmem [thread:$0]  %s12590_s1, 36864, %s16_s10, [#allocation3], %s10156_s12, %s10156_s12, %s10157_s13  }
   0xc   :  { %10153 = dma.done.wait [#allocation3], 36864  }
   0xd   :  { %10154 = vsyncadd [#allocation3], 4294930432  ;;  %v9845_v0 = vld [vmem:[#allocation2 + $0x78] sm:$0xff]   ;;  %v9849_v4 = vld [vmem:[#allocation2 + $0x70] sm:$0xff]   ;;  %v10158_v24 = vmov 1966171168   ;;  %v73_v26 = vlaneseq }
   0xe   :  { %v9846_v1 = vld [vmem:[#allocation2 + $0xf8] sm:$0xff]   ;;  %9057 = vmatprep.subr.bf16.mxu0 %v9845_v0  ;;  %v9850_v5 = vld [vmem:[#allocation2 + $0xf0] sm:$0xff]   ;;  %v9853_v8 = vld [vmem:[#allocation2 + $0x68] sm:$0xff]   ;;  %v71_v25 = vunpack.c.l.s4 %v10158_v24 }
   0xf   :  { %v9847_v2 = vld [vmem:[#allocation2 + $0x38] sm:$0xff]   ;;  %9097 = vmatprep.subr.bf16.mxu1 %v9846_v1  ;;  %v9851_v6 = vld [vmem:[#allocation2 + $0x30] sm:$0xff]   ;;  %v9854_v9 = vld [vmem:[#allocation2 + $0xe8] sm:$0xff]   ;;  %v74_v32 = vshrl.u32 %v73_v26, 7 }
  0x10   :  { %v9848_v3 = vld [vmem:[#allocation2 + $0xb8] sm:$0xff]   ;;  %9058 = vmatpush3.bf16.msra.mxu0 %v9847_v2  ;;  %v9852_v7 = vld [vmem:[#allocation2 + $0xb0] sm:$0xff]   ;;  %v9855_v10 = vld [vmem:[#allocation2 + $0x28] sm:$0xff]   ;;  %v72_v31 = vunpack.c.0.s8 %v71_v25 }
  0x11   :  { %9098 = vmatpush3.bf16.msra.mxu1 %v9848_v3  ;;  %9059 = vmatprep.subr.bf16.mxu0 %v9849_v4  ;;  %v9856_v11 = vld [vmem:[#allocation2 + $0xa8] sm:$0xff]   ;;  %v9857_v12 = vld [vmem:[#allocation2 + $0x60] sm:$0xff]   ;;  %v9861_v16 = vld [vmem:[#allocation2 + $0x58] sm:$0xff]  }
  0x12   :  { %9099 = vmatprep.subr.bf16.mxu1 %v9850_v5  ;;  %v9858_v13 = vld [vmem:[#allocation2 + $0xe0] sm:$0xff]   ;;  %v9862_v17 = vld [vmem:[#allocation2 + $0xd8] sm:$0xff]   ;;  %v9865_v20 = vld [vmem:[#allocation2 + $0x50] sm:$0xff]   ;;  %v10177_v37 = vsub.s32 %v72_v31, %v74_v32 }
  0x13   :  { %v9859_v14 = vld [vmem:[#allocation2 + $0x20] sm:$0xff]   ;;  %v9863_v18 = vld [vmem:[#allocation2 + $0x18] sm:$0xff]   ;;  %v9866_v21 = vld [vmem:[#allocation2 + $0xd0] sm:$0xff]  }
  0x14   :  { %9060 = vmatpush3.bf16.msra.mxu0 %v9851_v6  ;;  %v9860_v15 = vld [vmem:[#allocation2 + $0xa0] sm:$0xff]   ;;  %v9864_v19 = vld [vmem:[#allocation2 + $0x98] sm:$0xff]   ;;  %v9867_v22 = vld [vmem:[#allocation2 + $0x10] sm:$0xff]  }
  0x15   :  { %9100 = vmatpush3.bf16.msra.mxu1 %v9852_v7  ;;  %9061 = vmatprep.subr.bf16.mxu0 %v9853_v8  ;;  %v9868_v23 = vld [vmem:[#allocation2 + $0x90] sm:$0xff]   ;;  %v9869_v27 = vld [vmem:[#allocation2 + $0x48] sm:$0xff]   ;;  %v9873_v33 = vld [vmem:[#allocation2 + $0x40] sm:$0xff]  }
  0x16   :  { %9101 = vmatprep.subr.bf16.mxu1 %v9854_v9  ;;  %v9870_v28 = vld [vmem:[#allocation2 + $0xc8] sm:$0xff]   ;;  %v9874_v34 = vld [vmem:[#allocation2 + $0xc0] sm:$0xff]   ;;  %v9877_v2 = vld [vmem:[#allocation2 + $0x178] sm:$0xff]  }
  0x17   :  { %v9871_v29 = vld [vmem:[#allocation2 + $0x8] sm:$0xff]   ;;  %v9875_v35 = vld [vmem:[#allocation2] sm:$0xff]   ;;  %v9878_v3 = vld [vmem:[#allocation2 + $0x1f8] sm:$0xff]  }
  0x18   :  { %9062 = vmatpush3.bf16.msra.mxu0 %v9855_v10  ;;  %v9872_v30 = vld [vmem:[#allocation2 + $0x88] sm:$0xff]   ;;  %v9876_v36 = vld [vmem:[#allocation2 + $0x80] sm:$0xff]  }
  0x19   :  { %9102 = vmatpush3.bf16.msra.mxu1 %v9856_v11  ;;  %9063 = vmatprep.subr.bf16.mxu0 %v9857_v12  ;;  %v8442_v38 = vld.sshfl [vmem:[%s12589_s0] sm:$0xff pattern:$0x75316420]  ;;  %v8443_v39 = vld.sshfl [vmem:[%s12589_s0 + $0x8] sm:$0xff pattern:$0x75316420] }
  0x1a   :  { %9103 = vmatprep.subr.bf16.mxu1 %v9858_v13  ;;  %v8444_v40 = vld.sshfl [vmem:[%s12589_s0 + $0x20] sm:$0xff pattern:$0x75316420]  ;;  %v8445_v41 = vld.sshfl [vmem:[%s12589_s0 + $0x28] sm:$0xff pattern:$0x75316420]  ;;  %v68_v42 = vcombine.low %v8442_v38, %v8443_v39  ;;  %v69_v43 = vcombine.high %v8442_v38, %v8443_v39 }
  0x1b   :  { %v8446_v44 = vld.sshfl [vmem:[%s12589_s0 + $0x40] sm:$0xff pattern:$0x75316420]  ;;  %v8447_v45 = vld.sshfl [vmem:[%s12589_s0 + $0x48] sm:$0xff pattern:$0x75316420]  ;;  %v100_v46 = vcombine.low %v8444_v40, %v8445_v41  ;;  %v101_v47 = vcombine.high %v8444_v40, %v8445_v41 }
  0x1c   :  { %9064 = vmatpush3.bf16.msra.mxu0 %v9859_v14  ;;  %v10198_v48 = vrot.slane %v68_v42, %v10177_v37  ;;  %v10201_v49 = vrot.slane %v69_v43, %v10177_v37  ;;  %v132_v50 = vcombine.low %v8446_v44, %v8447_v45  ;;  %v133_v51 = vcombine.high %v8446_v44, %v8447_v45  ;;  %v8502_v52 = vld.sshfl [vmem:[%s12589_s0 + $0x60] sm:$0xff pattern:$0x75316420]  ;;  %v8503_v53 = vld.sshfl [vmem:[%s12589_s0 + $0x68] sm:$0xff pattern:$0x75316420] }
  0x1d   :  { %9104 = vmatpush3.bf16.msra.mxu1 %v9860_v15  ;;  %9065 = vmatprep.subr.bf16.mxu0 %v9861_v16  ;;  %v10210_v54 = vrot.slane %v100_v46, %v10177_v37  ;;  %v115_v55 = vrot.slane %v101_v47, %v10177_v37  ;;  %v924_v56 = vcombine.low %v8502_v52, %v8503_v53 }
  0x1e   :  { %9105 = vmatprep.subr.bf16.mxu1 %v9862_v17  ;;  %v925_v57 = vcombine.high %v8502_v52, %v8503_v53  ;;  %v10215_v58 = vcombine.high %v10198_v48, %v10198_v48  ;;  %v10219_v59 = vcombine.high %v10201_v49, %v10201_v49  ;;  %v10222_v60 = vrot.slane %v132_v50, %v10177_v37 }
  0x1f   :  { %v10225_v61 = vrot.slane %v133_v51, %v10177_v37  ;;  %v116_v62 = vcombine.high %v10210_v54, %v10210_v54  ;;  %v117_v63 = vcombine.high %v115_v55, %v115_v55  ;;  %v279_v0 = vunpack.i.h.s16 %v10198_v48 }
  0x20   :  { %9066 = vmatpush3.bf16.msra.mxu0 %v9863_v18  ;;  %v281_v1 = vunpack.i.h.s16 %v10201_v49  ;;  %v283_v4 = vunpack.i.h.s16 %v10215_v58  ;;  %v286_v5 = vunpack.i.h.s16 %v10210_v54  ;;  %v293_v6 = vunpack.i.h.s16 %v10222_v60 }
  0x21   :  { %9106 = vmatpush3.bf16.msra.mxu1 %v9864_v19  ;;  %9067 = vmatprep.subr.bf16.mxu0 %v9865_v20  ;;  %v327_v7 = vunpack.i.h.s16 %v10219_v59  ;;  %v290_v8 = vunpack.i.h.s16 %v116_v62  ;;  %v8664_v9 = vpack.i.b16 %v10201_v49, %v279_v0  ;;  %v2618_v11 = vcombine.low %v115_v55, %v116_v62 }
  0x22   :  { %9107 = vmatprep.subr.bf16.mxu1 %v9866_v21  ;;  %v8665_v10 = vpack.i.b16 %v10215_v58, %v281_v1  ;;  %v8666_v12 = vpack.i.b16 %v10219_v59, %v283_v4  ;;  %v8667_v14 = vpack.i.b16 %v10225_v61, %v293_v6  ;;  %v10241_v15 = vcombine.high %v10222_v60, %v10222_v60 }
  0x23   :  { %v2594_v13 = vpack.i.b16 %v286_v5, %v327_v7  ;;  %v10243_v16 = vpack.i.b16 %v117_v63, %v290_v8  ;;  %v10246_v18 = vrot.slane %v2618_v11, %v10177_v37  ;;  %v10250_v19 = vcombine.high %v10225_v61, %v10225_v61 }
  0x24   :  { %9068 = vmatpush3.bf16.msra.mxu0 %v9867_v22  ;;  %v2616_v17 = vcombine.low %v8664_v9, %v8665_v10  ;;  %v2619_v21 = vcombine.low %v117_v63, %v8667_v14  ;;  %v10253_v22 = vrot.slane %v924_v56, %v10177_v37  ;;  %v1073_v25 = vunpack.i.h.s16 %v115_v55  ;;  %v8456_v56 = vld.sshfl [vmem:[%s12589_s0] sm:$0xfa pattern:$0x75316420] }
  0x25   :  { %9108 = vmatpush3.bf16.msra.mxu1 %v9868_v23  ;;  %9069 = vmatprep.subr.bf16.mxu0 %v9869_v27  ;;  %12802 = vst [vmem:[#allocation5_spill] sm:$0xff] %v10246_v18  ;;  %v2617_v20 = vcombine.low %v8666_v12, %v2594_v13  ;;  %v10256_v23 = vrot.slane %v925_v57, %v10177_v37  ;;  %v1080_v26 = vunpack.i.h.s16 %v10225_v61  ;;  %v1082_v27 = vunpack.i.h.s16 %v10241_v15  ;;  %v8457_v57 = vld.sshfl [vmem:[%s12589_s0 + $0x8] sm:$0xfa pattern:$0x75316420] }
  0x26   :  { %9109 = vmatprep.subr.bf16.mxu1 %v9870_v28  ;;  %v10259_v24 = vrot.slane %v2616_v17, %v10177_v37  ;;  %v1119_v31 = vunpack.i.h.s16 %v117_v63  ;;  %v8691_v32 = vpack.i.b16 %v10222_v60, %v117_v63  ;;  %v8703_v39 = vpack.i.b16 %v115_v55, %v286_v5  ;;  %v8460_v10 = vld.sshfl [vmem:[%s12589_s0 + $0x20] sm:$0xfa pattern:$0x75316420]  ;;  %v9882_v63 = vld [vmem:[#allocation2 + $0x1f0] sm:$0xff]  }
  0x27   :  { %v10264_v28 = vrot.slane %v2617_v20, %v10177_v37  ;;  %v8704_v40 = vpack.i.b16 %v116_v62, %v1073_v25  ;;  %v8652_v5 = vpack.i.b16 %v10210_v54, %v10219_v59  ;;  %v2426_v8 = vcombine.low %v10198_v48, %v10201_v49  ;;  %v8461_v12 = vld.sshfl [vmem:[%s12589_s0 + $0x28] sm:$0xfa pattern:$0x75316420] }
  0x28   :  { %9070 = vmatpush3.bf16.msra.mxu0 %v9871_v29  ;;  %12803 = vst [vmem:[#allocation6_spill] sm:$0xff] %v10259_v24  ;;  %v10267_v29 = vrot.slane %v2619_v21, %v10177_v37  ;;  %v2997_v41 = vcombine.low %v116_v62, %v8691_v32  ;;  %v10294_v47 = vpack.i.b16 %v293_v6, %v1119_v31  ;;  %v8459_v6 = vld.sshfl [vmem:[%s12589_s0 + $0x18] sm:$0x5 pattern:$0x75316420] }
  0x29   :  { %9110 = vmatpush3.bf16.msra.mxu1 %v9872_v30  ;;  %9071 = vmatprep.subr.bf16.mxu0 %v9873_v33  ;;  %12804 = vst [vmem:[#allocation7_spill] sm:$0xff] %v10264_v28  ;;  %v1085_v30 = vunpack.i.h.s16 %v10253_v22  ;;  %v10272_v33 = vpack.i.b16 %v10241_v15, %v1080_v26  ;;  %v2429_v9 = vcombine.low %v10243_v16, %v10222_v60  ;;  %v8462_v60 = vld.sshfl [vmem:[%s12589_s0 + $0x30] sm:$0x5 pattern:$0x75316420] }
  0x2a   :  { %9111 = vmatprep.subr.bf16.mxu1 %v9874_v34  ;;  %12805 = vst [vmem:[#allocation8_spill] sm:$0xff] %v10267_v29  ;;  %v10275_v34 = vpack.i.b16 %v10250_v19, %v1082_v27  ;;  %v2649_v38 = vcombine.low %v10246_v18, %v10267_v29  ;;  %v10302_v51 = vrot.slane %v2997_v41, %v10177_v37  ;;  %v8463_v20 = vld.sshfl [vmem:[%s12589_s0 + $0x38] sm:$0x5 pattern:$0x75316420] }
  0x2b   :  { %v2998_v42 = vcombine.low %v8667_v14, %v10272_v33  ;;  %v10299_v50 = vpack.i.b16 %v10256_v23, %v1085_v30  ;;  %v2427_v11 = vcombine.low %v10215_v58, %v8652_v5  ;;  %v10357_v48 = vrot.slane %v2426_v8, %v10177_v37  ;;  %v10376_v25 = vld.sshfl [vmem:[%s12589_s0 + $0x40] sm:$0xfa pattern:$0x75316420] }
  0x2c   :  { %9072 = vmatpush3.bf16.msra.mxu0 %v9875_v35  ;;  %v2996_v35 = vcombine.low %v10210_v54, %v115_v55  ;;  %v2999_v43 = vcombine.low %v10275_v34, %v10253_v22  ;;  %v10292_v46 = vrot.slane %v2649_v38, %v10177_v37  ;;  %12809 = vst [vmem:[#allocation12_spill] sm:$0xff] %v10302_v51  ;;  %v8451_v8 = vld.sshfl [vmem:[%s12589_s0 + $0x88] sm:$0xff pattern:$0x75316420] }
  0x2d   :  { %9112 = vmatpush3.bf16.msra.mxu1 %v9876_v36  ;;  %9137 = vmatprep.subr.bf16.mxu0 %v9877_v2  ;;  %v2648_v36 = vcombine.low %v10259_v24, %v10264_v28  ;;  %v10305_v52 = vrot.slane %v2998_v42, %v10177_v37  ;;  %v3186_v55 = vcombine.low %v8703_v39, %v8704_v40  ;;  %v8458_v2 = vld.sshfl [vmem:[%s12589_s0 + $0x10] sm:$0x5 pattern:$0x75316420] }
  0x2e   :  { %9177 = vmatprep.subr.bf16.mxu1 %v9878_v3  ;;  %v10286_v44 = vrot.slane %v2996_v35, %v10177_v37  ;;  %12808 = vst [vmem:[#allocation11_spill] sm:$0xff] %v10292_v46  ;;  %v10308_v53 = vrot.slane %v2999_v43, %v10177_v37  ;;  %v3189_v1 = vcombine.low %v10250_v19, %v10299_v50  ;;  %12815 = vst [vmem:[#allocation18_spill] sm:$0xff] %v10357_v48  ;;  %v10390_v39 = vld.sshfl [vmem:[%s12589_s0 + $0x48] sm:$0xfa pattern:$0x75316420] }
  0x2f   :  { %v10289_v45 = vrot.slane %v2648_v36, %v10177_v37  ;;  %12810 = vst [vmem:[#allocation13_spill] sm:$0xff] %v10305_v52  ;;  %v10360_v49 = vrot.slane %v2429_v9, %v10177_v37  ;;  %v404_v13 = vcombine.low %v8456_v56, %v8457_v57  ;;  %v405_v14 = vcombine.high %v8456_v56, %v8457_v57 }
  0x30   :  { %12806 = vst [vmem:[#allocation9_spill] sm:$0xff] %v10286_v44  ;;  %12811 = vst [vmem:[#allocation14_spill] sm:$0xff] %v10308_v53  ;;  %v3028_v3 = vcombine.low %v10286_v44, %v10302_v51  ;;  %v3029_v4 = vcombine.low %v10305_v52, %v10308_v53  ;;  %v10337_v7 = vrot.slane %v3189_v1, %v10177_v37 }
  0x31   :  { %12807 = vst [vmem:[#allocation10_spill] sm:$0xff] %v10289_v45  ;;  %v2664_v62 = vcombine.low %v10289_v45, %v10292_v46  ;;  %12816 = vst [vmem:[#allocation19_spill] sm:$0xff] %v10360_v49  ;;  %v10368_v58 = vrot.slane %v2427_v11, %v10177_v37  ;;  %v436_v21 = vcombine.low %v8458_v2, %v8459_v6  ;;  %v8450_v6 = vld.sshfl [vmem:[%s12589_s0 + $0x80] sm:$0xff pattern:$0x75316420] }
  0x32   :  { %12812 = vst [vmem:[#allocation15_spill] sm:$0xff] %v10337_v7  ;;  %v10347_v54 = vrot.slane %v3028_v3, %v10177_v37  ;;  %v10350_v59 = vrot.slane %v3029_v4, %v10177_v37  ;;  %v412_v26 = vrot.slane %v404_v13, %v10177_v37  ;;  %v419_v27 = vrot.slane %v405_v14, %v10177_v37 }
  0x33   :  { %4719 = vmatprep.mubr.bf16.mxu0 %v2664_v62  ;;  %12817 = vst [vmem:[#allocation20_spill] sm:$0xff] %v10368_v58  ;;  %v458_v31 = vcombine.low %v8460_v10, %v8461_v12  ;;  %v459_v32 = vcombine.high %v8460_v10, %v8461_v12  ;;  %v10381_v35 = vrot.slane %v3186_v55, %v10177_v37  ;;  %v9880_v62 = vld [vmem:[#allocation2 + $0x1b8] sm:$0xff]  }
  0x34   :  { %12813 = vst [vmem:[#allocation16_spill] sm:$0xff] %v10347_v54  ;;  %12814 = vst [vmem:[#allocation17_spill] sm:$0xff] %v10350_v59  ;;  %v3044_v17 = vcombine.low %v10347_v54, %v10350_v59  ;;  %v2458_v36 = vcombine.low %v10357_v48, %v10368_v58  ;;  %v443_v40 = vrot.slane %v436_v21, %v10177_v37  ;;  %v9891_v54 = vld [vmem:[#allocation2 + $0x120] sm:$0xff]  }
  0x35   :  { %12818 = vst [vmem:[#allocation21_spill] sm:$0xff] %v10381_v35  ;;  %v420_v41 = vcombine.high %v412_v26, %v412_v26  ;;  %v421_v42 = vcombine.high %v419_v27, %v419_v27  ;;  %v466_v43 = vrot.slane %v458_v31, %v10177_v37  ;;  %v10395_v55 = vrot.slane %v459_v32, %v10177_v37 }
  0x36   :  { %4783 = vmatprep.mubr.bf16.mxu1 %v3044_v17  ;;  %v2459_v56 = vcombine.low %v10381_v35, %v10360_v49  ;;  %v10400_v57 = vrot.slane %v2458_v36, %v10177_v37  ;;  %v490_v1 = vcombine.low %v8462_v60, %v8463_v20  ;;  %v513_v4 = vcombine.high %v10376_v25, %v10390_v39  ;;  %v9879_v20 = vld [vmem:[#allocation2 + $0x138] sm:$0xff]  }
  0x37   :  { %v10404_v2 = vcombine.high %v466_v43, %v466_v43  ;;  %v10408_v3 = vcombine.high %v10395_v55, %v10395_v55  ;;  %v776_v5 = vunpack.i.h.s16 %v10395_v55  ;;  %v8677_v11 = vpack.i.b16 %v10395_v55, %v443_v40 }
  0x38   :  { %12819 = vst [vmem:[#allocation22_spill] sm:$0xff] %v10400_v57  ;;  %v10420_v9 = vrot.slane %v2459_v56, %v10177_v37  ;;  %v10423_v10 = vrot.slane %v490_v1, %v10177_v37  ;;  %v2806_v12 = vcombine.low %v419_v27, %v420_v41  ;;  %v10427_v60 = vrot.slane %v513_v4, %v10177_v37  ;;  %v9881_v27 = vld [vmem:[#allocation2 + $0x170] sm:$0xff]  }
  0x39   :  { %v778_v13 = vunpack.i.h.s16 %v10404_v2  ;;  %v780_v14 = vunpack.i.h.s16 %v10408_v3  ;;  %v8678_v17 = vpack.i.b16 %v10404_v2, %v776_v5  ;;  %v2807_v31 = vcombine.low %v421_v42, %v8677_v11  ;;  %v9883_v5 = vld [vmem:[#allocation2 + $0x130] sm:$0xff]  }
  0x3a   :  { %12820 = vst [vmem:[#allocation23_spill] sm:$0xff] %v10420_v9  ;;  %v2474_v21 = vcombine.low %v10400_v57, %v10420_v9  ;;  %v10437_v32 = vrot.slane %v2806_v12, %v10177_v37  ;;  %v196_v43 = vcombine.low %v8450_v6, %v8451_v8  ;;  %v197_v56 = vcombine.high %v8450_v6, %v8451_v8  ;;  %v9885_v6 = vld [vmem:[#allocation2 + $0x168] sm:$0xff]  }
  0x3b   :  { %v8679_v36 = vpack.i.b16 %v10408_v3, %v778_v13  ;;  %v8680_v40 = vpack.i.b16 %v10423_v10, %v780_v14  ;;  %v10442_v41 = vrot.slane %v2807_v31, %v10177_v37  ;;  %v329_v42 = vunpack.i.h.s16 %v10250_v19 }
  0x3c   :  { %12821 = vst [vmem:[#allocation24_spill] sm:$0xff] %v10437_v32  ;;  %4720 = vmatmul.mubr.bf16.vlgmr.msra.gmra.mxu0 %v2474_v21  ;;  %v10451_v13 = vrot.slane %v196_v43, %v10177_v37  ;;  %v10454_v14 = vrot.slane %v197_v56, %v10177_v37 }
  0x3d   :  { %12822 = vst [vmem:[#allocation25_spill] sm:$0xff] %v10442_v41  ;;  %v2808_v1 = vcombine.low %v8678_v17, %v8679_v36  ;;  %v2809_v4 = vcombine.low %v8680_v40, %v10427_v60  ;;  %9138 = vmatpush3.bf16.msra.mxu0 %v9879_v20  ;;  %v2838_v11 = vcombine.low %v10437_v32, %v10442_v41  ;;  %v8506_v36 = vld.sshfl [vmem:[%s12589_s0 + $0xa0] sm:$0xff pattern:$0x75316420] }
  0x3e   :  { %9139 = vmatprep.subr.bf16.mxu0 %v9881_v27  ;;  %v10467_v21 = vcombine.high %v10451_v13, %v10451_v13  ;;  %v12592_v31 = vunpack.i.h.s16 %v10451_v13  ;;  %v309_v27 = vunpack.i.h.s16 %v10454_v14  ;;  %v2601_v56 = vpack.i.b16 %v1085_v30, %v329_v42 }
  0x3f   :  { %v10457_v8 = vrot.slane %v2808_v1, %v10177_v37  ;;  %v10460_v17 = vrot.slane %v2809_v4, %v10177_v37  ;;  %v10463_v20 = vrot.slane %v2838_v11, %v10177_v37  ;;  %v2665_v1 = vcombine.low %v10272_v33, %v10275_v34  ;;  %v8507_v4 = vld.sshfl [vmem:[%s12589_s0 + $0xa8] sm:$0xff pattern:$0x75316420]  ;;  %v9889_v33 = vld [vmem:[#allocation2 + $0x160] sm:$0xff]  }
  0x40   :  { %v9887_v11 = vld [vmem:[#allocation2 + $0x128] sm:$0xff]   ;;  %v10488_v26 = vpack.i.b16 %v10454_v14, %v12592_v31  ;;  %v10491_v12 = vpack.i.b16 %v10467_v21, %v309_v27  ;;  %v940_v30 = vcombine.high %v10253_v22, %v10253_v22  ;;  %v2666_v42 = vcombine.low %v2601_v56, %v10256_v23 }
  0x41   :  { %12823 = vst [vmem:[#allocation26_spill] sm:$0xff] %v10457_v8  ;;  %12824 = vst [vmem:[#allocation27_spill] sm:$0xff] %v10460_v17  ;;  %v2839_v40 = vcombine.low %v10457_v8, %v10460_v17  ;;  %9140 = vmatpush3.bf16.msra.mxu0 %v9883_v5  ;;  %v8676_v5 = vcombine.high %v10253_v22, %v10256_v23  ;;  %v10502_v43 = vrot.slane %v2665_v1, %v10177_v37  ;;  %v9895_v8 = vld [vmem:[#allocation2 + $0x118] sm:$0xff]  }
  0x42   :  { %12825 = vst [vmem:[#allocation28_spill] sm:$0xff] %v10463_v20  ;;  %9141 = vmatprep.subr.bf16.mxu0 %v9885_v6  ;;  %v10506_v27 = vcombine.high %v10256_v23, %v10256_v23  ;;  %v2668_v38 = vcombine.low %v10488_v26, %v10491_v12  ;;  %v10515_v6 = vcombine.high %v10454_v14, %v10454_v14  ;;  %v1096_v45 = vunpack.i.h.s16 %v10467_v21 }
  0x43   :  { %v10498_v34 = vrot.slane %v2839_v40, %v10177_v37  ;;  %12827 = vst [vmem:[#allocation30_spill] sm:$0xff] %v10502_v43  ;;  %v10511_v31 = vrot.slane %v8676_v5, %v10177_v37  ;;  %v988_v40 = vcombine.low %v8506_v36, %v8507_v4  ;;  %v10522_v0 = vrot.slane %v2666_v42, %v10177_v37 }
  0x44   :  { %v989_v9 = vcombine.high %v8506_v36, %v8507_v4  ;;  %v10525_v5 = vrot.slane %v2668_v38, %v10177_v37  ;;  %v8695_v46 = vpack.i.b16 %v10451_v13, %v10506_v27  ;;  %v3045_v38 = vcombine.low %v10256_v23, %v940_v30 }
  0x45   :  { %12826 = vst [vmem:[#allocation29_spill] sm:$0xff] %v10498_v34  ;;  %12828 = vst [vmem:[#allocation31_spill] sm:$0xff] %v10511_v31  ;;  %v2854_v56 = vcombine.low %v10463_v20, %v10498_v34  ;;  %9142 = vmatpush3.bf16.msra.mxu0 %v9887_v11  ;;  %v10528_v57 = vrot.slane %v988_v40, %v10177_v37  ;;  %v2697_v42 = vcombine.low %v10502_v43, %v10522_v0  ;;  %v9893_v11 = vld [vmem:[#allocation2 + $0x158] sm:$0xff]   ;;  %v9884_v40 = vld [vmem:[#allocation2 + $0x1b0] sm:$0xff]  }
  0x46   :  { %12829 = vst [vmem:[#allocation32_spill] sm:$0xff] %v10522_v0  ;;  %12830 = vst [vmem:[#allocation33_spill] sm:$0xff] %v10525_v5  ;;  %9143 = vmatprep.subr.bf16.mxu0 %v9889_v33  ;;  %v10536_v36 = vrot.slane %v989_v9, %v10177_v37  ;;  %v302_v4 = vunpack.i.h.s16 %v10256_v23  ;;  %v2698_v1 = vcombine.low %v10511_v31, %v10525_v5  ;;  %v304_v34 = vunpack.i.h.s16 %v940_v30  ;;  %v10699_v5 = vld [vmem:[#allocation2 + $0x238] sm:$0xff]  }
  0x47   :  { %4784 = vmatmul.mubr.bf16.vlgmr.msra.gmra.mxu1 %v2854_v56  ;;  %v10543_v33 = vpack.i.b16 %v10515_v6, %v1096_v45  ;;  %v3046_v56 = vcombine.low %v8695_v46, %v10488_v26  ;;  %v10547_v9 = vrot.slane %v2697_v42, %v10177_v37  ;;  %v10552_v23 = vrot.slane %v3045_v38, %v10177_v37  ;;  %v8466_v45 = vld.sshfl [vmem:[%s12589_s0 + $0x50] sm:$0x5 pattern:$0x75316420] }
  0x48   :  { %9178 = vmatpush3.bf16.msra.mxu1 %v9880_v62  ;;  %v3048_v20 = vcombine.low %v10528_v57, %v10536_v36  ;;  %v8656_v62 = vpack.i.b16 %v10253_v22, %v10250_v19  ;;  %v8467_v46 = vld.sshfl [vmem:[%s12589_s0 + $0x58] sm:$0x5 pattern:$0x75316420]  ;;  %v10563_v42 = vrot.slane %v2698_v1, %v10177_v37  ;;  %v8658_v17 = vpack.i.b16 %v940_v30, %v302_v4 }
  0x49   :  { %9179 = vmatprep.subr.bf16.mxu1 %v9882_v63  ;;  %12831 = vst [vmem:[#allocation34_spill] sm:$0xff] %v10547_v9  ;;  %12832 = vst [vmem:[#allocation35_spill] sm:$0xff] %v10552_v23  ;;  %v9886_v63 = vld [vmem:[#allocation2 + $0x1e8] sm:$0xff]   ;;  %v3047_v59 = vcombine.low %v10491_v12, %v10543_v33  ;;  %v10568_v38 = vrot.slane %v3046_v56, %v10177_v37  ;;  %9144 = vmatpush3.bf16.msra.mxu0 %v9891_v54 }
  0x4a   :  { %12833 = vst [vmem:[#allocation36_spill] sm:$0xff] %v10563_v42  ;;  %v8468_v19 = vld.sshfl [vmem:[%s12589_s0 + $0x60] sm:$0xfa pattern:$0x75316420]  ;;  %v10577_v1 = vrot.slane %v3048_v20, %v10177_v37  ;;  %v8659_v41 = vpack.i.b16 %v10506_v27, %v304_v34  ;;  %v2476_v12 = vcombine.low %v8656_v62, %v10299_v50  ;;  %9145 = vmatprep.subr.bf16.mxu0 %v9893_v11 }
  0x4b   :  { %12834 = vst [vmem:[#allocation37_spill] sm:$0xff] %v10568_v38  ;;  %v8469_v22 = vld.sshfl [vmem:[%s12589_s0 + $0x68] sm:$0xfa pattern:$0x75316420]  ;;  %v2713_v54 = vcombine.low %v10547_v9, %v10563_v42  ;;  %v10590_v20 = vrot.slane %v3047_v59, %v10177_v37  ;;  %v3077_v34 = vcombine.low %v10552_v23, %v10568_v38  ;;  %v2478_v50 = vcombine.low %v10451_v13, %v10454_v14  ;;  %v9890_v38 = vld [vmem:[#allocation2 + $0x1e0] sm:$0xff]  }
  0x4c   :  { %12835 = vst [vmem:[#allocation38_spill] sm:$0xff] %v10577_v1  ;;  %v8470_v30 = vld.sshfl [vmem:[%s12589_s0 + $0x70] sm:$0x5 pattern:$0x75316420]  ;;  %9180 = vmatpush3.bf16.msra.mxu1 %v9884_v40  ;;  %v9888_v40 = vld [vmem:[#allocation2 + $0x1a8] sm:$0xff]   ;;  %v2477_v62 = vcombine.low %v8658_v17, %v8659_v41  ;;  %v12836_v59 = vcombine.low %v10225_v61, %v10241_v15  ;;  %v10609_v42 = vrot.slane %v2476_v12, %v10177_v37 }
  0x4d   :  { %v8471_v4 = vld.sshfl [vmem:[%s12589_s0 + $0x78] sm:$0x5 pattern:$0x75316420]  ;;  %v512_v23 = vcombine.low %v10376_v25, %v10390_v39  ;;  %9181 = vmatprep.subr.bf16.mxu1 %v9886_v63  ;;  %4727 = vmatprep.mubr.bf16.mxu0 %v2713_v54  ;;  %v3078_v32 = vcombine.low %v10590_v20, %v10577_v1  ;;  %v10616_v41 = vrot.slane %v3077_v34, %v10177_v37  ;;  %v9892_v15 = vld [vmem:[#allocation2 + $0x1a0] sm:$0xff]   ;;  %v9899_v54 = vld [vmem:[#allocation2 + $0x110] sm:$0xff]  }
  0x4e   :  { %v8472_v56 = vld.sshfl [vmem:[%s12589_s0 + $0x80] sm:$0xfa pattern:$0x75316420]  ;;  %v10606_v9 = vrot.slane %v12836_v59, %v10177_v37  ;;  %12838 = vst [vmem:[#allocation40_spill] sm:$0xff] %v10609_v42  ;;  %v10619_v17 = vrot.slane %v2478_v50, %v10177_v37  ;;  %v544_v61 = vcombine.low %v8466_v45, %v8467_v46  ;;  %v9897_v59 = vld [vmem:[#allocation2 + $0x150] sm:$0xff]   ;;  %v10622_v12 = vrot.slane %v2477_v62, %v10177_v37 }
  0x4f   :  { %v8473_v11 = vld.sshfl [vmem:[%s12589_s0 + $0x88] sm:$0xfa pattern:$0x75316420]  ;;  %12839 = vst [vmem:[#allocation41_spill] sm:$0xff] %v10616_v41  ;;  %v10627_v39 = vrot.slane %v512_v23, %v10177_v37  ;;  %v566_v63 = vcombine.low %v8468_v19, %v8469_v22  ;;  %9146 = vmatpush3.bf16.msra.mxu0 %v9895_v8  ;;  %v10630_v34 = vrot.slane %v3078_v32, %v10177_v37  ;;  %v9894_v62 = vld [vmem:[#allocation2 + $0x1d8] sm:$0xff]  }
  0x50   :  { %12837 = vst [vmem:[#allocation39_spill] sm:$0xff] %v10606_v9  ;;  %12840 = vst [vmem:[#allocation42_spill] sm:$0xff] %v10619_v17  ;;  %v2507_v25 = vcombine.low %v10606_v9, %v10609_v42  ;;  %v10633_v50 = vrot.slane %v544_v61, %v10177_v37  ;;  %v567_v45 = vcombine.high %v8468_v19, %v8469_v22  ;;  %9182 = vmatpush3.bf16.msra.mxu1 %v9888_v40  ;;  %v9901_v32 = vld [vmem:[#allocation2 + $0x148] sm:$0xff]  }
  0x51   :  { %12841 = vst [vmem:[#allocation43_spill] sm:$0xff] %v10630_v34  ;;  %v598_v46 = vcombine.low %v8470_v30, %v8471_v4  ;;  %v2508_v1 = vcombine.low %v10622_v12, %v10619_v17  ;;  %v10641_v23 = vrot.slane %v566_v63, %v10177_v37  ;;  %v620_v8 = vcombine.low %v8472_v56, %v8473_v11  ;;  %v8454_v4 = vld.sshfl [vmem:[%s12589_s0 + $0xc0] sm:$0xff pattern:$0x75316420] }
  0x52   :  { %v10638_v52 = vrot.slane %v2507_v25, %v10177_v37  ;;  %9183 = vmatprep.subr.bf16.mxu1 %v9890_v38  ;;  %v3093_v61 = vcombine.low %v10616_v41, %v10630_v34  ;;  %v10646_v19 = vrot.slane %v567_v45, %v10177_v37  ;;  %v621_v30 = vcombine.high %v8472_v56, %v8473_v11  ;;  %v8455_v56 = vld.sshfl [vmem:[%s12589_s0 + $0xc8] sm:$0xff pattern:$0x75316420]  ;;  %v9896_v11 = vld [vmem:[#allocation2 + $0x198] sm:$0xff]  }
  0x53   :  { %v10649_v22 = vrot.slane %v598_v46, %v10177_v37  ;;  %9147 = vmatprep.subr.bf16.mxu0 %v9897_v59  ;;  %v10655_v40 = vrot.slane %v2508_v1, %v10177_v37  ;;  %v582_v38 = vcombine.high %v10641_v23, %v10641_v23  ;;  %v628_v25 = vrot.slane %v620_v8, %v10177_v37  ;;  %v9898_v8 = vld [vmem:[#allocation2 + $0x1d0] sm:$0xff]   ;;  %v9903_v41 = vld [vmem:[#allocation2 + $0x108] sm:$0xff]  }
  0x54   :  { %12842 = vst [vmem:[#allocation44_spill] sm:$0xff] %v10638_v52  ;;  %v8689_v63 = vcombine.high %v10627_v39, %v10427_v60  ;;  %9148 = vmatpush3.bf16.msra.mxu0 %v9899_v54  ;;  %4791 = vmatprep.mubr.bf16.mxu1 %v3093_v61  ;;  %v583_v59 = vcombine.high %v10646_v19, %v10646_v19  ;;  %v790_v45 = vunpack.i.h.s16 %v10646_v19 }
  0x55   :  { %12843 = vst [vmem:[#allocation45_spill] sm:$0xff] %v10655_v40  ;;  %v10668_v1 = vrot.slane %v621_v30, %v10177_v37  ;;  %v8681_v46 = vpack.i.b16 %v10646_v19, %v10633_v50  ;;  %9184 = vmatpush3.bf16.msra.mxu1 %v9892_v15  ;;  %v2523_v34 = vcombine.low %v10638_v52, %v10655_v40  ;;  %v792_v54 = vunpack.i.h.s16 %v582_v38  ;;  %v9905_v30 = vld [vmem:[#allocation2 + $0x140] sm:$0xff]   ;;  %v9900_v15 = vld [vmem:[#allocation2 + $0x190] sm:$0xff]  }
  0x56   :  { %v10675_v53 = vcombine.high %v628_v25, %v628_v25  ;;  %v10678_v61 = vrot.slane %v8689_v63, %v10177_v37  ;;  %9185 = vmatprep.subr.bf16.mxu1 %v9894_v62  ;;  %9149 = vmatprep.subr.bf16.mxu0 %v9901_v32  ;;  %v794_v44 = vunpack.i.h.s16 %v583_v59  ;;  %v8682_v51 = vpack.i.b16 %v582_v38, %v790_v45  ;;  %v9902_v62 = vld [vmem:[#allocation2 + $0x1c8] sm:$0xff]   ;;  %v9907_v45 = vld [vmem:[#allocation2 + $0x100] sm:$0xff]  }
  0x57   :  { %v10682_v17 = vcombine.high %v10528_v57, %v10528_v57  ;;  %4728 = vmatmul.mubr.bf16.gmra.mxu0 %v2523_v34  ;;  %v8683_v42 = vpack.i.b16 %v583_v59, %v792_v54  ;;  %v10688_v52 = vcombine.high %v10536_v36, %v10536_v36  ;;  %v260_v63 = vcombine.low %v8454_v4, %v8455_v56 }
  0x58   :  { %12844 = vst [vmem:[#allocation46_spill] sm:$0xff] %v10678_v61  ;;  %v2858_v25 = vcombine.low %v10668_v1, %v10675_v53  ;;  %v8684_v32 = vpack.i.b16 %v10649_v22, %v794_v44  ;;  %v2856_v40 = vcombine.low %v8681_v46, %v8682_v51  ;;  %v261_v38 = vcombine.high %v8454_v4, %v8455_v56 }
  0x59   :  { %9186 = vmatpush3.bf16.msra.mxu1 %v9896_v11  ;;  %9150 = vmatpush3.bf16.msra.mxu0 %v9903_v41  ;;  %v10695_v34 = vrot.slane %v260_v63, %v10177_v37  ;;  %v314_v59 = vunpack.i.h.s16 %v10528_v57  ;;  %v12622_v54 = vunpack.i.h.s16 %v10515_v6  ;;  %v2715_v46 = vcombine.low %v10536_v36, %v10682_v17 }
  0x5a   :  { %v10692_v31 = vrot.slane %v2858_v25, %v10177_v37  ;;  %9187 = vmatprep.subr.bf16.mxu1 %v9898_v8  ;;  %9151 = vmatprep.subr.bf16.mxu0 %v9905_v30  ;;  %v2857_v44 = vcombine.low %v8683_v42, %v8684_v32  ;;  %v10702_v51 = vrot.slane %v2856_v40, %v10177_v37  ;;  %v8510_v42 = vld.sshfl [vmem:[%s12589_s0 + $0xe0] sm:$0xff pattern:$0x75316420]  ;;  %v8511_v40 = vld.sshfl [vmem:[%s12589_s0 + $0xe8] sm:$0xff pattern:$0x75316420] }
  0x5b   :  { %v10705_v41 = vrot.slane %v261_v38, %v10177_v37  ;;  %v10709_v4 = vcombine.high %v10695_v34, %v10695_v34  ;;  %v12627_v56 = vunpack.i.h.s16 %v10695_v34  ;;  %v2608_v11 = vpack.i.b16 %v314_v59, %v12622_v54  ;;  %v9904_v32 = vld [vmem:[#allocation2 + $0x188] sm:$0xff]  }
  0x5c   :  { %12845 = vst [vmem:[#allocation47_spill] sm:$0xff] %v10692_v31  ;;  %12846 = vst [vmem:[#allocation48_spill] sm:$0xff] %v10702_v51  ;;  %v10723_v8 = vrot.slane %v2857_v44, %v10177_v37  ;;  %v2887_v30 = vcombine.low %v10678_v61, %v10702_v51  ;;  %v10738_v43 = vrot.slane %v2715_v46, %v10177_v37  ;;  %v9906_v61 = vld [vmem:[#allocation2 + $0x1c0] sm:$0xff]  }
  0x5d   :  { %12847 = vst [vmem:[#allocation49_spill] sm:$0xff] %v10709_v4  ;;  %v10729_v25 = vcombine.high %v10705_v41, %v10705_v41  ;;  %v323_v63 = vunpack.i.h.s16 %v10705_v41  ;;  %9188 = vmatpush3.bf16.msra.mxu1 %v9900_v15  ;;  %9152 = vmatpush3.bf16.msra.mxu0 %v9907_v45  ;;  %v325_v38 = vunpack.i.h.s16 %v10709_v4  ;;  %v8673_v54 = vpack.i.b16 %v10705_v41, %v12627_v56 }
  0x5e   :  { %12848 = vst [vmem:[#allocation50_spill] sm:$0xff] %v10723_v8  ;;  %v2714_v44 = vcombine.low %v10543_v33, %v2608_v11  ;;  %12850 = vst [vmem:[#allocation52_spill] sm:$0xff] %v10738_v43  ;;  %9189 = vmatprep.subr.bf16.mxu1 %v9902_v62  ;;  %9745 = vmatprep.subr.bf16.mxu0 %v10699_v5  ;;  %v2888_v15 = vcombine.low %v10723_v8, %v10692_v31  ;;  %v8474_v31 = vld.sshfl [vmem:[%s12589_s0 + $0x90] sm:$0x5 pattern:$0x75316420] }
  0x5f   :  { %12849 = vst [vmem:[#allocation51_spill] sm:$0xff] %v10729_v25  ;;  %v10744_v45 = vrot.slane %v2887_v30, %v10177_v37  ;;  %v8674_v51 = vpack.i.b16 %v10709_v4, %v323_v63  ;;  %v10748_v0 = vpack.i.b16 %v10729_v25, %v325_v38  ;;  %v2716_v33 = vcombine.low %v10688_v52, %v8673_v54 }
  0x60   :  { %v10752_v11 = vrot.slane %v2714_v44, %v10177_v37  ;;  %v10755_v62 = vrot.slane %v2888_v15, %v10177_v37  ;;  %v1052_v46 = vcombine.low %v8510_v42, %v8511_v40  ;;  %v1053_v56 = vcombine.high %v8510_v42, %v8511_v40  ;;  %v9908_v44 = vld [vmem:[#allocation2 + $0x180] sm:$0xff]   ;;  %v9910_v40 = vld [vmem:[#allocation2 + $0x2b8] sm:$0xff]  }
  0x61   :  { %12851 = vst [vmem:[#allocation53_spill] sm:$0xff] %v10744_v45  ;;  %12852 = vst [vmem:[#allocation54_spill] sm:$0xff] %v10748_v0  ;;  %v3095_v49 = vcombine.low %v8673_v54, %v8674_v51  ;;  %9190 = vmatpush3.bf16.msra.mxu1 %v9904_v32  ;;  %v2717_v30 = vcombine.low %v8674_v51, %v10748_v0  ;;  %v10759_v8 = vrot.slane %v2716_v33, %v10177_v37 }
  0x62   :  { %12853 = vst [vmem:[#allocation55_spill] sm:$0xff] %v10752_v11  ;;  %12854 = vst [vmem:[#allocation56_spill] sm:$0xff] %v10755_v62  ;;  %v2746_v63 = vcombine.low %v10752_v11, %v10738_v43  ;;  %v8699_v38 = vpack.i.b16 %v10695_v34, %v10688_v52  ;;  %9191 = vmatprep.subr.bf16.mxu1 %v9906_v61  ;;  %v2903_v15 = vcombine.low %v10744_v45, %v10755_v62  ;;  %v8475_v11 = vld.sshfl [vmem:[%s12589_s0 + $0x98] sm:$0x5 pattern:$0x75316420] }
  0x63   :  { %12855 = vst [vmem:[#allocation57_spill] sm:$0xff] %v10759_v8  ;;  %v10768_v42 = vrot.slane %v1052_v46, %v10177_v37  ;;  %v10771_v54 = vrot.slane %v1053_v56, %v10177_v37  ;;  %v10774_v51 = vrot.slane %v3095_v49, %v10177_v37  ;;  %v10777_v32 = vrot.slane %v2717_v30, %v10177_v37 }
  0x64   :  { %v10780_v33 = vrot.slane %v2746_v63, %v10177_v37  ;;  %v3094_v61 = vcombine.low %v10682_v17, %v8699_v38  ;;  %v316_v45 = vunpack.i.h.s16 %v10536_v36  ;;  %4792 = vmatmul.mubr.bf16.gmra.mxu1 %v2903_v15  ;;  %v318_v56 = vunpack.i.h.s16 %v10682_v17 }
  0x65   :  { %12856 = vst [vmem:[#allocation58_spill] sm:$0xff] %v10777_v32  ;;  %v10786_v46 = vcombine.high %v10768_v42, %v10768_v42  ;;  %v3096_v49 = vcombine.low %v10748_v0, %v10768_v42  ;;  %v8660_v30 = vpack.i.b16 %v10528_v57, %v10515_v6  ;;  %v2747_v63 = vcombine.low %v10759_v8, %v10777_v32  ;;  %v8476_v57 = vld.sshfl [vmem:[%s12589_s0 + $0xa0] sm:$0xfa pattern:$0x75316420] }
  0x66   :  { %12857 = vst [vmem:[#allocation59_spill] sm:$0xff] %v10780_v33  ;;  %v10796_v38 = vrot.slane %v3094_v61, %v10177_v37  ;;  %v8661_v15 = vpack.i.b16 %v10536_v36, %v314_v59  ;;  %v8662_v62 = vpack.i.b16 %v10682_v17, %v316_v45  ;;  %v8477_v61 = vld.sshfl [vmem:[%s12589_s0 + $0xa8] sm:$0xfa pattern:$0x75316420]  ;;  %9192 = vmatpush3.bf16.msra.mxu1 %v9908_v44 }
  0x67   :  { %v3097_v36 = vcombine.low %v10771_v54, %v10786_v46  ;;  %v10815_v17 = vrot.slane %v3096_v49, %v10177_v37  ;;  %v10818_v59 = vpack.i.b16 %v10688_v52, %v318_v56  ;;  %v2524_v45 = vcombine.low %v10467_v21, %v8660_v30  ;;  %v8478_v8 = vld.sshfl [vmem:[%s12589_s0 + $0xb0] sm:$0x5 pattern:$0x75316420]  ;;  %9229 = vmatprep.subr.bf16.mxu1 %v9910_v40 }
  0x68   :  { %12858 = vst [vmem:[#allocation60_spill] sm:$0xff] %v10796_v38  ;;  %v8479_v32 = vld.sshfl [vmem:[%s12589_s0 + $0xb8] sm:$0x5 pattern:$0x75316420]  ;;  %v10834_v56 = vrot.slane %v2747_v63, %v10177_v37  ;;  %v3126_v30 = vcombine.low %v10796_v38, %v10774_v51  ;;  %v2525_v43 = vcombine.low %v8661_v15, %v8662_v62  ;;  %v2527_v58 = vcombine.low %v10705_v41, %v10709_v4 }
  0x69   :  { %12859 = vst [vmem:[#allocation61_spill] sm:$0xff] %v10815_v17  ;;  %12860 = vst [vmem:[#allocation62_spill] sm:$0xff] %v10818_v59  ;;  %v8480_v44 = vld.sshfl [vmem:[%s12589_s0 + $0xc0] sm:$0xfa pattern:$0x75316420]  ;;  %v10841_v48 = vrot.slane %v3097_v36, %v10177_v37  ;;  %v2526_v18 = vcombine.low %v10818_v59, %v10695_v34  ;;  %v10846_v29 = vrot.slane %v2524_v45, %v10177_v37 }
  0x6a   :  { %v8481_v49 = vld.sshfl [vmem:[%s12589_s0 + $0xc8] sm:$0xfa pattern:$0x75316420]  ;;  %12861 = vst [vmem:[#allocation63_spill] sm:$0xff] %v10834_v56  ;;  %v10850_v40 = vcombine.high %v10668_v1, %v10668_v1  ;;  %v2762_v63 = vcombine.low %v10780_v33, %v10834_v56  ;;  %v10855_v62 = vrot.slane %v3126_v30, %v10177_v37  ;;  %v10858_v15 = vrot.slane %v2525_v43, %v10177_v37 }
  0x6b   :  { %12862 = vst [vmem:[#allocation64_spill] sm:$0xff] %v10841_v48  ;;  %12863 = vst [vmem:[#allocation65_spill] sm:$0xff] %v10846_v29  ;;  %v10861_v36 = vrot.slane %v2527_v58, %v10177_v37  ;;  %v3127_v45 = vcombine.low %v10815_v17, %v10841_v48  ;;  %v10866_v38 = vrot.slane %v2526_v18, %v10177_v37 }
  0x6c   :  { %12864 = vst [vmem:[#allocation66_spill] sm:$0xff] %v10855_v62  ;;  %v652_v24 = vcombine.low %v8474_v31, %v8475_v11  ;;  %v674_v28 = vcombine.low %v8476_v57, %v8477_v61  ;;  %4735 = vmatprep.mubr.bf16.mxu0 %v2762_v63  ;;  %v2556_v33 = vcombine.low %v10846_v29, %v10858_v15 }
  0x6d   :  { %12865 = vst [vmem:[#allocation67_spill] sm:$0xff] %v10861_v36  ;;  %12866 = vst [vmem:[#allocation68_spill] sm:$0xff] %v10866_v38  ;;  %v675_v30 = vcombine.high %v8476_v57, %v8477_v61  ;;  %v706_v56 = vcombine.low %v8478_v8, %v8479_v32  ;;  %v728_v4 = vcombine.low %v8480_v44, %v8481_v49 }
  0x6e   :  { %v10871_v43 = vrot.slane %v3127_v45, %v10177_v37  ;;  %v2557_v58 = vcombine.low %v10866_v38, %v10861_v36  ;;  %v10876_v17 = vrot.slane %v652_v24, %v10177_v37  ;;  %v682_v18 = vrot.slane %v674_v28, %v10177_v37 }
  0x6f   :  { %v10880_v31 = vrot.slane %v2556_v33, %v10177_v37  ;;  %v10883_v11 = vrot.slane %v675_v30, %v10177_v37  ;;  %v10886_v8 = vrot.slane %v706_v56, %v10177_v37  ;;  %v729_v32 = vcombine.high %v8480_v44, %v8481_v49  ;;  %v8482_v33 = vld.sshfl [vmem:[%s12589_s0 + $0xd0] sm:$0x5 pattern:$0x75316420] }
  0x70   :  { %12867 = vst [vmem:[#allocation69_spill] sm:$0xff] %v10871_v43  ;;  %v3142_v57 = vcombine.low %v10855_v62, %v10871_v43  ;;  %v10891_v61 = vrot.slane %v2557_v58, %v10177_v37  ;;  %v10893_v24 = vcombine.high %v682_v18, %v682_v18  ;;  %v10896_v28 = vrot.slane %v728_v4, %v10177_v37  ;;  %v8483_v56 = vld.sshfl [vmem:[%s12589_s0 + $0xd8] sm:$0x5 pattern:$0x75316420] }
  0x71   :  { %12868 = vst [vmem:[#allocation70_spill] sm:$0xff] %v10880_v31  ;;  %v10906_v44 = vcombine.high %v10883_v11, %v10883_v11  ;;  %v10909_v49 = vrot.slane %v729_v32, %v10177_v37  ;;  %v804_v63 = vunpack.i.h.s16 %v10883_v11  ;;  %v8685_v4 = vpack.i.b16 %v10883_v11, %v10876_v17 }
  0x72   :  { %12869 = vst [vmem:[#allocation71_spill] sm:$0xff] %v10891_v61  ;;  %4799 = vmatprep.mubr.bf16.mxu1 %v3142_v57  ;;  %v2572_v45 = vcombine.low %v10880_v31, %v10891_v61  ;;  %v806_v30 = vunpack.i.h.s16 %v10893_v24  ;;  %v12656_v58 = vunpack.i.h.s16 %v10729_v25  ;;  %v10920_v18 = vcombine.high %v10771_v54, %v10771_v54 }
  0x73   :  { %v808_v32 = vunpack.i.h.s16 %v10906_v44  ;;  %v8686_v62 = vpack.i.b16 %v10893_v24, %v804_v63  ;;  %v2904_v43 = vcombine.low %v10850_v40, %v8685_v4  ;;  %v8690_v57 = vcombine.high %v10896_v28, %v10909_v49 }
  0x74   :  { %4736 = vmatmul.mubr.bf16.gmra.mxu0 %v2572_v45  ;;  %v8687_v31 = vpack.i.b16 %v10906_v44, %v806_v30  ;;  %v10931_v61 = vrot.slane %v12656_v58, %v10177_v37  ;;  %v1118_v48 = vunpack.i.l.s16 %v10920_v18  ;;  %v326_v38 = vunpack.i.l.s16 %v10729_v25 }
  0x75   :  { %v8688_v29 = vpack.i.b16 %v10886_v8, %v808_v32  ;;  %v10937_v63 = vrot.slane %v2904_v43, %v10177_v37  ;;  %v10940_v4 = vrot.slane %v8690_v57, %v10177_v37  ;;  %v760_v45 = vcombine.low %v8482_v33, %v8483_v56 }
  0x76   :  { %12870 = vst [vmem:[#allocation72_spill] sm:$0xff] %v10931_v61  ;;  %v2905_v0 = vcombine.low %v8686_v62, %v8687_v31  ;;  %v10944_v30 = vrot.slane %v10931_v61, %v10177_v37  ;;  %v10947_v58 = vrot.slane %v1118_v48, %v10177_v37  ;;  %v10950_v36 = vrot.slane %v326_v38, %v10177_v37  ;;  %v8582_v61 = vld.sshfl [vmem:[%s12589_s0 + $0x40] sm:$0xff pattern:$0x75316420] }
  0x77   :  { %12871 = vst [vmem:[#allocation73_spill] sm:$0xff] %v10937_v63  ;;  %12872 = vst [vmem:[#allocation74_spill] sm:$0xff] %v10940_v4  ;;  %v2906_v32 = vcombine.low %v8688_v29, %v10909_v49  ;;  %v10954_v43 = vrot.slane %v760_v45, %v10177_v37  ;;  %v1266_v57 = vcombine.high %v10627_v39, %v10627_v39  ;;  %v1568_v38 = vunpack.i.h.s16 %v10427_v60 }
  0x78   :  { %12873 = vst [vmem:[#allocation75_spill] sm:$0xff] %v10944_v30  ;;  %12874 = vst [vmem:[#allocation76_spill] sm:$0xff] %v10947_v58  ;;  %v1267_v62 = vcombine.high %v10427_v60, %v10427_v60  ;;  %v10961_v31 = vrot.slane %v2905_v0, %v10177_v37  ;;  %4743 = vmatprep.mubr.bf16.mxu0 %v10944_v30  ;;  %v10966_v48 = vrot.slane %v10947_v58, %v10177_v37 }
  0x79   :  { %12875 = vst [vmem:[#allocation77_spill] sm:$0xff] %v10950_v36  ;;  %v10970_v29 = vrot.slane %v10950_v36, %v10177_v37  ;;  %v10974_v39 = vrot.slane %v2906_v32, %v10177_v37  ;;  %v816_v33 = vunpack.i.l.s16 %v10954_v43  ;;  %v1570_v56 = vunpack.i.h.s16 %v1266_v57 }
  0x7a   :  { %12876 = vst [vmem:[#allocation78_spill] sm:$0xff] %v10961_v31  ;;  %12877 = vst [vmem:[#allocation79_spill] sm:$0xff] %v10966_v48  ;;  %v1572_v0 = vunpack.i.h.s16 %v1267_v62  ;;  %v2936_v45 = vcombine.low %v10937_v63, %v10961_v31  ;;  %v8716_v30 = vpack.i.b16 %v10427_v60, %v10423_v10  ;;  %v8717_v58 = vpack.i.b16 %v1266_v57, %v1568_v38  ;;  %v8583_v10 = vld.sshfl [vmem:[%s12589_s0 + $0x48] sm:$0xff pattern:$0x75316420] }
  0x7b   :  { %12878 = vst [vmem:[#allocation80_spill] sm:$0xff] %v10970_v29  ;;  %12879 = vst [vmem:[#allocation81_spill] sm:$0xff] %v10974_v39  ;;  %v3376_v36 = vcombine.low %v10395_v55, %v10404_v2  ;;  %v2937_v32 = vcombine.low %v10974_v39, %v10940_v4  ;;  %v10989_v59 = vrot.slane %v816_v33, %v10177_v37  ;;  %v8584_v33 = vld.sshfl [vmem:[%s12589_s0 + $0x60] sm:$0xff pattern:$0x75316420] }
  0x7c   :  { %v8718_v25 = vpack.i.b16 %v1267_v62, %v1570_v56  ;;  %v8719_v63 = vpack.i.b16 %v10633_v50, %v1572_v0  ;;  %v10996_v60 = vrot.slane %v2936_v45, %v10177_v37  ;;  %4744 = vmatmul.mubr.bf16.gmra.mxu0 %v10970_v29  ;;  %v3377_v55 = vcombine.low %v10408_v3, %v8716_v30  ;;  %v8585_v30 = vld.sshfl [vmem:[%s12589_s0 + $0x68] sm:$0xff pattern:$0x75316420] }
  0x7d   :  { %12880 = vst [vmem:[#allocation82_spill] sm:$0xff] %v10989_v59  ;;  %v11001_v2 = vrot.slane %v3376_v36, %v10177_v37  ;;  %v11004_v57 = vrot.slane %v2937_v32, %v10177_v37  ;;  %v11008_v50 = vrot.slane %v10989_v59, %v10177_v37  ;;  %v12886_v3 = vcombine.low %v10243_v16, %v10294_v47 }
  0x7e   :  { %12881 = vst [vmem:[#allocation83_spill] sm:$0xff] %v10996_v60  ;;  %v3378_v62 = vcombine.low %v8717_v58, %v8718_v25  ;;  %v3379_v38 = vcombine.low %v8719_v63, %v10646_v19  ;;  %v11015_v56 = vrot.slane %v3377_v55, %v10177_v37  ;;  %v1652_v25 = vcombine.low %v8582_v61, %v8583_v10 }
  0x7f   :  { %12882 = vst [vmem:[#allocation84_spill] sm:$0xff] %v11001_v2  ;;  %12883 = vst [vmem:[#allocation85_spill] sm:$0xff] %v11004_v57  ;;  %v11021_v36 = vrot.slane %v12886_v3, %v10177_v37  ;;  %v2952_v58 = vcombine.low %v10996_v60, %v11004_v57  ;;  %v1653_v45 = vcombine.high %v8582_v61, %v8583_v10 }
  0x80   :  { %12884 = vst [vmem:[#allocation86_spill] sm:$0xff] %v11008_v50  ;;  %12885 = vst [vmem:[#allocation87_spill] sm:$0xff] %v11015_v56  ;;  %v11029_v63 = vrot.slane %v3378_v62, %v10177_v37  ;;  %v11032_v0 = vrot.slane %v3379_v38, %v10177_v37  ;;  %v3408_v16 = vcombine.low %v11001_v2, %v11015_v56 }
  0x81   :  { %12887 = vst [vmem:[#allocation88_spill] sm:$0xff] %v11021_v36  ;;  %v3218_v47 = vcombine.low %v10381_v35, %v11021_v36  ;;  %v3219_v32 = vcombine.low %v10606_v9, %v10337_v7  ;;  %v1660_v55 = vrot.slane %v1652_v25, %v10177_v37  ;;  %4800 = vmatmul.mubr.bf16.gmra.mxu1 %v2952_v58  ;;  %v9912_v7 = vld [vmem:[#allocation2 + $0x230] sm:$0xff]  }
  0x82   :  { %12888 = vst [vmem:[#allocation89_spill] sm:$0xff] %v11029_v63  ;;  %12889 = vst [vmem:[#allocation90_spill] sm:$0xff] %v11032_v0  ;;  %v3409_v62 = vcombine.low %v11029_v63, %v11032_v0  ;;  %v1667_v3 = vrot.slane %v1653_v45, %v10177_v37  ;;  %v1684_v38 = vcombine.low %v8584_v33, %v8585_v30  ;;  %4807 = vmatprep.mubr.bf16.mxu1 %v10966_v48 }
  0x83   :  { %v1685_v29 = vcombine.high %v8584_v33, %v8585_v30  ;;  %v11046_v61 = vrot.slane %v3408_v16, %v10177_v37  ;;  %v11049_v10 = vrot.slane %v3218_v47, %v10177_v37  ;;  %v11052_v60 = vrot.slane %v3219_v32, %v10177_v37 }
  0x84   :  { %v1668_v25 = vcombine.high %v1660_v55, %v1660_v55  ;;  %v11055_v58 = vrot.slane %v3409_v62, %v10177_v37  ;;  %v1669_v57 = vcombine.high %v1667_v3, %v1667_v3  ;;  %v1692_v45 = vrot.slane %v1684_v38, %v10177_v37 }
  0x85   :  { %12890 = vst [vmem:[#allocation91_spill] sm:$0xff] %v11046_v61  ;;  %12891 = vst [vmem:[#allocation92_spill] sm:$0xff] %v11049_v10  ;;  %v1699_v33 = vrot.slane %v1685_v29, %v10177_v37  ;;  %v3234_v30 = vcombine.low %v11049_v10, %v11052_v60  ;;  %v1863_v16 = vunpack.i.h.s16 %v1660_v55  ;;  %v1865_v48 = vunpack.i.h.s16 %v1667_v3 }
  0x86   :  { %12892 = vst [vmem:[#allocation93_spill] sm:$0xff] %v11052_v60  ;;  %12893 = vst [vmem:[#allocation94_spill] sm:$0xff] %v11055_v58  ;;  %v1867_v59 = vunpack.i.h.s16 %v1668_v25  ;;  %v3424_v47 = vcombine.low %v11046_v61, %v11055_v58  ;;  %v1700_v32 = vcombine.high %v1692_v45, %v1692_v45  ;;  %v1870_v4 = vunpack.i.h.s16 %v1692_v45 }
  0x87   :  { %v1701_v39 = vcombine.high %v1699_v33, %v1699_v33  ;;  %v1872_v31 = vunpack.i.h.s16 %v1699_v33  ;;  %v1911_v62 = vunpack.i.h.s16 %v1669_v57  ;;  %v8742_v63 = vpack.i.b16 %v1667_v3, %v1863_v16 }
  0x88   :  { %v8743_v0 = vpack.i.b16 %v1668_v25, %v1865_v48  ;;  %4847 = vmatprep.mubr.bf16.mxu0 %v3424_v47  ;;  %v1874_v38 = vunpack.i.h.s16 %v1700_v32  ;;  %v8731_v2 = vpack.i.b16 %v1699_v33, %v1870_v4  ;;  %v8744_v29 = vpack.i.b16 %v1669_v57, %v1867_v59 }
  0x89   :  { %v3758_v56 = vcombine.low %v1699_v33, %v1700_v32  ;;  %4848 = vmatmul.mubr.bf16.vlgmr.msra.gmra.mxu0 %v3234_v30  ;;  %v8732_v10 = vpack.i.b16 %v1700_v32, %v1872_v31  ;;  %v3734_v60 = vpack.i.b16 %v1870_v4, %v1911_v62  ;;  %v3759_v9 = vcombine.low %v1701_v39, %v10488_v26 }
  0x8a   :  { %v3756_v36 = vcombine.low %v8742_v63, %v8743_v0  ;;  %4808 = vmatmul.mubr.bf16.gmra.mxu1 %v11008_v50  ;;  %v8733_v61 = vpack.i.b16 %v1701_v39, %v1874_v38  ;;  %v8730_v16 = vpack.i.b16 %v1692_v45, %v1669_v57  ;;  %v3566_v48 = vcombine.low %v1660_v55, %v1667_v3 }
  0x8b   :  { %v11066_v58 = vrot.slane %v3758_v56, %v10177_v37  ;;  %v3757_v47 = vcombine.low %v8744_v29, %v3734_v60  ;;  %v11072_v59 = vrot.slane %v3759_v9, %v10177_v37  ;;  %v3568_v31 = vcombine.low %v8731_v2, %v8732_v10  ;;  %9746 = vmatpush3.bf16.msra.mxu0 %v10699_v5  ;;  %v9915_v56 = vld [vmem:[#allocation2 + $0x228] sm:$0xff]  }
  0x8c   :  { %v11069_v35 = vrot.slane %v3756_v36, %v10177_v37  ;;  %v3569_v26 = vcombine.low %v8733_v61, %v10451_v13  ;;  %v3567_v4 = vcombine.low %v1668_v25, %v8730_v16  ;;  %v11077_v39 = vrot.slane %v3566_v48, %v10177_v37  ;;  %9747 = vmatprep.subr.bf16.mxu0 %v9912_v7 }
  0x8d   :  { %12894 = vst [vmem:[#allocation95_spill] sm:$0xff] %v11066_v58  ;;  %12896 = vst [vmem:[#allocation97_spill] sm:$0xff] %v11072_v59  ;;  %v1582_v57 = vunpack.i.h.s16 %v10668_v1  ;;  %v11081_v60 = vrot.slane %v3757_v47, %v10177_v37  ;;  %v3789_v9 = vcombine.low %v11066_v58, %v11072_v59  ;;  %v11086_v2 = vrot.slane %v3568_v31, %v10177_v37  ;;  %v9913_v47 = vld [vmem:[#allocation2 + $0x2b0] sm:$0xff]  }
  0x8e   :  { %12895 = vst [vmem:[#allocation96_spill] sm:$0xff] %v11069_v35  ;;  %v1584_v5 = vunpack.i.h.s16 %v10675_v53  ;;  %v11090_v36 = vrot.slane %v3567_v4, %v10177_v37  ;;  %v11093_v63 = vrot.slane %v3569_v26, %v10177_v37  ;;  %v1586_v0 = vunpack.i.h.s16 %v10850_v40 }
  0x8f   :  { %12897 = vst [vmem:[#allocation98_spill] sm:$0xff] %v11081_v60  ;;  %v8720_v55 = vpack.i.b16 %v10668_v1, %v10649_v22  ;;  %v3788_v3 = vcombine.low %v11069_v35, %v11081_v60  ;;  %v11101_v61 = vrot.slane %v3789_v9, %v10177_v37  ;;  %9748 = vmatpush3.bf16.msra.mxu0 %v9912_v7  ;;  %v9918_v1 = vld [vmem:[#allocation2 + $0x220] sm:$0xff]   ;;  %v1121_v4 = vunpack.i.h.s16 %v10506_v27  ;;  %v9921_v9 = vld [vmem:[#allocation2 + $0x218] sm:$0xff]  }
  0x90   :  { %v8721_v10 = vpack.i.b16 %v10675_v53, %v1582_v57  ;;  %v8722_v25 = vpack.i.b16 %v10850_v40, %v1584_v5  ;;  %v3598_v45 = vcombine.low %v11077_v39, %v11090_v36  ;;  %v3599_v33 = vcombine.low %v11086_v2, %v11093_v63  ;;  %9749 = vmatprep.subr.bf16.mxu0 %v9915_v56  ;;  %v9914_v5 = vld [vmem:[#allocation2 + $0x270] sm:$0xff]   ;;  %v12970_v35 = vld [vmem:[#allocation33_spill] sm:$0xff] }
  0x91   :  { %12898 = vst [vmem:[#allocation99_spill] sm:$0xff] %v11101_v61  ;;  %v8723_v30 = vpack.i.b16 %v10876_v17, %v1586_v0  ;;  %v8728_v22 = vcombine.high %v10641_v23, %v10646_v19  ;;  %v11113_v32 = vrot.slane %v3788_v3, %v10177_v37  ;;  %v3428_v53 = vcombine.low %v10883_v11, %v10893_v24  ;;  %v9911_v19 = vld [vmem:[#allocation2 + $0x278] sm:$0xff]   ;;  %v8588_v11 = vld.sshfl [vmem:[%s12589_s0 + $0xa0] sm:$0xff pattern:$0x75316420] }
  0x92   :  { %v3426_v7 = vcombine.low %v8720_v55, %v8721_v10  ;;  %v11118_v40 = vrot.slane %v3598_v45, %v10177_v37  ;;  %v11121_v62 = vrot.slane %v3599_v33, %v10177_v37  ;;  %v8589_v24 = vld.sshfl [vmem:[%s12589_s0 + $0xa8] sm:$0xff pattern:$0x75316420]  ;;  %v12903_v55 = vunpack.i.h.s16 %v10451_v13 }
  0x93   :  { %12899 = vst [vmem:[#allocation100_spill] sm:$0xff] %v11113_v32  ;;  %v3427_v38 = vcombine.low %v8722_v25, %v8723_v30  ;;  %v11124_v17 = vrot.slane %v8728_v22, %v10177_v37  ;;  %v3804_v23 = vcombine.low %v11113_v32, %v11101_v61  ;;  %v11132_v16 = vrot.slane %v3428_v53, %v10177_v37  ;;  %v9916_v45 = vld [vmem:[#allocation2 + $0x2a8] sm:$0xff]  }
  0x94   :  { %12900 = vst [vmem:[#allocation101_spill] sm:$0xff] %v11118_v40  ;;  %12901 = vst [vmem:[#allocation102_spill] sm:$0xff] %v11121_v62  ;;  %v11129_v29 = vrot.slane %v3426_v7, %v10177_v37  ;;  %9750 = vmatpush3.bf16.msra.mxu0 %v9915_v56  ;;  %v3614_v48 = vcombine.low %v11118_v40, %v11121_v62  ;;  %v8715_v56 = vcombine.high %v10451_v13, %v10454_v14  ;;  %v9924_v13 = vld [vmem:[#allocation2 + $0x210] sm:$0xff]   ;;  %v12929_v61 = vld [vmem:[#allocation54_spill] sm:$0xff] }
  0x95   :  { %v11143_v31 = vrot.slane %v3427_v38, %v10177_v37  ;;  %9751 = vmatprep.subr.bf16.mxu0 %v9918_v1  ;;  %4911 = vmatprep.mubr.bf16.mxu1 %v3804_v23  ;;  %v3171_v3 = vpack.i.b16 %v12903_v55, %v1121_v4  ;;  %v1748_v25 = vcombine.low %v8588_v11, %v8589_v24  ;;  %v9917_v23 = vld [vmem:[#allocation2 + $0x268] sm:$0xff]  }
  0x96   :  { %v3457_v26 = vcombine.low %v11124_v17, %v11129_v29  ;;  %4912 = vmatmul.mubr.bf16.vlgmr.msra.gmra.mxu1 %v3614_v48  ;;  %v11161_v27 = vrot.slane %v8715_v56, %v10177_v37  ;;  %v1749_v30 = vcombine.high %v8588_v11, %v8589_v24  ;;  %v9919_v24 = vld [vmem:[#allocation2 + $0x2a0] sm:$0xff]   ;;  %v9927_v55 = vld [vmem:[#allocation2 + $0x208] sm:$0xff]  }
  0x97   :  { %v3458_v57 = vcombine.low %v11143_v31, %v11132_v16  ;;  %9230 = vmatpush3.bf16.msra.mxu1 %v9911_v19  ;;  %v3236_v33 = vcombine.low %v3171_v3, %v10454_v14  ;;  %v1756_v7 = vrot.slane %v1748_v25, %v10177_v37 }
  0x98   :  { %v11153_v0 = vrot.slane %v3457_v26, %v10177_v37  ;;  %9231 = vmatprep.subr.bf16.mxu1 %v9913_v47  ;;  %9752 = vmatpush3.bf16.msra.mxu0 %v9918_v1  ;;  %v1763_v38 = vrot.slane %v1749_v30, %v10177_v37  ;;  %v3268_v19 = vcombine.low %v11161_v27, %v10858_v15 }
  0x99   :  { %v11158_v10 = vrot.slane %v3458_v57, %v10177_v37  ;;  %9753 = vmatprep.subr.bf16.mxu0 %v9921_v9  ;;  %v11168_v53 = vrot.slane %v3236_v33, %v10177_v37  ;;  %v1884_v11 = vunpack.i.h.s16 %v1756_v7  ;;  %v1764_v1 = vcombine.high %v1756_v7, %v1756_v7 }
  0x9a   :  { %12902 = vst [vmem:[#allocation103_spill] sm:$0xff] %v11153_v0  ;;  %v8754_v47 = vcombine.high %v1756_v7, %v1763_v38  ;;  %v1765_v26 = vcombine.high %v1763_v38, %v1763_v38  ;;  %v11176_v4 = vrot.slane %v3268_v19, %v10177_v37  ;;  %v12906_v57 = vunpack.i.h.s16 %v10515_v6 }
  0x9b   :  { %12904 = vst [vmem:[#allocation104_spill] sm:$0xff] %v11158_v10  ;;  %v3473_v22 = vcombine.low %v11153_v0, %v11158_v10  ;;  %9232 = vmatpush3.bf16.msra.mxu1 %v9914_v5  ;;  %v3267_v48 = vcombine.low %v10622_v12, %v11168_v53  ;;  %v1886_v5 = vunpack.i.h.s16 %v1763_v38  ;;  %v8734_v33 = vpack.i.b16 %v1756_v7, %v10515_v6  ;;  %v9922_v0 = vld [vmem:[#allocation2 + $0x298] sm:$0xff]  }
  0x9c   :  { %9233 = vmatprep.subr.bf16.mxu1 %v9916_v45  ;;  %9754 = vmatpush3.bf16.msra.mxu0 %v9921_v9  ;;  %12905 = vst [vmem:[#allocation105_spill] sm:$0xff] %v11176_v4  ;;  %v3741_v56 = vpack.i.b16 %v1884_v11, %v12906_v57  ;;  %v11184_v25 = vrot.slane %v8754_v47, %v10177_v37  ;;  %v1888_v45 = vunpack.i.h.s16 %v1764_v1  ;;  %v9920_v9 = vld [vmem:[#allocation2 + $0x260] sm:$0xff]  }
  0x9d   :  { %4855 = vmatprep.mubr.bf16.mxu0 %v3473_v22  ;;  %9755 = vmatprep.subr.bf16.mxu0 %v9924_v13  ;;  %v11181_v3 = vrot.slane %v3267_v48, %v10177_v37  ;;  %v8735_v22 = vpack.i.b16 %v1763_v38, %v1884_v11  ;;  %v8736_v19 = vpack.i.b16 %v1764_v1, %v1886_v5  ;;  %v8564_v57 = vld.sshfl [vmem:[%s12589_s0 + $0xe0] sm:$0xfa pattern:$0x75316420] }
  0x9e   :  { %12908 = vst [vmem:[#allocation107_spill] sm:$0xff] %v11184_v25  ;;  %v3806_v30 = vcombine.low %v3741_v56, %v1763_v38  ;;  %v8565_v48 = vld.sshfl [vmem:[%s12589_s0 + $0xe8] sm:$0xfa pattern:$0x75316420]  ;;  %v3838_v6 = vcombine.low %v11184_v25, %v10774_v51  ;;  %v8737_v7 = vpack.i.b16 %v1765_v26, %v1888_v45  ;;  %v3615_v38 = vcombine.low %v10454_v14, %v10467_v21  ;;  %v9930_v56 = vld [vmem:[#allocation2 + $0x200] sm:$0xff]  }
  0x9f   :  { %12907 = vst [vmem:[#allocation106_spill] sm:$0xff] %v11181_v3  ;;  %9234 = vmatpush3.bf16.msra.mxu1 %v9917_v23  ;;  %v3283_v47 = vcombine.low %v11181_v3, %v11176_v4  ;;  %v3616_v11 = vcombine.low %v8734_v33, %v8735_v22  ;;  %v3618_v1 = vcombine.low %v10695_v34, %v10705_v41  ;;  %v1596_v21 = vunpack.i.h.s16 %v10909_v49  ;;  %v9928_v4 = vld [vmem:[#allocation2 + $0x288] sm:$0xff]  }
  0xa0   :  { %9235 = vmatprep.subr.bf16.mxu1 %v9919_v24  ;;  %9756 = vmatpush3.bf16.msra.mxu0 %v9924_v13  ;;  %v11200_v23 = vrot.slane %v3806_v30, %v10177_v37  ;;  %v1482_v24 = vcombine.high %v10896_v28, %v10896_v28  ;;  %v11207_v5 = vrot.slane %v3838_v6, %v10177_v37  ;;  %v9923_v13 = vld [vmem:[#allocation2 + $0x258] sm:$0xff]   ;;  %v9925_v30 = vld [vmem:[#allocation2 + $0x290] sm:$0xff]  }
  0xa1   :  { %9757 = vmatprep.subr.bf16.mxu0 %v9927_v55  ;;  %4856 = vmatmul.mubr.bf16.gmra.mxu0 %v3283_v47  ;;  %v3617_v26 = vcombine.low %v8736_v19, %v8737_v7  ;;  %v11210_v14 = vrot.slane %v3615_v38, %v10177_v37  ;;  %v11216_v45 = vrot.slane %v3616_v11, %v10177_v37 }
  0xa2   :  { %12909 = vst [vmem:[#allocation108_spill] sm:$0xff] %v11200_v23  ;;  %12910 = vst [vmem:[#allocation109_spill] sm:$0xff] %v11207_v5  ;;  %v3837_v41 = vcombine.low %v10590_v20, %v11200_v23  ;;  %v11219_v28 = vrot.slane %v3618_v1, %v10177_v37  ;;  %v1483_v33 = vcombine.high %v10909_v49, %v10909_v49  ;;  %v1598_v47 = vunpack.i.h.s16 %v1482_v24 }
  0xa3   :  { %12911 = vst [vmem:[#allocation110_spill] sm:$0xff] %v11210_v14  ;;  %9236 = vmatpush3.bf16.msra.mxu1 %v9920_v9  ;;  %12912 = vst [vmem:[#allocation111_spill] sm:$0xff] %v11216_v45  ;;  %v11224_v22 = vrot.slane %v3617_v26, %v10177_v37  ;;  %v1520_v9 = vcombine.low %v8564_v57, %v8565_v48  ;;  %v1521_v19 = vcombine.high %v8564_v57, %v8565_v48  ;;  %v9926_v48 = vld [vmem:[#allocation2 + $0x250] sm:$0xff]  }
  0xa4   :  { %12913 = vst [vmem:[#allocation112_spill] sm:$0xff] %v11219_v28  ;;  %9237 = vmatprep.subr.bf16.mxu1 %v9922_v0  ;;  %9758 = vmatpush3.bf16.msra.mxu0 %v9927_v55  ;;  %v11227_v6 = vrot.slane %v3837_v41, %v10177_v37  ;;  %v3647_v7 = vcombine.low %v11210_v14, %v11216_v45  ;;  %v1600_v38 = vunpack.i.h.s16 %v1483_v33  ;;  %v9933_v0 = vld [vmem:[#allocation2 + $0x338] sm:$0xff]  }
  0xa5   :  { %12914 = vst [vmem:[#allocation113_spill] sm:$0xff] %v11224_v22  ;;  %v8724_v11 = vpack.i.b16 %v10909_v49, %v10886_v8  ;;  %9759 = vmatprep.subr.bf16.mxu0 %v9930_v56  ;;  %v3648_v1 = vcombine.low %v11224_v22, %v11219_v28  ;;  %v11236_v26 = vrot.slane %v1520_v9, %v10177_v37 }
  0xa6   :  { %12915 = vst [vmem:[#allocation114_spill] sm:$0xff] %v11227_v6  ;;  %v11239_v55 = vrot.slane %v1521_v19, %v10177_v37  ;;  %v8725_v57 = vpack.i.b16 %v1482_v24, %v1596_v21  ;;  %v3853_v41 = vcombine.low %v11227_v6, %v11207_v5  ;;  %v11244_v3 = vrot.slane %v3647_v7, %v10177_v37  ;;  %v8592_v21 = vld.sshfl [vmem:[%s12589_s0 + $0xe0] sm:$0xff pattern:$0x75316420] }
  0xa7   :  { %9238 = vmatpush3.bf16.msra.mxu1 %v9923_v13  ;;  %v8726_v8 = vpack.i.b16 %v1483_v33, %v1598_v47  ;;  %v8727_v49 = vpack.i.b16 %v10954_v43, %v1600_v38  ;;  %v11248_v9 = vrot.slane %v3648_v1, %v10177_v37  ;;  %v3474_v19 = vcombine.low %v10906_v44, %v8724_v11  ;;  %v8593_v13 = vld.sshfl [vmem:[%s12589_s0 + $0xe8] sm:$0xff pattern:$0x75316420]  ;;  %v8594_v47 = vld.sshfl [vmem:[%s12589_s0 + $0x100] sm:$0xff pattern:$0x75316420] }
  0xa8   :  { %12916 = vst [vmem:[#allocation115_spill] sm:$0xff] %v11244_v3  ;;  %9239 = vmatprep.subr.bf16.mxu1 %v9925_v30  ;;  %v8729_v24 = vcombine.high %v11236_v26, %v11239_v55  ;;  %9760 = vmatpush3.bf16.msra.mxu0 %v9930_v56  ;;  %v1113_v30 = vunpack.i.h.s16 %v10768_v42  ;;  %v1115_v44 = vunpack.i.h.s16 %v10771_v54  ;;  %v8595_v7 = vld.sshfl [vmem:[%s12589_s0 + $0x108] sm:$0xff pattern:$0x75316420]  ;;  %v1117_v42 = vunpack.i.h.s16 %v10786_v46 }
  0xa9   :  { %12917 = vst [vmem:[#allocation116_spill] sm:$0xff] %v11248_v9  ;;  %4919 = vmatprep.mubr.bf16.mxu1 %v3853_v41  ;;  %v3475_v43 = vcombine.low %v8725_v57, %v8726_v8  ;;  %v3476_v33 = vcombine.low %v8727_v49, %v11239_v55  ;;  %9269 = vmatprep.subr.bf16.mxu0 %v9933_v0  ;;  %v9929_v1 = vld [vmem:[#allocation2 + $0x248] sm:$0xff]   ;;  %v1123_v0 = vunpack.i.h.s16 %v10688_v52  ;;  %v9931_v8 = vld [vmem:[#allocation2 + $0x280] sm:$0xff]   ;;  %v12919_v52 = vld [vmem:[#allocation51_spill] sm:$0xff] }
  0xaa   :  { %v3663_v56 = vcombine.low %v11244_v3, %v11248_v9  ;;  %v11271_v38 = vrot.slane %v3474_v19, %v10177_v37  ;;  %v11274_v11 = vrot.slane %v8729_v24, %v10177_v37  ;;  %v8712_v49 = vpack.i.b16 %v10771_v54, %v1113_v30  ;;  %v9932_v54 = vld [vmem:[#allocation2 + $0x240] sm:$0xff]  }
  0xab   :  { %9240 = vmatpush3.bf16.msra.mxu1 %v9926_v48  ;;  %v11278_v57 = vrot.slane %v3475_v43, %v10177_v37  ;;  %v11281_v41 = vrot.slane %v3476_v33, %v10177_v37  ;;  %v8713_v19 = vpack.i.b16 %v10786_v46, %v1115_v44  ;;  %v8714_v24 = vpack.i.b16 %v10920_v18, %v1117_v42  ;;  %v12922_v44 = vld [vmem:[#allocation62_spill] sm:$0xff] }
  0xac   :  { %9241 = vmatprep.subr.bf16.mxu1 %v9928_v4  ;;  %4920 = vmatmul.mubr.bf16.gmra.mxu1 %v3663_v56  ;;  %v12918_v33 = vunpack.i.h.s16 %v10695_v34  ;;  %v1812_v9 = vcombine.low %v8592_v21, %v8593_v13  ;;  %v3286_v4 = vcombine.low %v12919_v52, %v8712_v49  ;;  %v1813_v56 = vcombine.high %v8592_v21, %v8593_v13  ;;  %v9934_v34 = vld [vmem:[#allocation2 + $0x3b8] sm:$0xff]  }
  0xad   :  { %v3506_v48 = vcombine.low %v11271_v38, %v11278_v57  ;;  %v3507_v43 = vcombine.low %v11281_v41, %v11274_v11  ;;  %v3287_v6 = vcombine.low %v8713_v19, %v8714_v24  ;;  %v1844_v5 = vcombine.low %v8594_v47, %v8595_v7 }
  0xae   :  { %v3178_v3 = vpack.i.b16 %v12918_v33, %v1123_v0  ;;  %v1820_v10 = vrot.slane %v1812_v9, %v10177_v37  ;;  %v11303_v0 = vrot.slane %v3286_v4, %v10177_v37  ;;  %v1827_v13 = vrot.slane %v1813_v56, %v10177_v37 }
  0xaf   :  { %9242 = vmatpush3.bf16.msra.mxu1 %v9929_v1  ;;  %v11295_v46 = vrot.slane %v3506_v48, %v10177_v37  ;;  %v11298_v30 = vrot.slane %v3507_v43, %v10177_v37  ;;  %v11306_v21 = vrot.slane %v3287_v6, %v10177_v37  ;;  %v1845_v1 = vcombine.high %v8594_v47, %v8595_v7  ;;  %v12925_v6 = vld [vmem:[#allocation67_spill] sm:$0xff] }
  0xb0   :  { %v3284_v42 = vcombine.low %v12922_v44, %v3178_v3  ;;  %9243 = vmatprep.subr.bf16.mxu1 %v9931_v8  ;;  %12923 = vst [vmem:[#allocation62_spill] sm:$0xff] %v11303_v0  ;;  %v1828_v3 = vcombine.high %v1820_v10, %v1820_v10  ;;  %v1852_v9 = vrot.slane %v1844_v5, %v10177_v37  ;;  %v1898_v43 = vunpack.i.h.s16 %v1820_v10 }
  0xb1   :  { %12920 = vst [vmem:[#allocation51_spill] sm:$0xff] %v11295_v46  ;;  %12921 = vst [vmem:[#allocation117_spill] sm:$0xff] %v11298_v30  ;;  %v3522_v49 = vcombine.low %v11295_v46, %v11298_v30  ;;  %v3317_v8 = vcombine.low %v11303_v0, %v11306_v21  ;;  %v1829_v24 = vcombine.high %v1827_v13, %v1827_v13  ;;  %v1900_v40 = vunpack.i.h.s16 %v1827_v13 }
  0xb2   :  { %12924 = vst [vmem:[#allocation118_spill] sm:$0xff] %v11306_v21  ;;  %v11312_v19 = vrot.slane %v3284_v42, %v10177_v37  ;;  %v1859_v48 = vrot.slane %v1845_v1, %v10177_v37  ;;  %v1860_v7 = vcombine.high %v1852_v9, %v1852_v9  ;;  %v1905_v33 = vunpack.i.h.s16 %v1852_v9  ;;  %v8567_v1 = vld.sshfl [vmem:[%s12589_s0 + $0xf8] sm:$0x5 pattern:$0x75316420] }
  0xb3   :  { %9244 = vmatpush3.bf16.msra.mxu1 %v9932_v54  ;;  %4863 = vmatprep.mubr.bf16.mxu0 %v3522_v49  ;;  %v11321_v4 = vrot.slane %v3317_v8, %v10177_v37  ;;  %v8566_v54 = vld.sshfl [vmem:[%s12589_s0 + $0xf0] sm:$0x5 pattern:$0x75316420]  ;;  %v3855_v30 = vcombine.low %v1827_v13, %v1828_v3  ;;  %v8738_v28 = vpack.i.b16 %v1820_v10, %v12919_v52 }
  0xb4   :  { %v3316_v47 = vcombine.low %v11312_v19, %v12925_v6  ;;  %9309 = vmatprep.subr.bf16.mxu1 %v9934_v34  ;;  %v1861_v56 = vcombine.high %v1859_v48, %v1859_v48  ;;  %v1907_v5 = vunpack.i.h.s16 %v1859_v48  ;;  %v1909_v42 = vunpack.i.h.s16 %v1860_v7 }
  0xb5   :  { %12926 = vst [vmem:[#allocation67_spill] sm:$0xff] %v11321_v4  ;;  %v8751_v46 = vpack.i.b16 %v1859_v48, %v1905_v33  ;;  %v12928_v34 = vunpack.i.h.s16 %v12919_v52  ;;  %v1902_v33 = vunpack.i.h.s16 %v1828_v3  ;;  %v11338_v22 = vrot.slane %v3855_v30, %v10177_v37 }
  0xb6   :  { %v11324_v44 = vrot.slane %v3316_v47, %v10177_v37  ;;  %v8752_v8 = vpack.i.b16 %v1860_v7, %v1907_v5  ;;  %v8753_v62 = vpack.i.b16 %v1861_v56, %v1909_v42  ;;  %v8739_v14 = vpack.i.b16 %v1827_v13, %v1898_v43 }
  0xb7   :  { %v3748_v49 = vpack.i.b16 %v1898_v43, %v12928_v34  ;;  %v3856_v32 = vcombine.low %v1829_v24, %v8751_v46  ;;  %12930 = vst [vmem:[#allocation54_spill] sm:$0xff] %v11338_v22  ;;  %v8740_v34 = vpack.i.b16 %v1828_v3, %v1900_v40  ;;  %v8741_v25 = vpack.i.b16 %v1829_v24, %v1902_v33  ;;  %v12933_v46 = vld [vmem:[#allocation49_spill] sm:$0xff]  ;;  %v8627_v43 = vld.sshfl [vmem:[%s12589_s0 + $0x58] sm:$0x5 pattern:$0x75316420] }
  0xb8   :  { %12927 = vst [vmem:[#allocation119_spill] sm:$0xff] %v11324_v44  ;;  %v3332_v47 = vcombine.low %v11324_v44, %v11321_v4  ;;  %v3857_v45 = vcombine.low %v8752_v8, %v8753_v62  ;;  %v3664_v42 = vcombine.low %v12933_v46, %v8738_v28  ;;  %v3667_v4 = vcombine.low %v1859_v48, %v1860_v7  ;;  %v8626_v7 = vld.sshfl [vmem:[%s12589_s0 + $0x50] sm:$0x5 pattern:$0x75316420] }
  0xb9   :  { %v3854_v50 = vcombine.low %v12929_v61, %v3748_v49  ;;  %v11342_v5 = vrot.slane %v3856_v32, %v10177_v37  ;;  %v1552_v61 = vcombine.low %v8566_v54, %v8567_v1  ;;  %v3665_v49 = vcombine.low %v8739_v14, %v8740_v34  ;;  %v8624_v32 = vld.sshfl [vmem:[%s12589_s0 + $0x40] sm:$0xfa pattern:$0x75316420] }
  0xba   :  { %4864 = vmatmul.mubr.bf16.gmra.mxu0 %v3332_v47  ;;  %v11349_v30 = vrot.slane %v3857_v45, %v10177_v37  ;;  %v3666_v10 = vcombine.low %v8741_v25, %v1852_v9  ;;  %v1125_v52 = vunpack.i.h.s16 %v10920_v18  ;;  %v11361_v62 = vrot.slane %v3664_v42, %v10177_v37  ;;  %v8629_v54 = vld.sshfl [vmem:[%s12589_s0 + $0x68] sm:$0xfa pattern:$0x75316420] }
  0xbb   :  { %12931 = vst [vmem:[#allocation120_spill] sm:$0xff] %v11342_v5  ;;  %v11345_v44 = vrot.slane %v3854_v50, %v10177_v37  ;;  %v8625_v50 = vld.sshfl [vmem:[%s12589_s0 + $0x48] sm:$0xfa pattern:$0x75316420]  ;;  %v11364_v45 = vrot.slane %v3667_v4, %v10177_v37  ;;  %v11367_v25 = vrot.slane %v1552_v61, %v10177_v37  ;;  %v11372_v14 = vrot.slane %v3665_v49, %v10177_v37 }
  0xbc   :  { %12934 = vst [vmem:[#allocation49_spill] sm:$0xff] %v11349_v30  ;;  %12935 = vst [vmem:[#allocation122_spill] sm:$0xff] %v11361_v62  ;;  %v3887_v18 = vcombine.low %v11342_v5, %v11349_v30  ;;  %v11375_v28 = vrot.slane %v3666_v10, %v10177_v37  ;;  %v11378_v13 = vrot.slane %v1125_v52, %v10177_v37  ;;  %v1917_v24 = vunpack.i.h.s16 %v1861_v56  ;;  %v8628_v4 = vld.sshfl [vmem:[%s12589_s0 + $0x60] sm:$0xfa pattern:$0x75316420] }
  0xbd   :  { %12932 = vst [vmem:[#allocation121_spill] sm:$0xff] %v11345_v44  ;;  %v3886_v40 = vcombine.low %v11345_v44, %v11338_v22  ;;  %12936 = vst [vmem:[#allocation123_spill] sm:$0xff] %v11364_v45  ;;  %v1608_v9 = vunpack.i.l.s16 %v11367_v25  ;;  %v1910_v48 = vunpack.i.l.s16 %v1861_v56  ;;  %v3696_v56 = vcombine.low %v11361_v62, %v11372_v14  ;;  %v8630_v33 = vld.sshfl [vmem:[%s12589_s0 + $0x70] sm:$0x5 pattern:$0x75316420] }
  0xbe   :  { %12937 = vst [vmem:[#allocation124_spill] sm:$0xff] %v11372_v14  ;;  %12938 = vst [vmem:[#allocation125_spill] sm:$0xff] %v11375_v28  ;;  %v11397_v1 = vrot.slane %v3887_v18, %v10177_v37  ;;  %v3697_v8 = vcombine.low %v11375_v28, %v11364_v45  ;;  %v11405_v47 = vrot.slane %v11378_v13, %v10177_v37  ;;  %v8631_v34 = vld.sshfl [vmem:[%s12589_s0 + $0x78] sm:$0x5 pattern:$0x75316420] }
  0xbf   :  { %12939 = vst [vmem:[#allocation126_spill] sm:$0xff] %v11378_v13  ;;  %v11381_v3 = vrot.slane %v3886_v40, %v10177_v37  ;;  %v8632_v46 = vld.sshfl [vmem:[%s12589_s0 + $0x80] sm:$0xfa pattern:$0x75316420]  ;;  %v11420_v61 = vrot.slane %v1608_v9, %v10177_v37  ;;  %v11423_v49 = vrot.slane %v1917_v24, %v10177_v37  ;;  %v11426_v10 = vrot.slane %v1910_v48, %v10177_v37 }
  0xc0   :  { %12941 = vst [vmem:[#allocation128_spill] sm:$0xff] %v11397_v1  ;;  %12942 = vst [vmem:[#allocation129_spill] sm:$0xff] %v11405_v47  ;;  %v8633_v42 = vld.sshfl [vmem:[%s12589_s0 + $0x88] sm:$0xfa pattern:$0x75316420]  ;;  %v1988_v52 = vcombine.low %v8624_v32, %v8625_v50  ;;  %v11431_v18 = vrot.slane %v3696_v56, %v10177_v37  ;;  %v11434_v28 = vrot.slane %v3697_v8, %v10177_v37 }
  0xc1   :  { %12940 = vst [vmem:[#allocation127_spill] sm:$0xff] %v11381_v3  ;;  %12943 = vst [vmem:[#allocation130_spill] sm:$0xff] %v11420_v61  ;;  %v3902_v40 = vcombine.low %v11381_v3, %v11397_v1  ;;  %v1989_v45 = vcombine.high %v8624_v32, %v8625_v50  ;;  %v11438_v9 = vrot.slane %v11420_v61, %v10177_v37  ;;  %v8634_v56 = vld.sshfl [vmem:[%s12589_s0 + $0x90] sm:$0x5 pattern:$0x75316420] }
  0xc2   :  { %12944 = vst [vmem:[#allocation131_spill] sm:$0xff] %v11423_v49  ;;  %12945 = vst [vmem:[#allocation132_spill] sm:$0xff] %v11426_v10  ;;  %v11442_v24 = vrot.slane %v11423_v49, %v10177_v37  ;;  %v11446_v48 = vrot.slane %v11426_v10, %v10177_v37  ;;  %v1996_v3 = vrot.slane %v1988_v52, %v10177_v37  ;;  %v8635_v32 = vld.sshfl [vmem:[%s12589_s0 + $0x98] sm:$0x5 pattern:$0x75316420] }
  0xc3   :  { %12946 = vst [vmem:[#allocation133_spill] sm:$0xff] %v11431_v18  ;;  %12947 = vst [vmem:[#allocation134_spill] sm:$0xff] %v11434_v28  ;;  %v8636_v50 = vld.sshfl [vmem:[%s12589_s0 + $0xa0] sm:$0xfa pattern:$0x75316420]  ;;  %4927 = vmatprep.mubr.bf16.mxu1 %v3902_v40  ;;  %v3712_v52 = vcombine.low %v11431_v18, %v11434_v28  ;;  %v2003_v1 = vrot.slane %v1989_v45, %v10177_v37  ;;  %v2020_v10 = vcombine.low %v8626_v7, %v8627_v43 }
  0xc4   :  { %12948 = vst [vmem:[#allocation135_spill] sm:$0xff] %v11438_v9  ;;  %12949 = vst [vmem:[#allocation136_spill] sm:$0xff] %v11442_v24  ;;  %v8637_v8 = vld.sshfl [vmem:[%s12589_s0 + $0xa8] sm:$0xfa pattern:$0x75316420]  ;;  %v2042_v49 = vcombine.low %v8628_v4, %v8629_v54  ;;  %4871 = vmatprep.mubr.bf16.mxu0 %v11438_v9  ;;  %v2004_v62 = vcombine.high %v1996_v3, %v1996_v3  ;;  %v2043_v14 = vcombine.high %v8628_v4, %v8629_v54 }
  0xc5   :  { %12950 = vst [vmem:[#allocation137_spill] sm:$0xff] %v11446_v48  ;;  %v2074_v5 = vcombine.low %v8630_v33, %v8631_v34  ;;  %v2096_v30 = vcombine.low %v8632_v46, %v8633_v42  ;;  %4928 = vmatmul.mubr.bf16.gmra.mxu1 %v3712_v52  ;;  %4872 = vmatmul.mubr.bf16.gmra.mxu0 %v11405_v47  ;;  %v8638_v4 = vld.sshfl [vmem:[%s12589_s0 + $0xb0] sm:$0x5 pattern:$0x75316420] }
  0xc6   :  { %v2005_v44 = vcombine.high %v2003_v1, %v2003_v1  ;;  %v2027_v22 = vrot.slane %v2020_v10, %v10177_v37  ;;  %v2050_v40 = vrot.slane %v2042_v49, %v10177_v37  ;;  %4935 = vmatprep.mubr.bf16.mxu1 %v11442_v24  ;;  %v2057_v45 = vrot.slane %v2043_v14, %v10177_v37  ;;  %v8639_v54 = vld.sshfl [vmem:[%s12589_s0 + $0xb8] sm:$0x5 pattern:$0x75316420]  ;;  %v9939_v61 = vld [vmem:[#allocation2 + $0x2f0] sm:$0xff]  }
  0xc7   :  { %v2081_v7 = vrot.slane %v2074_v5, %v10177_v37  ;;  %v2097_v3 = vcombine.high %v8632_v46, %v8633_v42  ;;  %v2104_v43 = vrot.slane %v2096_v30, %v10177_v37  ;;  %v3946_v34 = vcombine.low %v2003_v1, %v2004_v62  ;;  %v8640_v49 = vld.sshfl [vmem:[%s12589_s0 + $0xc0] sm:$0xfa pattern:$0x75316420] }
  0xc8   :  { %v2058_v33 = vcombine.high %v2050_v40, %v2050_v40  ;;  %v8641_v5 = vld.sshfl [vmem:[%s12589_s0 + $0xc8] sm:$0xfa pattern:$0x75316420]  ;;  %v2128_v14 = vcombine.low %v8634_v56, %v8635_v32  ;;  %v2150_v30 = vcombine.low %v8636_v50, %v8637_v8  ;;  %v2059_v46 = vcombine.high %v2057_v45, %v2057_v45 }
  0xc9   :  { %v2111_v42 = vrot.slane %v2097_v3, %v10177_v37  ;;  %v2360_v10 = vunpack.i.h.s16 %v2057_v45  ;;  %v8755_v52 = vpack.i.b16 %v2057_v45, %v2027_v22  ;;  %v11487_v47 = vrot.slane %v3946_v34, %v10177_v37 }
  0xca   :  { %v2362_v18 = vunpack.i.h.s16 %v2058_v33  ;;  %v2135_v62 = vrot.slane %v2128_v14, %v10177_v37  ;;  %v2151_v1 = vcombine.high %v8636_v50, %v8637_v8  ;;  %v2364_v40 = vunpack.i.h.s16 %v2059_v46 }
  0xcb   :  { %v8756_v24 = vpack.i.b16 %v2058_v33, %v2360_v10  ;;  %v3947_v9 = vcombine.low %v2005_v44, %v8755_v52  ;;  %v8767_v28 = vcombine.high %v2104_v43, %v2111_v42  ;;  %v2158_v56 = vrot.slane %v2150_v30, %v10177_v37  ;;  %v8642_v52 = vld.sshfl [vmem:[%s12589_s0 + $0xd0] sm:$0x5 pattern:$0x75316420] }
  0xcc   :  { %v8757_v23 = vpack.i.b16 %v2059_v46, %v2362_v18  ;;  %v2165_v32 = vrot.slane %v2151_v1, %v10177_v37  ;;  %v2182_v13 = vcombine.low %v8638_v4, %v8639_v54  ;;  %v8758_v3 = vpack.i.b16 %v2081_v7, %v2364_v40  ;;  %v8643_v1 = vld.sshfl [vmem:[%s12589_s0 + $0xd8] sm:$0x5 pattern:$0x75316420] }
  0xcd   :  { %v11493_v22 = vrot.slane %v3947_v9, %v10177_v37  ;;  %v2204_v45 = vcombine.low %v8640_v49, %v8641_v5  ;;  %v2205_v34 = vcombine.high %v8640_v49, %v8641_v5  ;;  %4936 = vmatmul.mubr.bf16.gmra.mxu1 %v11446_v48  ;;  %v2166_v50 = vcombine.high %v2158_v56, %v2158_v56 }
  0xce   :  { %v3948_v14 = vcombine.low %v8756_v24, %v8757_v23  ;;  %v2167_v8 = vcombine.high %v2165_v32, %v2165_v32  ;;  %v2189_v44 = vrot.slane %v2182_v13, %v10177_v37  ;;  %v3949_v43 = vcombine.low %v8758_v3, %v2111_v42 }
  0xcf   :  { %v3978_v18 = vcombine.low %v11487_v47, %v11493_v22  ;;  %v2212_v33 = vrot.slane %v2204_v45, %v10177_v37  ;;  %v11501_v7 = vrot.slane %v2205_v34, %v10177_v37  ;;  %v2374_v4 = vunpack.i.h.s16 %v2165_v32  ;;  %v12954_v45 = vld [vmem:[#allocation8_spill] sm:$0xff]  ;;  %v12955_v34 = vld [vmem:[#allocation5_spill] sm:$0xff] }
  0xd0   :  { %v11504_v9 = vrot.slane %v3948_v14, %v10177_v37  ;;  %v2376_v54 = vunpack.i.h.s16 %v2166_v50  ;;  %v2378_v49 = vunpack.i.h.s16 %v2167_v8  ;;  %v11507_v23 = vrot.slane %v3949_v43, %v10177_v37  ;;  %v8648_v14 = vld.sshfl [vmem:[%s12589_s0 + $0x100] sm:$0xfa pattern:$0x75316420]  ;;  %v12956_v43 = vld [vmem:[#allocation18_spill] sm:$0xff] }
  0xd1   :  { %v11510_v13 = vrot.slane %v3978_v18, %v10177_v37  ;;  %v2220_v24 = vcombine.high %v2212_v33, %v2212_v33  ;;  %v8759_v5 = vpack.i.b16 %v2165_v32, %v2135_v62  ;;  %v8760_v30 = vpack.i.b16 %v2166_v50, %v2374_v4  ;;  %v12952_v62 = vld [vmem:[#allocation7_spill] sm:$0xff]  ;;  %v12953_v32 = vld [vmem:[#allocation6_spill] sm:$0xff]  ;;  %v12957_v18 = vld [vmem:[#allocation20_spill] sm:$0xff] }
  0xd2   :  { %v8761_v46 = vpack.i.b16 %v2167_v8, %v2376_v54  ;;  %v8762_v42 = vpack.i.b16 %v2189_v44, %v2378_v49  ;;  %v11513_v10 = vrot.slane %v8767_v28, %v10177_v37  ;;  %v3979_v40 = vcombine.low %v11504_v9, %v11507_v23  ;;  %v8649_v50 = vld.sshfl [vmem:[%s12589_s0 + $0x108] sm:$0xfa pattern:$0x75316420]  ;;  %v12960_v54 = vld [vmem:[#allocation21_spill] sm:$0xff]  ;;  %v12961_v49 = vld [vmem:[#allocation19_spill] sm:$0xff] }
  0xd3   :  { %12951 = vst [vmem:[#allocation138_spill] sm:$0xff] %v11510_v13  ;;  %v3998_v56 = vcombine.low %v11501_v7, %v2220_v24  ;;  %v5070_v3 = vcombine.high %v12953_v32, %v12952_v62  ;;  %v5071_v28 = vcombine.high %v12955_v34, %v12954_v45  ;;  %v3996_v8 = vcombine.low %v8759_v5, %v8760_v30 }
  0xd4   :  { %v3997_v44 = vcombine.low %v8761_v46, %v8762_v42  ;;  %v12958_v33 = vcombine.high %v12956_v43, %v12957_v18  ;;  %v12962_v24 = vcombine.high %v12960_v54, %v12961_v49  ;;  %v11547_v32 = vrot.slane %v3979_v40, %v10177_v37  ;;  %v9938_v49 = vld [vmem:[#allocation2 + $0x3b0] sm:$0xff]  }
  0xd5   :  { %v11550_v45 = vrot.slane %v3998_v56, %v10177_v37  ;;  %v11553_v5 = vrot.slane %v5070_v3, %v10177_v37  ;;  %v11556_v30 = vrot.slane %v5071_v28, %v10177_v37  ;;  %v11559_v46 = vrot.slane %v3996_v8, %v10177_v37  ;;  %v8650_v56 = vld.sshfl [vmem:[%s12589_s0 + $0x110] sm:$0x5 pattern:$0x75316420] }
  0xd6   :  { %v11538_v4 = vrot.slane %v12958_v33, %v10177_v37  ;;  %v11544_v62 = vrot.slane %v12962_v24, %v10177_v37  ;;  %12964 = vst [vmem:[#allocation8_spill] sm:$0xff] %v11547_v32  ;;  %v11562_v42 = vrot.slane %v3997_v44, %v10177_v37  ;;  %v2221_v40 = vcombine.high %v11501_v7, %v11501_v7  ;;  %v8651_v3 = vld.sshfl [vmem:[%s12589_s0 + $0x118] sm:$0x5 pattern:$0x75316420] }
  0xd7   :  { %12965 = vst [vmem:[#allocation5_spill] sm:$0xff] %v11553_v5  ;;  %12966 = vst [vmem:[#allocation18_spill] sm:$0xff] %v11556_v30  ;;  %v3994_v28 = vcombine.low %v11510_v13, %v11547_v32  ;;  %v5086_v8 = vcombine.low %v11553_v5, %v11556_v30  ;;  %v9936_v44 = vld [vmem:[#allocation2 + $0x378] sm:$0xff]   ;;  %v2236_v43 = vcombine.low %v8642_v52, %v8643_v1  ;;  %v9937_v32 = vld [vmem:[#allocation2 + $0x330] sm:$0xff]  }
  0xd8   :  { %12959 = vst [vmem:[#allocation7_spill] sm:$0xff] %v11538_v4  ;;  %12963 = vst [vmem:[#allocation6_spill] sm:$0xff] %v11544_v62  ;;  %v5023_v34 = vcombine.low %v11538_v4, %v11544_v62  ;;  %v2274_v18 = vcombine.high %v11236_v26, %v11236_v26  ;;  %v4027_v7 = vcombine.low %v11513_v10, %v11559_v46  ;;  %v9935_v62 = vld [vmem:[#allocation2 + $0x2f8] sm:$0xff]   ;;  %v12967_v26 = vunpack.i.h.s16 %v11239_v55 }
  0xd9   :  { %v4028_v33 = vcombine.low %v11562_v42, %v11550_v45  ;;  %v2275_v24 = vcombine.high %v11239_v55, %v11239_v55  ;;  %v2312_v4 = vcombine.low %v8648_v14, %v8649_v50  ;;  %9761 = vmatprep.mubr.bf16.mxu0 %v3994_v28  ;;  %6183 = vmatprep.mubr.bf16.mxu1 %v5086_v8  ;;  %v9940_v8 = vld [vmem:[#allocation2 + $0x370] sm:$0xff]  }
  0xda   :  { %v2243_v5 = vrot.slane %v2236_v43, %v10177_v37  ;;  %v2313_v52 = vcombine.high %v8648_v14, %v8649_v50  ;;  %v2390_v1 = vunpack.i.h.s16 %v2274_v18  ;;  %v8764_v30 = vpack.i.b16 %v2274_v18, %v12967_v26  ;;  %6184 = vmatmul.mubr.bf16.vlgmr.msra.gmra.mxu1 %v5023_v34  ;;  %v12969_v34 = vld [vmem:[#allocation30_spill] sm:$0xff] }
  0xdb   :  { %v11590_v48 = vrot.slane %v4027_v7, %v10177_v37  ;;  %v11593_v13 = vrot.slane %v4028_v33, %v10177_v37  ;;  %v2320_v58 = vrot.slane %v2312_v4, %v10177_v37  ;;  %v2392_v28 = vunpack.i.h.s16 %v2275_v24  ;;  %9310 = vmatpush3.bf16.msra.mxu1 %v9936_v44  ;;  %v12968_v33 = vld [vmem:[#allocation32_spill] sm:$0xff]  ;;  %v12971_v4 = vld [vmem:[#allocation31_spill] sm:$0xff]  ;;  %v9942_v44 = vld [vmem:[#allocation2 + $0x3a8] sm:$0xff]  }
  0xdc   :  { %v2327_v43 = vrot.slane %v2313_v52, %v10177_v37  ;;  %v8763_v14 = vpack.i.b16 %v11239_v55, %v2243_v5  ;;  %v8765_v50 = vpack.i.b16 %v2275_v24, %v2390_v1  ;;  %v2344_v59 = vcombine.low %v8650_v56, %v8651_v3  ;;  %9311 = vmatprep.subr.bf16.mxu1 %v9938_v49  ;;  %v9941_v3 = vld [vmem:[#allocation2 + $0x328] sm:$0xff]   ;;  %v12974_v49 = vld [vmem:[#allocation40_spill] sm:$0xff]  ;;  %v12975_v24 = vld [vmem:[#allocation39_spill] sm:$0xff] }
  0xdd   :  { %v4043_v18 = vcombine.low %v11590_v48, %v11593_v13  ;;  %v8766_v7 = vpack.i.b16 %v11367_v25, %v2392_v28  ;;  %v5087_v26 = vcombine.high %v12969_v34, %v12968_v33  ;;  %v5088_v60 = vcombine.high %v12971_v4, %v12970_v35  ;;  %v9943_v34 = vld [vmem:[#allocation2 + $0x2e8] sm:$0xff]   ;;  %v12983_v4 = vld [vmem:[#allocation57_spill] sm:$0xff] }
  0xde   :  { %v4044_v0 = vcombine.low %v2221_v40, %v8763_v14  ;;  %v4045_v52 = vcombine.low %v8764_v30, %v8765_v50  ;;  %v8768_v21 = vcombine.high %v2320_v58, %v2327_v43  ;;  %v2351_v55 = vrot.slane %v2344_v59, %v10177_v37  ;;  %v9944_v40 = vld [vmem:[#allocation2 + $0x368] sm:$0xff]   ;;  %v12980_v50 = vld [vmem:[#allocation55_spill] sm:$0xff] }
  0xdf   :  { %9762 = vmatmul.mubr.bf16.vlgmr.msra.gmra.mxu0 %v4043_v18  ;;  %v4046_v5 = vcombine.low %v8766_v7, %v2327_v43  ;;  %v11607_v56 = vrot.slane %v5087_v26, %v10177_v37  ;;  %v11610_v25 = vrot.slane %v5088_v60, %v10177_v37  ;;  %v5024_v1 = vcombine.high %v12975_v24, %v12974_v49  ;;  %v12982_v26 = vld [vmem:[#allocation58_spill] sm:$0xff]  ;;  %v9948_v49 = vld [vmem:[#allocation2 + $0x360] sm:$0xff]  }
  0xe0   :  { %9270 = vmatpush3.bf16.msra.mxu0 %v9935_v62  ;;  %9312 = vmatpush3.bf16.msra.mxu1 %v9940_v8  ;;  %v11615_v35 = vrot.slane %v4044_v0, %v10177_v37  ;;  %v11618_v58 = vrot.slane %v4045_v52, %v10177_v37  ;;  %v11621_v59 = vrot.slane %v8768_v21, %v10177_v37  ;;  %v2400_v30 = vunpack.i.l.s16 %v2351_v55  ;;  %v12976_v62 = vld [vmem:[#allocation42_spill] sm:$0xff]  ;;  %v9946_v8 = vld [vmem:[#allocation2 + $0x3a0] sm:$0xff]  }
  0xe1   :  { %12972 = vst [vmem:[#allocation20_spill] sm:$0xff] %v11607_v56  ;;  %12973 = vst [vmem:[#allocation21_spill] sm:$0xff] %v11610_v25  ;;  %9271 = vmatprep.subr.bf16.mxu0 %v9937_v32  ;;  %v11624_v60 = vrot.slane %v4046_v5, %v10177_v37  ;;  %v5103_v28 = vcombine.low %v11607_v56, %v11610_v25  ;;  %9313 = vmatprep.subr.bf16.mxu1 %v9942_v44  ;;  %v12979_v32 = vld [vmem:[#allocation52_spill] sm:$0xff]  ;;  %v12984_v52 = vld [vmem:[#allocation65_spill] sm:$0xff] }
  0xe2   :  { %v5025_v0 = vcombine.high %v10622_v12, %v12976_v62  ;;  %v4076_v43 = vcombine.low %v11615_v35, %v11618_v58  ;;  %v11633_v21 = vrot.slane %v2400_v30, %v10177_v37  ;;  %v11636_v14 = vrot.slane %v5024_v1, %v10177_v37  ;;  %v9945_v62 = vld [vmem:[#allocation2 + $0x320] sm:$0xff]   ;;  %v9966_v25 = vld [vmem:[#allocation2 + $0x478] sm:$0xff]  }
  0xe3   :  { %v5104_v18 = vcombine.high %v12980_v50, %v12979_v32  ;;  %v4077_v7 = vcombine.low %v11624_v60, %v11621_v59  ;;  %6191 = vmatprep.mubr.bf16.mxu1 %v5103_v28  ;;  %v5105_v44 = vcombine.high %v12983_v4, %v12982_v26  ;;  %v5041_v55 = vcombine.high %v12984_v52, %v10858_v15  ;;  %v12990_v26 = vld [vmem:[#allocation12_spill] sm:$0xff]  ;;  %v12991_v4 = vld [vmem:[#allocation9_spill] sm:$0xff]  ;;  %v12992_v52 = vld [vmem:[#allocation14_spill] sm:$0xff] }
  0xe4   :  { %12977 = vst [vmem:[#allocation19_spill] sm:$0xff] %v11633_v21  ;;  %12978 = vst [vmem:[#allocation32_spill] sm:$0xff] %v11636_v14  ;;  %v11643_v33 = vrot.slane %v5025_v0, %v10177_v37  ;;  %9272 = vmatpush3.bf16.msra.mxu0 %v9939_v61  ;;  %v11650_v5 = vrot.slane %v4076_v43, %v10177_v37  ;;  %9314 = vmatpush3.bf16.msra.mxu1 %v9944_v40  ;;  %v9947_v40 = vld [vmem:[#allocation2 + $0x2e0] sm:$0xff]   ;;  %v12988_v43 = vld [vmem:[#allocation68_spill] sm:$0xff] }
  0xe5   :  { %v11653_v1 = vrot.slane %v5104_v18, %v10177_v37  ;;  %v11656_v30 = vrot.slane %v4077_v7, %v10177_v37  ;;  %9273 = vmatprep.subr.bf16.mxu0 %v9941_v3  ;;  %9315 = vmatprep.subr.bf16.mxu1 %v9946_v8  ;;  %v11661_v0 = vrot.slane %v5105_v44, %v10177_v37  ;;  %v9949_v18 = vld [vmem:[#allocation2 + $0x318] sm:$0xff]  }
  0xe6   :  { %12981 = vst [vmem:[#allocation30_spill] sm:$0xff] %v11643_v33  ;;  %v5040_v28 = vcombine.low %v11636_v14, %v11643_v33  ;;  %v11665_v61 = vrot.slane %v11633_v21, %v10177_v37  ;;  %v5042_v32 = vcombine.high %v12988_v43, %v12925_v6  ;;  %v11670_v50 = vrot.slane %v5041_v55, %v10177_v37  ;;  %v9950_v7 = vld [vmem:[#allocation2 + $0x398] sm:$0xff]   ;;  %v12993_v21 = vld [vmem:[#allocation13_spill] sm:$0xff] }
  0xe7   :  { %12985 = vst [vmem:[#allocation33_spill] sm:$0xff] %v11653_v1  ;;  %12986 = vst [vmem:[#allocation31_spill] sm:$0xff] %v11661_v0  ;;  %v4092_v3 = vcombine.low %v11650_v5, %v11656_v30  ;;  %v5120_v8 = vcombine.low %v11653_v1, %v11661_v0  ;;  %v5196_v44 = vcombine.high %v12991_v4, %v12990_v26  ;;  %v9952_v43 = vld [vmem:[#allocation2 + $0x358] sm:$0xff]   ;;  %v9954_v1 = vld [vmem:[#allocation2 + $0x390] sm:$0xff]  }
  0xe8   :  { %12987 = vst [vmem:[#allocation40_spill] sm:$0xff] %v11665_v61  ;;  %12989 = vst [vmem:[#allocation39_spill] sm:$0xff] %v11670_v50  ;;  %6192 = vmatmul.mubr.bf16.gmra.mxu1 %v5040_v28  ;;  %v5197_v14 = vcombine.high %v12993_v21, %v12992_v52  ;;  %9274 = vmatpush3.bf16.msra.mxu0 %v9943_v34  ;;  %v11681_v55 = vrot.slane %v5042_v32, %v10177_v37  ;;  %v12995_v33 = vld [vmem:[#allocation72_spill] sm:$0xff]  ;;  %v12999_v34 = vld [vmem:[#allocation25_spill] sm:$0xff] }
  0xe9   :  { %9316 = vmatpush3.bf16.msra.mxu1 %v9948_v49  ;;  %v5121_v28 = vcombine.high %v12995_v33, %v12995_v33  ;;  %9765 = vmatprep.mubr.bf16.mxu0 %v4092_v3  ;;  %v11686_v0 = vrot.slane %v5196_v44, %v10177_v37  ;;  %v12998_v21 = vld [vmem:[#allocation24_spill] sm:$0xff]  ;;  %v13002_v33 = vld [vmem:[#allocation26_spill] sm:$0xff]  ;;  %v13003_v32 = vld [vmem:[#allocation27_spill] sm:$0xff] }
  0xea   :  { %12994 = vst [vmem:[#allocation42_spill] sm:$0xff] %v11681_v55  ;;  %9275 = vmatprep.subr.bf16.mxu0 %v9945_v62  ;;  %v11689_v26 = vrot.slane %v5197_v14, %v10177_v37  ;;  %v13000_v49 = vcombine.high %v12998_v21, %v12999_v34  ;;  %9766 = vmatmul.mubr.bf16.gmra.mxu0 %v11665_v61  ;;  %v9951_v44 = vld [vmem:[#allocation2 + $0x2d8] sm:$0xff]  }
  0xeb   :  { %12996 = vst [vmem:[#allocation52_spill] sm:$0xff] %v11686_v0  ;;  %6199 = vmatprep.mubr.bf16.mxu1 %v5120_v8  ;;  %v13004_v62 = vcombine.high %v13002_v33, %v13003_v32  ;;  %9317 = vmatprep.subr.bf16.mxu1 %v9950_v7  ;;  %v5057_v14 = vcombine.low %v11670_v50, %v11681_v55  ;;  %v13006_v21 = vld [vmem:[#allocation88_spill] sm:$0xff]  ;;  %v9956_v8 = vld [vmem:[#allocation2 + $0x350] sm:$0xff]  }
  0xec   :  { %12997 = vst [vmem:[#allocation55_spill] sm:$0xff] %v11689_v26  ;;  %v11695_v4 = vrot.slane %v13000_v49, %v10177_v37  ;;  %v5212_v52 = vcombine.low %v11686_v0, %v11689_v26  ;;  %v5259_v34 = vcombine.high %v12960_v54, %v13006_v21  ;;  %9276 = vmatpush3.bf16.msra.mxu0 %v9947_v40  ;;  %v13007_v7 = vld [vmem:[#allocation15_spill] sm:$0xff]  ;;  %v13010_v54 = vld [vmem:[#allocation84_spill] sm:$0xff]  ;;  %v13012_v21 = vld [vmem:[#allocation89_spill] sm:$0xff] }
  0xed   :  { %v11702_v3 = vrot.slane %v13004_v62, %v10177_v37  ;;  %9318 = vmatpush3.bf16.msra.mxu1 %v9952_v43  ;;  %v5260_v32 = vcombine.high %v12975_v24, %v13007_v7  ;;  %9277 = vmatprep.subr.bf16.mxu0 %v9949_v18  ;;  %v9953_v62 = vld [vmem:[#allocation2 + $0x310] sm:$0xff]   ;;  %v11717_v61 = vrot.slane %v5121_v28, %v10177_v37  ;;  %v13011_v43 = vld [vmem:[#allocation90_spill] sm:$0xff]  ;;  %v13015_v18 = vld [vmem:[#allocation77_spill] sm:$0xff] }
  0xee   :  { %13001 = vst [vmem:[#allocation58_spill] sm:$0xff] %v11695_v4  ;;  %9319 = vmatprep.subr.bf16.mxu1 %v9954_v1  ;;  %v13009_v0 = vld [vmem:[#allocation87_spill] sm:$0xff]  ;;  %v5323_v26 = vcombine.high %v13012_v21, %v13011_v43  ;;  %v9958_v49 = vld [vmem:[#allocation2 + $0x388] sm:$0xff]   ;;  %6247 = vmatprep.mubr.bf16.mxu0 %v5212_v52  ;;  %v11724_v33 = vrot.slane %v5259_v34, %v10177_v37  ;;  %v9962_v52 = vld [vmem:[#allocation2 + $0x380] sm:$0xff]  }
  0xef   :  { %13005 = vst [vmem:[#allocation57_spill] sm:$0xff] %v11702_v3  ;;  %13008 = vst [vmem:[#allocation65_spill] sm:$0xff] %v11717_v61  ;;  %v5322_v40 = vcombine.high %v13010_v54, %v13009_v0  ;;  %v9955_v50 = vld [vmem:[#allocation2 + $0x2d0] sm:$0xff]   ;;  %v11727_v24 = vrot.slane %v5260_v32, %v10177_v37  ;;  %v9957_v1 = vld [vmem:[#allocation2 + $0x308] sm:$0xff]   ;;  %v5058_v28 = vcombine.high %v13015_v18, %v13015_v18 }
  0xf0   :  { %13013 = vst [vmem:[#allocation68_spill] sm:$0xff] %v11724_v33  ;;  %6200 = vmatmul.mubr.bf16.gmra.mxu1 %v5057_v14  ;;  %9278 = vmatpush3.bf16.msra.mxu0 %v9951_v44  ;;  %v9960_v0 = vld [vmem:[#allocation2 + $0x348] sm:$0xff]   ;;  %v11738_v32 = vrot.slane %v5323_v26, %v10177_v37  ;;  %v13019_v54 = vld [vmem:[#allocation35_spill] sm:$0xff]  ;;  %v13021_v7 = vld [vmem:[#allocation48_spill] sm:$0xff] }
  0xf1   :  { %13014 = vst [vmem:[#allocation12_spill] sm:$0xff] %v11727_v24  ;;  %9320 = vmatpush3.bf16.msra.mxu1 %v9956_v8  ;;  %9279 = vmatprep.subr.bf16.mxu0 %v9953_v62  ;;  %v11735_v34 = vrot.slane %v5322_v40, %v10177_v37  ;;  %v11741_v14 = vrot.slane %v5058_v28, %v10177_v37  ;;  %v9959_v44 = vld [vmem:[#allocation2 + $0x2c8] sm:$0xff]   ;;  %v13018_v8 = vld [vmem:[#allocation37_spill] sm:$0xff]  ;;  %v13023_v55 = vld [vmem:[#allocation47_spill] sm:$0xff] }
  0xf2   :  { %6207 = vmatprep.mubr.bf16.mxu1 %v11717_v61  ;;  %13016 = vst [vmem:[#allocation9_spill] sm:$0xff] %v11738_v32  ;;  %9321 = vmatprep.subr.bf16.mxu1 %v9958_v49  ;;  %v5213_v43 = vcombine.high %v13019_v54, %v13018_v8  ;;  %v9964_v62 = vld [vmem:[#allocation2 + $0x340] sm:$0xff]   ;;  %v13020_v21 = vld [vmem:[#allocation38_spill] sm:$0xff]  ;;  %v13025_v54 = vld [vmem:[#allocation60_spill] sm:$0xff] }
  0xf3   :  { %13017 = vst [vmem:[#allocation14_spill] sm:$0xff] %v11741_v14  ;;  %v5214_v18 = vcombine.high %v10590_v20, %v13020_v21  ;;  %v13022_v40 = vld [vmem:[#allocation46_spill] sm:$0xff]  ;;  %v9961_v49 = vld [vmem:[#allocation2 + $0x300] sm:$0xff]   ;;  %v5338_v28 = vcombine.low %v11735_v34, %v11738_v32 }
  0xf4   :  { %9280 = vmatpush3.bf16.msra.mxu0 %v9955_v50  ;;  %v5150_v61 = vcombine.high %v13022_v40, %v13021_v7  ;;  %v13024_v26 = vld [vmem:[#allocation50_spill] sm:$0xff]  ;;  %v5339_v50 = vcombine.high %v11124_v17, %v11129_v29  ;;  %v11759_v7 = vrot.slane %v5213_v43, %v10177_v37  ;;  %v9965_v17 = vld [vmem:[#allocation2 + $0x438] sm:$0xff]   ;;  %v5276_v29 = vcombine.high %v10622_v12, %v11168_v53  ;;  %v13027_v53 = vld [vmem:[#allocation61_spill] sm:$0xff] }
  0xf5   :  { %9322 = vmatpush3.bf16.msra.mxu1 %v9960_v0  ;;  %v5151_v56 = vcombine.high %v13024_v26, %v13023_v55  ;;  %9281 = vmatprep.subr.bf16.mxu0 %v9957_v1  ;;  %v5340_v0 = vcombine.high %v11143_v31, %v11132_v16  ;;  %v9963_v55 = vld [vmem:[#allocation2 + $0x2c0] sm:$0xff]   ;;  %v11762_v1 = vrot.slane %v5214_v18, %v10177_v37  ;;  %v9969_v40 = vld [vmem:[#allocation2 + $0x470] sm:$0xff]  }
  0xf6   :  { %9323 = vmatprep.subr.bf16.mxu1 %v9962_v52  ;;  %v11765_v52 = vrot.slane %v5150_v61, %v10177_v37  ;;  %v5277_v16 = vcombine.high %v11161_v27, %v10858_v15  ;;  %v11775_v31 = vrot.slane %v5339_v50, %v10177_v37  ;;  %v9967_v61 = vld [vmem:[#allocation2 + $0x3f8] sm:$0xff]   ;;  %v5230_v43 = vcombine.high %v13025_v54, %v10774_v51 }
  0xf7   :  { %v11768_v8 = vrot.slane %v5151_v56, %v10177_v37  ;;  %v5275_v56 = vcombine.low %v11724_v33, %v11727_v24  ;;  %v5229_v12 = vcombine.low %v11759_v7, %v11762_v1  ;;  %v13026_v27 = vld [vmem:[#allocation64_spill] sm:$0xff]  ;;  %v5385_v18 = vcombine.high %v11077_v39, %v11090_v36 }
  0xf8   :  { %6208 = vmatmul.mubr.bf16.gmra.mxu1 %v11741_v14  ;;  %9282 = vmatpush3.bf16.msra.mxu0 %v9959_v44  ;;  %v11778_v44 = vrot.slane %v5340_v0, %v10177_v37  ;;  %v5231_v21 = vcombine.high %v13027_v53, %v13026_v27  ;;  %v11793_v26 = vrot.slane %v5276_v29, %v10177_v37 }
  0xf9   :  { %9324 = vmatpush3.bf16.msra.mxu1 %v9964_v62  ;;  %9283 = vmatprep.subr.bf16.mxu0 %v9961_v49  ;;  %v9968_v62 = vld [vmem:[#allocation2 + $0x430] sm:$0xff]   ;;  %v5166_v15 = vcombine.low %v11765_v52, %v11768_v8  ;;  %v11796_v49 = vrot.slane %v5277_v16, %v10177_v37  ;;  %v5356_v39 = vcombine.high %v11271_v38, %v11278_v57  ;;  %v13032_v16 = vld [vmem:[#allocation73_spill] sm:$0xff] }
  0xfa   :  { %6311 = vmatprep.mubr.bf16.mxu1 %v5338_v28  ;;  %9769 = vmatprep.subr.bf16.mxu1 %v9966_v25  ;;  %v5386_v28 = vcombine.high %v11086_v2, %v11093_v63  ;;  %v5355_v0 = vcombine.low %v11775_v31, %v11778_v44  ;;  %v5357_v36 = vcombine.high %v11281_v41, %v11274_v11  ;;  %v9970_v2 = vld [vmem:[#allocation2 + $0x3f0] sm:$0xff]   ;;  %v9971_v11 = vld [vmem:[#allocation2 + $0x428] sm:$0xff]  }
  0xfb   :  { %v11814_v63 = vrot.slane %v5230_v43, %v10177_v37  ;;  %v11817_v29 = vrot.slane %v5385_v18, %v10177_v37  ;;  %v11823_v57 = vrot.slane %v5231_v21, %v10177_v37  ;;  %v13031_v41 = vld [vmem:[#allocation78_spill] sm:$0xff]  ;;  %v5292_v27 = vcombine.low %v11793_v26, %v11796_v49  ;;  %v13035_v18 = vld [vmem:[#allocation81_spill] sm:$0xff] }
  0xfc   :  { %9284 = vmatpush3.bf16.msra.mxu0 %v9963_v55  ;;  %v11820_v38 = vrot.slane %v5386_v28, %v10177_v37  ;;  %v5167_v54 = vcombine.high %v13032_v16, %v13031_v41  ;;  %v9972_v43 = vld [vmem:[#allocation2 + $0x468] sm:$0xff]   ;;  %v11836_v53 = vrot.slane %v5356_v39, %v10177_v37  ;;  %v11839_v21 = vrot.slane %v5357_v36, %v10177_v37  ;;  %v11853_v39 = vpop.f32.mrf.mxu0  ;;  %v9975_v36 = vld [vmem:[#allocation2 + $0x460] sm:$0xff]  }
  0xfd   :  { %9349 = vmatprep.subr.bf16.mxu0 %v9965_v17  ;;  %v13028_v17 = vcombine.low %v11695_v4, %v11702_v3  ;;  %13029 = vst [vmem:[#allocation13_spill] sm:$0xff] %v11817_v29  ;;  %v13036_v41 = vld [vmem:[#allocation118_spill] sm:$0xff] }
  0xfe   :  { %13030 = vst [vmem:[#allocation72_spill] sm:$0xff] %v11820_v38  ;;  %v13050_v3 = vld [vmem:[#allocation126_spill] sm:$0xff] }
  0xff   :  { %6248 = vmatmul.mubr.bf16.vlgmr.msra.gmra.mxu0 %v13028_v17  ;;  %v5293_v17 = vcombine.high %v11312_v19, %v12925_v6  ;;  %v5246_v6 = vcombine.low %v11814_v63, %v11823_v57  ;;  %v5310_v4 = vcombine.high %v13050_v3, %v13050_v3 }
 0x100   :  { %6312 = vmatmul.mubr.bf16.vlgmr.msra.gmra.mxu1 %v5275_v56  ;;  %9350 = vmatpush3.bf16.msra.mxu0 %v9967_v61  ;;  %v5528_v56 = vcombine.high %v11513_v10, %v11559_v46  ;;  %v9973_v46 = vld [vmem:[#allocation2 + $0x3e8] sm:$0xff]  }
 0x101   :  { %9770 = vmatpush3.bf16.msra.mxu1 %v9966_v25  ;;  %9351 = vmatprep.subr.bf16.mxu0 %v9968_v62  ;;  %v5529_v25 = vcombine.high %v11562_v42, %v11550_v45  ;;  %v13034_v62 = vld [vmem:[#allocation74_spill] sm:$0xff] }
 0x102   :  { %9771 = vmatprep.subr.bf16.mxu1 %v9969_v40  ;;  %6255 = vmatprep.mubr.bf16.mxu0 %v5229_v12  ;;  %v11842_v10 = vrot.slane %v5528_v56, %v10177_v37  ;;  %v5168_v28 = vcombine.high %v13035_v18, %v13034_v62  ;;  %v13037_v45 = vld [vmem:[#allocation62_spill] sm:$0xff]  ;;  %v11862_v56 = vrot.slane %v5167_v54, %v10177_v37  ;;  %v9977_v18 = vld [vmem:[#allocation2 + $0x418] sm:$0xff]   ;;  %v9074_v54 = vpop.f32.mrf.mxu0 }
 0x103   :  { %6319 = vmatprep.mubr.bf16.mxu1 %v5355_v0  ;;  %v5294_v42 = vcombine.high %v13037_v45, %v13036_v41  ;;  %v11851_v12 = vrot.slane %v5529_v25, %v10177_v37  ;;  %v9974_v0 = vld [vmem:[#allocation2 + $0x420] sm:$0xff]   ;;  %v11870_v25 = vrot.slane %v5293_v17, %v10177_v37  ;;  %v9978_v41 = vld [vmem:[#allocation2 + $0x458] sm:$0xff]   ;;  %v13044_v61 = vld [vmem:[#allocation98_spill] sm:$0xff] }
 0x104   :  { %13033 = vst [vmem:[#allocation24_spill] sm:$0xff] %v11842_v10  ;;  %9352 = vmatpush3.bf16.msra.mxu0 %v9970_v2  ;;  %v9976_v2 = vld [vmem:[#allocation2 + $0x3e0] sm:$0xff]   ;;  %v9076_v19 = vpop.f32.mrf.mxu0 }
 0x105   :  { %13038 = vst [vmem:[#allocation25_spill] sm:$0xff] %v11851_v12  ;;  %9772 = vmatpush3.bf16.msra.mxu1 %v9969_v40  ;;  %9353 = vmatprep.subr.bf16.mxu0 %v9971_v11  ;;  %v5372_v40 = vcombine.low %v11836_v53, %v11839_v21  ;;  %v11867_v11 = vrot.slane %v5168_v28, %v10177_v37  ;;  %13039 = vst [vmem:[#allocation26_spill] sm:$0xff] %v11870_v25  ;;  %v13042_v28 = vld [vmem:[#allocation130_spill] sm:$0xff] }
 0x106   :  { %9773 = vmatprep.subr.bf16.mxu1 %v9972_v43  ;;  %v11873_v62 = vrot.slane %v5294_v42, %v10177_v37  ;;  %v5373_v45 = vcombine.high %v13042_v28, %v13042_v28  ;;  %v13045_v28 = vld [vmem:[#allocation96_spill] sm:$0xff] }
 0x107   :  { %6256 = vmatmul.mubr.bf16.gmra.mxu0 %v5166_v15  ;;  %v13041_v15 = vld [vmem:[#allocation76_spill] sm:$0xff]  ;;  %v5183_v17 = vcombine.low %v11862_v56, %v11867_v11  ;;  %v9113_v42 = vpop.f32.mrf.mxu1  ;;  %v5448_v16 = vcombine.high %v13045_v28, %v13044_v61  ;;  %v9983_v61 = vld [vmem:[#allocation2 + $0x408] sm:$0xff]   ;;  %v9077_v28 = vpop.f32.mrf.mxu0 }
 0x108   :  { %6320 = vmatmul.mubr.bf16.gmra.mxu1 %v5292_v27  ;;  %13040 = vst [vmem:[#allocation27_spill] sm:$0xff] %v11873_v62  ;;  %9354 = vmatpush3.bf16.msra.mxu0 %v9973_v46  ;;  %v5247_v27 = vcombine.high %v13041_v15, %v13041_v15  ;;  %v5309_v46 = vcombine.low %v11870_v25, %v11873_v62  ;;  %v13125_v62 = vld [vmem:[#allocation66_spill] sm:$0xff] }
 0x109   :  { %9774 = vmatpush3.bf16.msra.mxu1 %v9972_v43  ;;  %9355 = vmatprep.subr.bf16.mxu0 %v9974_v0  ;;  %v9979_v43 = vld [vmem:[#allocation2 + $0x3d8] sm:$0xff]   ;;  %v9980_v0 = vld [vmem:[#allocation2 + $0x410] sm:$0xff]   ;;  %v9114_v55 = vpop.f32.mrf.mxu1  ;;  %v11891_v24 = vrot.slane %v5373_v45, %v10177_v37  ;;  %v9984_v45 = vld [vmem:[#allocation2 + $0x448] sm:$0xff]   ;;  %v11901_v14 = vrot.slane %v5448_v16, %v10177_v37 }
 0x10a   :  { %9775 = vmatprep.subr.bf16.mxu1 %v9975_v36  ;;  %6263 = vmatprep.mubr.bf16.mxu0 %v5246_v6  ;;  %v9981_v6 = vld [vmem:[#allocation2 + $0x450] sm:$0xff]   ;;  %v11888_v50 = vrot.slane %v5247_v27, %v10177_v37 }
 0x10b   :  { %6327 = vmatprep.mubr.bf16.mxu1 %v5372_v40  ;;  %v13043_v40 = vld [vmem:[#allocation82_spill] sm:$0xff]  ;;  %13047 = vst [vmem:[#allocation15_spill] sm:$0xff] %v11891_v24  ;;  %13052 = vst [vmem:[#allocation84_spill] sm:$0xff] %v11901_v14 }
 0x10c   :  { %9356 = vmatpush3.bf16.msra.mxu0 %v9976_v2  ;;  %v5184_v15 = vcombine.high %v13043_v40, %v13043_v40  ;;  %13046 = vst [vmem:[#allocation88_spill] sm:$0xff] %v11888_v50  ;;  %v13048_v2 = vld [vmem:[#allocation97_spill] sm:$0xff]  ;;  %v9116_v40 = vpop.f32.mrf.mxu1 }
 0x10d   :  { %9776 = vmatpush3.bf16.msra.mxu1 %v9975_v36  ;;  %9357 = vmatprep.subr.bf16.mxu0 %v9977_v18  ;;  %v13049_v36 = vld [vmem:[#allocation95_spill] sm:$0xff] }
 0x10e   :  { %9777 = vmatprep.subr.bf16.mxu1 %v9978_v41  ;;  %v5449_v33 = vcombine.high %v13049_v36, %v13048_v2  ;;  %v9982_v18 = vld [vmem:[#allocation2 + $0x3d0] sm:$0xff]   ;;  %v11898_v27 = vrot.slane %v5184_v15, %v10177_v37  ;;  %v9985_v15 = vld [vmem:[#allocation2 + $0x3c8] sm:$0xff]   ;;  %v9075_v2 = vadd.f32 %v9074_v54, %v11853_v39  ;;  %v9078_v36 = vadd.f32 %v9077_v28, %v9076_v19 }
 0x10f   :  { %6264 = vmatmul.mubr.bf16.gmra.mxu0 %v5183_v17  ;;  %v9117_v17 = vpop.f32.mrf.mxu1 }
 0x110   :  { %6328 = vmatmul.mubr.bf16.gmra.mxu1 %v5309_v46  ;;  %9358 = vmatpush3.bf16.msra.mxu0 %v9979_v43  ;;  %13051 = vst [vmem:[#allocation87_spill] sm:$0xff] %v11898_v27  ;;  %v11906_v3 = vrot.slane %v5449_v33, %v10177_v37  ;;  %v13056_v43 = vcombine.high %v11504_v9, %v11507_v23  ;;  %v9987_v9 = vld [vmem:[#allocation2 + $0x440] sm:$0xff]   ;;  %v13060_v23 = vld [vmem:[#allocation107_spill] sm:$0xff] }
 0x111   :  { %9778 = vmatpush3.bf16.msra.mxu1 %v9978_v41  ;;  %9359 = vmatprep.subr.bf16.mxu0 %v9980_v0  ;;  %v13054_v41 = vcombine.high %v11487_v47, %v11493_v22  ;;  %v11921_v0 = vrot.slane %v5310_v4, %v10177_v37  ;;  %v9115_v33 = vadd.f32 %v9114_v55, %v9113_v42  ;;  %v13059_v47 = vld [vmem:[#allocation108_spill] sm:$0xff]  ;;  %v13064_v42 = vld [vmem:[#allocation111_spill] sm:$0xff] }
 0x112   :  { %9779 = vmatprep.subr.bf16.mxu1 %v9981_v6  ;;  %6271 = vmatprep.mubr.bf16.mxu0 %v11888_v50  ;;  %13053 = vst [vmem:[#allocation90_spill] sm:$0xff] %v11906_v3  ;;  %v11918_v16 = vrot.slane %v13056_v43, %v10177_v37  ;;  %v5465_v22 = vcombine.high %v10590_v20, %v13059_v47  ;;  %v13090_v47 = vld [vmem:[#allocation19_spill] sm:$0xff] }
 0x113   :  { %6335 = vmatprep.mubr.bf16.mxu1 %v11891_v24  ;;  %v11912_v46 = vrot.slane %v13054_v41, %v10177_v37  ;;  %13058 = vst [vmem:[#allocation37_spill] sm:$0xff] %v11921_v0  ;;  %v9986_v24 = vld [vmem:[#allocation2 + $0x400] sm:$0xff]   ;;  %v9118_v41 = vadd.f32 %v9117_v17, %v9116_v40  ;;  %v5466_v43 = vcombine.high %v13060_v23, %v10774_v51 }
 0x114   :  { %13057 = vst [vmem:[#allocation77_spill] sm:$0xff] %v11918_v16  ;;  %9360 = vmatpush3.bf16.msra.mxu0 %v9982_v18  ;;  %v5545_v4 = vcombine.high %v11615_v35, %v11618_v58  ;;  %v11930_v50 = vadd.f32 %v9115_v33, %v9075_v2  ;;  %v5464_v55 = vcombine.low %v11901_v14, %v11906_v3  ;;  %v9988_v51 = vld [vmem:[#allocation2 + $0x3c0] sm:$0xff]   ;;  %v9989_v58 = vld [vmem:[#allocation2 + $0x4f8] sm:$0xff]  }
 0x115   :  { %13055 = vst [vmem:[#allocation89_spill] sm:$0xff] %v11912_v46  ;;  %9780 = vmatpush3.bf16.msra.mxu1 %v9981_v6  ;;  %9361 = vmatprep.subr.bf16.mxu0 %v9983_v61  ;;  %v5527_v39 = vcombine.low %v11912_v46, %v11918_v16  ;;  %v5546_v20 = vcombine.high %v11624_v60, %v11621_v59  ;;  %v13065_v6 = vld [vmem:[#allocation110_spill] sm:$0xff]  ;;  %v13066_v59 = vld [vmem:[#allocation8_spill] sm:$0xff]  ;;  %v13071_v33 = vld [vmem:[#allocation21_spill] sm:$0xff] }
 0x116   :  { %9781 = vmatprep.subr.bf16.mxu1 %v9984_v45  ;;  %13061 = vst [vmem:[#allocation35_spill] sm:$0xff] %v11930_v50  ;;  %v11938_v19 = vadd.f32 %v9118_v41, %v9078_v36  ;;  %v5401_v35 = vcombine.low %v11817_v29, %v11820_v38  ;;  %v11945_v54 = vrot.slane %v5465_v22, %v10177_v37  ;;  %v13067_v60 = vld [vmem:[#allocation138_spill] sm:$0xff]  ;;  %v9990_v61 = vld [vmem:[#allocation2 + $0x578] sm:$0xff]   ;;  %v13074_v23 = vld [vmem:[#allocation113_spill] sm:$0xff] }
 0x117   :  { %6272 = vmatmul.mubr.bf16.gmra.mxu0 %v11898_v27  ;;  %v5402_v18 = vcombine.high %v13065_v6, %v13064_v42  ;;  %v11952_v28 = vrot.slane %v5466_v43, %v10177_v37  ;;  %v11955_v17 = vrot.slane %v5545_v4, %v10177_v37  ;;  %v11960_v2 = vrot.slane %v5546_v20, %v10177_v37  ;;  %v13072_v36 = vld [vmem:[#allocation20_spill] sm:$0xff]  ;;  %v9079_v4 = vpop.f32.mrf.mxu0  ;;  %v13075_v42 = vld [vmem:[#allocation30_spill] sm:$0xff]  ;;  %v13080_v20 = vld [vmem:[#allocation39_spill] sm:$0xff] }
 0x118   :  { %13062 = vst [vmem:[#allocation38_spill] sm:$0xff] %v11938_v19  ;;  %6336 = vmatmul.mubr.bf16.gmra.mxu1 %v11921_v0  ;;  %9362 = vmatpush3.bf16.msra.mxu0 %v9985_v15  ;;  %13063 = vst [vmem:[#allocation48_spill] sm:$0xff] %v11945_v54  ;;  %v9991_v15 = vld [vmem:[#allocation2 + $0x4b8] sm:$0xff]   ;;  %v13079_v38 = vld [vmem:[#allocation42_spill] sm:$0xff] }
 0x119   :  { %9782 = vmatpush3.bf16.msra.mxu1 %v9984_v45  ;;  %9363 = vmatprep.subr.bf16.mxu0 %v9986_v24  ;;  %13068 = vst [vmem:[#allocation46_spill] sm:$0xff] %v11952_v28  ;;  %13069 = vst [vmem:[#allocation47_spill] sm:$0xff] %v11955_v17  ;;  %v9992_v22 = vld [vmem:[#allocation2 + $0x538] sm:$0xff]   ;;  %v9993_v24 = vld [vmem:[#allocation2 + $0x4f0] sm:$0xff]   ;;  %v9080_v19 = vpop.f32.mrf.mxu0  ;;  %v5481_v40 = vcombine.low %v11945_v54, %v11952_v28 }
 0x11a   :  { %9783 = vmatprep.subr.bf16.mxu1 %v9987_v9  ;;  %6375 = vmatprep.mubr.bf16.mxu0 %v5464_v55  ;;  %13070 = vst [vmem:[#allocation50_spill] sm:$0xff] %v11960_v2  ;;  %v13073_v41 = vld [vmem:[#allocation112_spill] sm:$0xff]  ;;  %v13081_v46 = vld [vmem:[#allocation55_spill] sm:$0xff]  ;;  %v13085_v50 = vld [vmem:[#allocation49_spill] sm:$0xff] }
 0x11b   :  { %9785 = vmatprep.mubr.bf16.mxu1 %v5527_v39  ;;  %v5403_v43 = vcombine.high %v13074_v23, %v13073_v41  ;;  %v13076_v6 = vld [vmem:[#allocation32_spill] sm:$0xff]  ;;  %v13078_v39 = vld [vmem:[#allocation33_spill] sm:$0xff]  ;;  %v9994_v0 = vld [vmem:[#allocation2 + $0x570] sm:$0xff]  }
 0x11c   :  { %9364 = vmatpush3.bf16.msra.mxu0 %v9988_v51  ;;  %v13082_v16 = vld [vmem:[#allocation52_spill] sm:$0xff]  ;;  %v13083_v41 = vld [vmem:[#allocation54_spill] sm:$0xff]  ;;  %v13084_v23 = vld [vmem:[#allocation121_spill] sm:$0xff]  ;;  %v11984_v51 = vadd.f32 %v9080_v19, %v9079_v4 }
 0x11d   :  { %9784 = vmatpush3.bf16.msra.mxu1 %v9987_v9  ;;  %9401 = vmatprep.subr.bf16.mxu0 %v9989_v58  ;;  %v5482_v27 = vcombine.high %v13084_v23, %v13083_v41  ;;  %v9995_v45 = vld [vmem:[#allocation2 + $0x4b0] sm:$0xff]   ;;  %v13086_v55 = vld [vmem:[#allocation120_spill] sm:$0xff]  ;;  %v5561_v9 = vcombine.low %v11955_v17, %v11960_v2  ;;  %v13087_v58 = vcombine.low %v11842_v10, %v11851_v12  ;;  %v9998_v19 = vld [vmem:[#allocation2 + $0x568] sm:$0xff]  }
 0x11e   :  { %9441 = vmatprep.subr.bf16.mxu1 %v9990_v61  ;;  %v5483_v29 = vcombine.high %v13086_v55, %v13085_v50  ;;  %v9996_v61 = vld [vmem:[#allocation2 + $0x530] sm:$0xff]   ;;  %v11990_v41 = vrot.slane %v5402_v18, %v10177_v37  ;;  %v11993_v23 = vrot.slane %v5403_v43, %v10177_v37  ;;  %v5562_v50 = vcombine.high %v13090_v47, %v13090_v47  ;;  %v9997_v55 = vld [vmem:[#allocation2 + $0x4e8] sm:$0xff]   ;;  %v13096_v12 = vld [vmem:[#allocation125_spill] sm:$0xff] }
 0x11f   :  { %6376 = vmatmul.mubr.bf16.vlgmr.msra.gmra.mxu0 %v5401_v35  ;;  %v9999_v4 = vld [vmem:[#allocation2 + $0x4a8] sm:$0xff]   ;;  %v12000_v18 = vrot.slane %v5482_v27, %v10177_v37  ;;  %v10001_v27 = vld [vmem:[#allocation2 + $0x4e0] sm:$0xff]   ;;  %v13099_v2 = vld [vmem:[#allocation16_spill] sm:$0xff] }
 0x120   :  { %9786 = vmatmul.mubr.bf16.vlgmr.msra.gmra.mxu1 %v13087_v58  ;;  %13088 = vst [vmem:[#allocation60_spill] sm:$0xff] %v11990_v41  ;;  %13089 = vst [vmem:[#allocation64_spill] sm:$0xff] %v11993_v23  ;;  %9402 = vmatpush3.bf16.msra.mxu0 %v9991_v15  ;;  %v12003_v43 = vrot.slane %v5483_v29, %v10177_v37  ;;  %v5418_v15 = vcombine.low %v11990_v41, %v11993_v23  ;;  %v10000_v47 = vld [vmem:[#allocation2 + $0x528] sm:$0xff]   ;;  %v13095_v58 = vld [vmem:[#allocation123_spill] sm:$0xff] }
 0x121   :  { %9442 = vmatpush3.bf16.msra.mxu1 %v9992_v22  ;;  %9403 = vmatprep.subr.bf16.mxu0 %v9993_v24  ;;  %13091 = vst [vmem:[#allocation61_spill] sm:$0xff] %v12000_v18  ;;  %v13093_v22 = vld [vmem:[#allocation124_spill] sm:$0xff]  ;;  %v13094_v24 = vld [vmem:[#allocation122_spill] sm:$0xff]  ;;  %v5420_v10 = vcombine.high %v13096_v12, %v13095_v58  ;;  %v10002_v29 = vld [vmem:[#allocation2 + $0x560] sm:$0xff]  }
 0x122   :  { %9443 = vmatprep.subr.bf16.mxu1 %v9994_v0  ;;  %6383 = vmatprep.mubr.bf16.mxu0 %v5481_v40  ;;  %13092 = vst [vmem:[#allocation78_spill] sm:$0xff] %v12003_v43  ;;  %v5419_v0 = vcombine.high %v13094_v24, %v13093_v22  ;;  %v12012_v40 = vrot.slane %v5562_v50, %v10177_v37  ;;  %v13098_v17 = vld [vmem:[#allocation17_spill] sm:$0xff]  ;;  %v9082_v22 = vpop.f32.mrf.mxu0  ;;  %v10005_v50 = vld [vmem:[#allocation2 + $0x4d8] sm:$0xff]   ;;  %v13162_v23 = vld [vmem:[#allocation18_spill] sm:$0xff] }
 0x123   :  { %9789 = vmatprep.mubr.bf16.mxu1 %v5561_v9  ;;  %v10003_v9 = vld [vmem:[#allocation2 + $0x4a0] sm:$0xff]   ;;  %v5498_v35 = vcombine.low %v12000_v18, %v12003_v43  ;;  %v6495_v32 = vcombine.high %v13099_v2, %v13098_v17  ;;  %v10006_v2 = vld [vmem:[#allocation2 + $0x558] sm:$0xff]   ;;  %v10011_v18 = vld [vmem:[#allocation2 + $0x490] sm:$0xff]  }
 0x124   :  { %13097 = vst [vmem:[#allocation73_spill] sm:$0xff] %v12012_v40  ;;  %9404 = vmatpush3.bf16.msra.mxu0 %v9995_v45  ;;  %v10004_v24 = vld [vmem:[#allocation2 + $0x520] sm:$0xff]   ;;  %v12019_v12 = vrot.slane %v5419_v0, %v10177_v37  ;;  %v12022_v45 = vrot.slane %v5420_v10, %v10177_v37  ;;  %v10007_v10 = vld [vmem:[#allocation2 + $0x498] sm:$0xff]   ;;  %v13165_v28 = vld [vmem:[#allocation6_spill] sm:$0xff] }
 0x125   :  { %9444 = vmatpush3.bf16.msra.mxu1 %v9996_v61  ;;  %9405 = vmatprep.subr.bf16.mxu0 %v9997_v55  ;;  %v9119_v55 = vpop.f32.mrf.mxu1  ;;  %v10009_v61 = vld [vmem:[#allocation2 + $0x4d0] sm:$0xff]   ;;  %v13118_v3 = vld [vmem:[#allocation45_spill] sm:$0xff] }
 0x126   :  { %9445 = vmatprep.subr.bf16.mxu1 %v9998_v19  ;;  %13100 = vst [vmem:[#allocation74_spill] sm:$0xff] %v12019_v12  ;;  %13101 = vst [vmem:[#allocation81_spill] sm:$0xff] %v12022_v45  ;;  %v5435_v17 = vcombine.low %v12019_v12, %v12022_v45  ;;  %v10012_v12 = vld [vmem:[#allocation2 + $0x510] sm:$0xff]   ;;  %v13104_v45 = vld [vmem:[#allocation132_spill] sm:$0xff] }
 0x127   :  { %6384 = vmatmul.mubr.bf16.gmra.mxu0 %v5418_v15  ;;  %v13102_v15 = vld [vmem:[#allocation131_spill] sm:$0xff]  ;;  %v9120_v58 = vpop.f32.mrf.mxu1  ;;  %v13121_v14 = vld [vmem:[#allocation53_spill] sm:$0xff] }
 0x128   :  { %9790 = vmatmul.mubr.bf16.gmra.mxu1 %v12012_v40  ;;  %9406 = vmatpush3.bf16.msra.mxu0 %v9999_v4  ;;  %v5499_v0 = vcombine.high %v13102_v15, %v13102_v15  ;;  %v9083_v4 = vpop.f32.mrf.mxu0  ;;  %v10083_v54 = vld [vmem:[#allocation2 + $0x830] sm:$0xff]  }
 0x129   :  { %9446 = vmatpush3.bf16.msra.mxu1 %v10000_v47  ;;  %9407 = vmatprep.subr.bf16.mxu0 %v10001_v27  ;;  %v10008_v27 = vld [vmem:[#allocation2 + $0x518] sm:$0xff]   ;;  %v9122_v19 = vpop.f32.mrf.mxu1 }
 0x12a   :  { %9447 = vmatprep.subr.bf16.mxu1 %v10002_v29  ;;  %6391 = vmatprep.mubr.bf16.mxu0 %v5498_v35  ;;  %v9121_v29 = vadd.f32 %v9120_v58, %v9119_v55  ;;  %v10010_v35 = vld [vmem:[#allocation2 + $0x550] sm:$0xff]   ;;  %v12041_v43 = vrot.slane %v5499_v0, %v10177_v37  ;;  %v10013_v55 = vld [vmem:[#allocation2 + $0x4c8] sm:$0xff]   ;;  %v10018_v58 = vld [vmem:[#allocation2 + $0x540] sm:$0xff]  }
 0x12b   :  { %7216 = vmatprep.mubr.bf16.mxu1 %v6495_v32  ;;  %v9084_v32 = vadd.f32 %v9083_v4, %v9082_v22  ;;  %v9123_v47 = vpop.f32.mrf.mxu1  ;;  %v10014_v22 = vld [vmem:[#allocation2 + $0x548] sm:$0xff]   ;;  %v10019_v4 = vld [vmem:[#allocation2 + $0x480] sm:$0xff]  }
 0x12c   :  { %9408 = vmatpush3.bf16.msra.mxu0 %v10003_v9  ;;  %v12038_v15 = vadd.f32 %v9121_v29, %v11984_v51  ;;  %13103 = vst [vmem:[#allocation118_spill] sm:$0xff] %v12041_v43  ;;  %v5436_v9 = vcombine.high %v13104_v45, %v13104_v45  ;;  %v10015_v45 = vld [vmem:[#allocation2 + $0x488] sm:$0xff]   ;;  %v13108_v51 = vld [vmem:[#allocation36_spill] sm:$0xff] }
 0x12d   :  { %9448 = vmatpush3.bf16.msra.mxu1 %v10004_v24  ;;  %9409 = vmatprep.subr.bf16.mxu0 %v10005_v50  ;;  %v9124_v24 = vadd.f32 %v9123_v47, %v9122_v19  ;;  %v10016_v0 = vld [vmem:[#allocation2 + $0x508] sm:$0xff]   ;;  %v13106_v47 = vld [vmem:[#allocation11_spill] sm:$0xff] }
 0x12e   :  { %9449 = vmatprep.subr.bf16.mxu1 %v10006_v2  ;;  %v10025_v19 = vld [vmem:[#allocation2 + $0x5f0] sm:$0xff]   ;;  %v13112_v50 = vld [vmem:[#allocation22_spill] sm:$0xff] }
 0x12f   :  { %6392 = vmatmul.mubr.bf16.gmra.mxu0 %v5435_v17  ;;  %v12049_v2 = vadd.f32 %v9124_v24, %v9084_v32  ;;  %v10020_v32 = vld [vmem:[#allocation2 + $0x500] sm:$0xff]   ;;  %v10021_v24 = vld [vmem:[#allocation2 + $0x5f8] sm:$0xff]   ;;  %v13110_v17 = vld [vmem:[#allocation43_spill] sm:$0xff] }
 0x130   :  { %9410 = vmatpush3.bf16.msra.mxu0 %v10007_v10  ;;  %6399 = vmatprep.mubr.bf16.mxu0 %v12041_v43  ;;  %v12057_v10 = vrot.slane %v5436_v9, %v10177_v37  ;;  %v10022_v9 = vld [vmem:[#allocation2 + $0x5b8] sm:$0xff]   ;;  %v13116_v43 = vld [vmem:[#allocation29_spill] sm:$0xff] }
 0x131   :  { %9450 = vmatpush3.bf16.msra.mxu1 %v10008_v27  ;;  %9411 = vmatprep.subr.bf16.mxu0 %v10009_v61  ;;  %v10017_v61 = vld [vmem:[#allocation2 + $0x4c0] sm:$0xff]   ;;  %v13107_v27 = vld [vmem:[#allocation10_spill] sm:$0xff] }
 0x132   :  { %9451 = vmatprep.subr.bf16.mxu1 %v10010_v35  ;;  %13105 = vst [vmem:[#allocation62_spill] sm:$0xff] %v12057_v10  ;;  %v6479_v29 = vcombine.high %v13107_v27, %v13106_v47  ;;  %v10028_v27 = vld [vmem:[#allocation2 + $0x630] sm:$0xff]  }
 0x134   :  { %9412 = vmatpush3.bf16.msra.mxu0 %v10011_v18  ;;  %v9085_v35 = vpop.f32.mrf.mxu0  ;;  %v10023_v18 = vld [vmem:[#allocation2 + $0x678] sm:$0xff]  }
 0x135   :  { %9452 = vmatpush3.bf16.msra.mxu1 %v10012_v12  ;;  %9413 = vmatprep.subr.bf16.mxu0 %v10013_v55 }
 0x136   :  { %9453 = vmatprep.subr.bf16.mxu1 %v10014_v22  ;;  %v9086_v37 = vpop.f32.mrf.mxu0  ;;  %v10024_v22 = vld [vmem:[#allocation2 + $0x638] sm:$0xff]  }
 0x137   :  { %6400 = vmatmul.mubr.bf16.gmra.mxu0 %v12057_v10  ;;  %v9087_v12 = vadd.f32 %v9086_v37, %v9085_v35  ;;  %v13111_v35 = vld [vmem:[#allocation41_spill] sm:$0xff]  ;;  %v13113_v10 = vld [vmem:[#allocation23_spill] sm:$0xff] }
 0x138   :  { %9414 = vmatpush3.bf16.msra.mxu0 %v10015_v45  ;;  %7152 = vmatprep.mubr.bf16.mxu0 %v6479_v29  ;;  %v9088_v55 = vpop.f32.mrf.mxu0  ;;  %v10027_v45 = vld [vmem:[#allocation2 + $0x670] sm:$0xff]   ;;  %v6496_v29 = vcombine.high %v13111_v35, %v13110_v17  ;;  %v10030_v17 = vld [vmem:[#allocation2 + $0x5a8] sm:$0xff]  }
 0x139   :  { %9454 = vmatpush3.bf16.msra.mxu1 %v10016_v0  ;;  %9415 = vmatprep.subr.bf16.mxu0 %v10017_v61  ;;  %v10026_v0 = vld [vmem:[#allocation2 + $0x5b0] sm:$0xff]   ;;  %v13109_v61 = vld [vmem:[#allocation34_spill] sm:$0xff] }
 0x13a   :  { %9455 = vmatprep.subr.bf16.mxu1 %v10018_v58  ;;  %v9089_v47 = vpop.f32.mrf.mxu0  ;;  %v6480_v58 = vcombine.high %v13109_v61, %v13108_v51  ;;  %v10031_v51 = vld [vmem:[#allocation2 + $0x668] sm:$0xff]  }
 0x13c   :  { %9416 = vmatpush3.bf16.msra.mxu0 %v10019_v4  ;;  %v9091_v37 = vpop.f32.mrf.mxu0  ;;  %v13114_v4 = vcombine.high %v13112_v50, %v13113_v10  ;;  %v13119_v50 = vld [vmem:[#allocation44_spill] sm:$0xff] }
 0x13d   :  { %9456 = vmatpush3.bf16.msra.mxu1 %v10020_v32  ;;  %9481 = vmatprep.subr.bf16.mxu0 %v10021_v24  ;;  %v13115_v32 = vld [vmem:[#allocation28_spill] sm:$0xff]  ;;  %v10029_v24 = vld [vmem:[#allocation2 + $0x5e8] sm:$0xff]   ;;  %v6472_v10 = vcombine.high %v13119_v50, %v13118_v3 }
 0x13e   :  { %9521 = vmatprep.subr.bf16.mxu1 %v10023_v18  ;;  %v13117_v40 = vcombine.high %v13115_v32, %v13116_v43  ;;  %v9092_v18 = vpop.f32.mrf.mxu0 }
 0x13f   :  { %7153 = vmatmul.mubr.bf16.vlgmr.msra.gmra.mxu0 %v13114_v4  ;;  %v9093_v61 = vadd.f32 %v9092_v18, %v9091_v37  ;;  %v13120_v4 = vld [vmem:[#allocation56_spill] sm:$0xff]  ;;  %v13123_v37 = vld [vmem:[#allocation59_spill] sm:$0xff] }
 0x140   :  { %7217 = vmatmul.mubr.bf16.vlgmr.msra.gmra.mxu1 %v13117_v40  ;;  %9482 = vmatpush3.bf16.msra.mxu0 %v10022_v9  ;;  %v9094_v35 = vpop.f32.mrf.mxu0  ;;  %v6488_v43 = vcombine.high %v13121_v14, %v13120_v4  ;;  %v10032_v40 = vld [vmem:[#allocation2 + $0x628] sm:$0xff]   ;;  %v10033_v9 = vld [vmem:[#allocation2 + $0x5e0] sm:$0xff]  }
 0x141   :  { %9522 = vmatpush3.bf16.msra.mxu1 %v10024_v22  ;;  %9483 = vmatprep.subr.bf16.mxu0 %v10025_v19  ;;  %v9125_v32 = vpop.f32.mrf.mxu1  ;;  %v10035_v19 = vld [vmem:[#allocation2 + $0x660] sm:$0xff]  }
 0x142   :  { %9523 = vmatprep.subr.bf16.mxu1 %v10027_v45  ;;  %7160 = vmatprep.mubr.bf16.mxu0 %v6480_v58  ;;  %v9095_v22 = vpop.f32.mrf.mxu0  ;;  %v10034_v58 = vld [vmem:[#allocation2 + $0x5a0] sm:$0xff]  }
 0x143   :  { %7224 = vmatprep.mubr.bf16.mxu1 %v6496_v29  ;;  %v9126_v45 = vpop.f32.mrf.mxu1  ;;  %v13122_v29 = vld [vmem:[#allocation63_spill] sm:$0xff]  ;;  %v13124_v35 = vld [vmem:[#allocation69_spill] sm:$0xff] }
 0x144   :  { %9484 = vmatpush3.bf16.msra.mxu0 %v10026_v0  ;;  %v6481_v18 = vcombine.high %v13123_v37, %v13122_v29  ;;  %v6497_v3 = vcombine.high %v13125_v62, %v13124_v35  ;;  %v9127_v50 = vadd.f32 %v9126_v45, %v9125_v32  ;;  %v10036_v14 = vld [vmem:[#allocation2 + $0x620] sm:$0xff]   ;;  %v10037_v0 = vld [vmem:[#allocation2 + $0x5d8] sm:$0xff]   ;;  %v13127_v45 = vld [vmem:[#allocation70_spill] sm:$0xff] }
 0x145   :  { %9524 = vmatpush3.bf16.msra.mxu1 %v10028_v27  ;;  %9485 = vmatprep.subr.bf16.mxu0 %v10029_v24  ;;  %v9128_v4 = vpop.f32.mrf.mxu1  ;;  %v10039_v62 = vld [vmem:[#allocation2 + $0x658] sm:$0xff]   ;;  %v13128_v37 = vld [vmem:[#allocation85_spill] sm:$0xff]  ;;  %v13158_v22 = vld [vmem:[#allocation135_spill] sm:$0xff] }
 0x146   :  { %9525 = vmatprep.subr.bf16.mxu1 %v10031_v51  ;;  %v12084_v24 = vadd.f32 %v9127_v50, %v9087_v12  ;;  %v9090_v51 = vadd.f32 %v9089_v47, %v9088_v55  ;;  %v10038_v12 = vld [vmem:[#allocation2 + $0x598] sm:$0xff]   ;;  %v13161_v27 = vld [vmem:[#allocation137_spill] sm:$0xff] }
 0x147   :  { %7161 = vmatmul.mubr.bf16.gmra.mxu0 %v6472_v10  ;;  %v9129_v32 = vpop.f32.mrf.mxu1  ;;  %v10040_v55 = vld [vmem:[#allocation2 + $0x618] sm:$0xff]  }
 0x148   :  { %7225 = vmatmul.mubr.bf16.gmra.mxu1 %v6488_v43  ;;  %9486 = vmatpush3.bf16.msra.mxu0 %v10030_v17  ;;  %v9130_v10 = vadd.f32 %v9129_v32, %v9128_v4  ;;  %v13126_v43 = vld [vmem:[#allocation71_spill] sm:$0xff] }
 0x149   :  { %9526 = vmatpush3.bf16.msra.mxu1 %v10032_v40  ;;  %9487 = vmatprep.subr.bf16.mxu0 %v10033_v9  ;;  %v6473_v29 = vcombine.high %v13127_v45, %v13126_v43  ;;  %v13129_v17 = vld [vmem:[#allocation83_spill] sm:$0xff] }
 0x14a   :  { %9527 = vmatprep.subr.bf16.mxu1 %v10035_v19  ;;  %7168 = vmatprep.mubr.bf16.mxu0 %v6481_v18  ;;  %v6489_v40 = vcombine.high %v13129_v17, %v13128_v37  ;;  %v9131_v35 = vpop.f32.mrf.mxu1  ;;  %v12092_v47 = vadd.f32 %v9130_v10, %v9090_v51  ;;  %v10041_v9 = vld [vmem:[#allocation2 + $0x5d0] sm:$0xff]   ;;  %v13132_v37 = vld [vmem:[#allocation80_spill] sm:$0xff] }
 0x14b   :  { %7232 = vmatprep.mubr.bf16.mxu1 %v6497_v3  ;;  %v10043_v19 = vld [vmem:[#allocation2 + $0x650] sm:$0xff]   ;;  %v6474_v17 = vcombine.high %v13132_v37, %v13132_v37  ;;  %v13141_v37 = vld [vmem:[#allocation101_spill] sm:$0xff] }
 0x14c   :  { %9488 = vmatpush3.bf16.msra.mxu0 %v10034_v58  ;;  %v9132_v18 = vpop.f32.mrf.mxu1  ;;  %v13130_v3 = vld [vmem:[#allocation75_spill] sm:$0xff] }
 0x14d   :  { %9528 = vmatpush3.bf16.msra.mxu1 %v10036_v14  ;;  %9489 = vmatprep.subr.bf16.mxu0 %v10037_v0  ;;  %v6482_v50 = vcombine.high %v13130_v3, %v13130_v3  ;;  %v13131_v4 = vld [vmem:[#allocation79_spill] sm:$0xff]  ;;  %v9133_v43 = vadd.f32 %v9132_v18, %v9131_v35  ;;  %v10045_v0 = vld [vmem:[#allocation2 + $0x5c8] sm:$0xff]  }
 0x14e   :  { %9529 = vmatprep.subr.bf16.mxu1 %v10039_v62  ;;  %v6498_v32 = vcombine.high %v13131_v4, %v13131_v4  ;;  %v9134_v58 = vpop.f32.mrf.mxu1  ;;  %v10042_v14 = vld [vmem:[#allocation2 + $0x590] sm:$0xff]   ;;  %v10047_v62 = vld [vmem:[#allocation2 + $0x648] sm:$0xff]  }
 0x14f   :  { %7169 = vmatmul.mubr.bf16.gmra.mxu0 %v6473_v29  ;;  %v10044_v51 = vld [vmem:[#allocation2 + $0x610] sm:$0xff]   ;;  %v12098_v10 = vadd.f32 %v9133_v43, %v9093_v61  ;;  %v13133_v35 = vld [vmem:[#allocation86_spill] sm:$0xff]  ;;  %v10049_v61 = vld [vmem:[#allocation2 + $0x5c0] sm:$0xff]  }
 0x150   :  { %7233 = vmatmul.mubr.bf16.gmra.mxu1 %v6489_v40  ;;  %9490 = vmatpush3.bf16.msra.mxu0 %v10038_v12  ;;  %v9135_v45 = vpop.f32.mrf.mxu1  ;;  %v6490_v29 = vcombine.high %v13133_v35, %v13133_v35  ;;  %v10046_v40 = vld [vmem:[#allocation2 + $0x588] sm:$0xff]   ;;  %v13136_v3 = vld [vmem:[#allocation99_spill] sm:$0xff]  ;;  %v10052_v43 = vld [vmem:[#allocation2 + $0x600] sm:$0xff]  }
 0x151   :  { %9530 = vmatpush3.bf16.msra.mxu1 %v10040_v55  ;;  %9491 = vmatprep.subr.bf16.mxu0 %v10041_v9  ;;  %v10048_v12 = vld [vmem:[#allocation2 + $0x608] sm:$0xff]   ;;  %v10051_v55 = vld [vmem:[#allocation2 + $0x640] sm:$0xff]   ;;  %v10053_v58 = vld [vmem:[#allocation2 + $0x6b8] sm:$0xff]  }
 0x152   :  { %9531 = vmatprep.subr.bf16.mxu1 %v10043_v19  ;;  %7176 = vmatprep.mubr.bf16.mxu0 %v6482_v50  ;;  %v13134_v9 = vld [vmem:[#allocation94_spill] sm:$0xff]  ;;  %v13135_v19 = vld [vmem:[#allocation91_spill] sm:$0xff]  ;;  %v13137_v50 = vld [vmem:[#allocation100_spill] sm:$0xff] }
 0x153   :  { %7240 = vmatprep.mubr.bf16.mxu1 %v6498_v32  ;;  %v6511_v18 = vcombine.high %v13135_v19, %v13134_v9  ;;  %v6527_v4 = vcombine.high %v13137_v50, %v13136_v3  ;;  %v10050_v32 = vld [vmem:[#allocation2 + $0x580] sm:$0xff]   ;;  %v13140_v45 = vld [vmem:[#allocation102_spill] sm:$0xff]  ;;  %v12112_v9 = vpop.f32.mrf.mxu0 }
 0x154   :  { %9492 = vmatpush3.bf16.msra.mxu0 %v10042_v14  ;;  %v10054_v14 = vld [vmem:[#allocation2 + $0x738] sm:$0xff]   ;;  %v6519_v35 = vcombine.high %v13141_v37, %v13140_v45  ;;  %v13144_v19 = vld [vmem:[#allocation109_spill] sm:$0xff]  ;;  %v13149_v37 = vld [vmem:[#allocation115_spill] sm:$0xff] }
 0x155   :  { %9532 = vmatpush3.bf16.msra.mxu1 %v10044_v51  ;;  %9493 = vmatprep.subr.bf16.mxu0 %v10045_v0  ;;  %v13138_v51 = vld [vmem:[#allocation93_spill] sm:$0xff]  ;;  %v13139_v0 = vld [vmem:[#allocation92_spill] sm:$0xff]  ;;  %v12118_v50 = vpop.f32.mrf.mxu0 }
 0x156   :  { %9533 = vmatprep.subr.bf16.mxu1 %v10047_v62  ;;  %v6503_v62 = vcombine.high %v13139_v0, %v13138_v51  ;;  %v13147_v51 = vld [vmem:[#allocation106_spill] sm:$0xff]  ;;  %v13148_v45 = vld [vmem:[#allocation116_spill] sm:$0xff] }
 0x157   :  { %7177 = vmatmul.mubr.bf16.gmra.mxu0 %v6474_v17  ;;  %v10055_v17 = vld [vmem:[#allocation2 + $0x6f8] sm:$0xff]  }
 0x158   :  { %7241 = vmatmul.mubr.bf16.gmra.mxu1 %v6490_v29  ;;  %9494 = vmatpush3.bf16.msra.mxu0 %v10046_v40  ;;  %v10056_v29 = vld [vmem:[#allocation2 + $0x6b0] sm:$0xff]  }
 0x159   :  { %9534 = vmatpush3.bf16.msra.mxu1 %v10048_v12  ;;  %9495 = vmatprep.subr.bf16.mxu0 %v10049_v61  ;;  %v10057_v40 = vld [vmem:[#allocation2 + $0x730] sm:$0xff]   ;;  %v13142_v12 = vld [vmem:[#allocation104_spill] sm:$0xff] }
 0x15a   :  { %9535 = vmatprep.subr.bf16.mxu1 %v10051_v55  ;;  %7280 = vmatprep.mubr.bf16.mxu0 %v6511_v18  ;;  %v13143_v61 = vld [vmem:[#allocation103_spill] sm:$0xff]  ;;  %v13145_v18 = vld [vmem:[#allocation114_spill] sm:$0xff] }
 0x15b   :  { %7344 = vmatprep.mubr.bf16.mxu1 %v6527_v4  ;;  %v6512_v55 = vcombine.high %v13143_v61, %v13142_v12  ;;  %v6528_v3 = vcombine.high %v13145_v18, %v13144_v19  ;;  %v10058_v4 = vld [vmem:[#allocation2 + $0x6f0] sm:$0xff]   ;;  %v6520_v12 = vcombine.high %v13149_v37, %v13148_v45  ;;  %v12124_v61 = vpop.f32.mrf.mxu0 }
 0x15c   :  { %9496 = vmatpush3.bf16.msra.mxu0 %v10050_v32  ;;  %v10059_v32 = vld [vmem:[#allocation2 + $0x6a8] sm:$0xff]   ;;  %v13153_v18 = vld [vmem:[#allocation127_spill] sm:$0xff] }
 0x15d   :  { %9536 = vmatpush3.bf16.msra.mxu1 %v10052_v43  ;;  %9793 = vmatprep.subr.bf16.mxu0 %v10053_v58  ;;  %v10060_v43 = vld [vmem:[#allocation2 + $0x728] sm:$0xff]   ;;  %v13154_v45 = vld [vmem:[#allocation67_spill] sm:$0xff] }
 0x15e   :  { %9573 = vmatprep.subr.bf16.mxu1 %v10054_v14  ;;  %v13146_v14 = vld [vmem:[#allocation105_spill] sm:$0xff]  ;;  %v13155_v37 = vld [vmem:[#allocation119_spill] sm:$0xff] }
 0x15f   :  { %7281 = vmatmul.mubr.bf16.vlgmr.msra.gmra.mxu0 %v6503_v62  ;;  %v6504_v0 = vcombine.high %v13147_v51, %v13146_v14  ;;  %v10061_v62 = vld [vmem:[#allocation2 + $0x6e8] sm:$0xff]   ;;  %v12130_v14 = vpop.f32.mrf.mxu1  ;;  %v12132_v51 = vpop.f32.mrf.mxu0 }
 0x160   :  { %7345 = vmatmul.mubr.bf16.vlgmr.msra.gmra.mxu1 %v6519_v35  ;;  %9794 = vmatpush3.bf16.msra.mxu0 %v10053_v58  ;;  %v10062_v58 = vld [vmem:[#allocation2 + $0x6a0] sm:$0xff]  }
 0x161   :  { %9574 = vmatpush3.bf16.msra.mxu1 %v10055_v17  ;;  %9795 = vmatprep.subr.bf16.mxu0 %v10056_v29  ;;  %v10063_v35 = vld [vmem:[#allocation2 + $0x720] sm:$0xff]  }
 0x162   :  { %9575 = vmatprep.subr.bf16.mxu1 %v10057_v40  ;;  %7288 = vmatprep.mubr.bf16.mxu0 %v6512_v55  ;;  %v13150_v17 = vld [vmem:[#allocation117_spill] sm:$0xff]  ;;  %v13151_v40 = vld [vmem:[#allocation51_spill] sm:$0xff]  ;;  %v13152_v55 = vld [vmem:[#allocation128_spill] sm:$0xff] }
 0x163   :  { %7352 = vmatprep.mubr.bf16.mxu1 %v6528_v3  ;;  %v6513_v19 = vcombine.high %v13151_v40, %v13150_v17  ;;  %v6529_v3 = vcombine.high %v13153_v18, %v13152_v55  ;;  %v6505_v17 = vcombine.high %v13155_v37, %v13154_v45  ;;  %v13156_v40 = vld [vmem:[#allocation134_spill] sm:$0xff]  ;;  %v13157_v55 = vld [vmem:[#allocation133_spill] sm:$0xff]  ;;  %v12140_v18 = vpop.f32.mrf.mxu0 }
 0x164   :  { %9796 = vmatpush3.bf16.msra.mxu0 %v10056_v29  ;;  %v10064_v29 = vld [vmem:[#allocation2 + $0x6e0] sm:$0xff]  }
 0x165   :  { %9576 = vmatpush3.bf16.msra.mxu1 %v10058_v4  ;;  %9797 = vmatprep.subr.bf16.mxu0 %v10059_v32  ;;  %v10065_v4 = vld [vmem:[#allocation2 + $0x698] sm:$0xff]  }
 0x166   :  { %9577 = vmatprep.subr.bf16.mxu1 %v10060_v43  ;;  %v10066_v43 = vld [vmem:[#allocation2 + $0x718] sm:$0xff]  }
 0x167   :  { %7289 = vmatmul.mubr.bf16.gmra.mxu0 %v6504_v0  ;;  %v6521_v0 = vcombine.high %v13157_v55, %v13156_v40  ;;  %v12148_v40 = vpop.f32.mrf.mxu0  ;;  %v13160_v55 = vld [vmem:[#allocation129_spill] sm:$0xff] }
 0x168   :  { %7353 = vmatmul.mubr.bf16.gmra.mxu1 %v6520_v12  ;;  %9798 = vmatpush3.bf16.msra.mxu0 %v10059_v32  ;;  %v12138_v12 = vpop.f32.mrf.mxu1  ;;  %v10067_v32 = vld [vmem:[#allocation2 + $0x6d8] sm:$0xff]  }
 0x169   :  { %9578 = vmatpush3.bf16.msra.mxu1 %v10061_v62  ;;  %9799 = vmatprep.subr.bf16.mxu0 %v10062_v58  ;;  %v10068_v62 = vld [vmem:[#allocation2 + $0x690] sm:$0xff]  }
 0x16a   :  { %9579 = vmatprep.subr.bf16.mxu1 %v10063_v35  ;;  %7296 = vmatprep.mubr.bf16.mxu0 %v6513_v19  ;;  %v10069_v35 = vld [vmem:[#allocation2 + $0x710] sm:$0xff]   ;;  %v6514_v19 = vcombine.high %v13158_v22, %v13158_v22  ;;  %v12146_v37 = vpop.f32.mrf.mxu1  ;;  %v6506_v22 = vcombine.high %v13160_v55, %v13160_v55 }
 0x16b   :  { %7360 = vmatprep.mubr.bf16.mxu1 %v6529_v3  ;;  %v13159_v3 = vld [vmem:[#allocation136_spill] sm:$0xff] }
 0x16c   :  { %9800 = vmatpush3.bf16.msra.mxu0 %v10062_v58  ;;  %v6530_v45 = vcombine.high %v13159_v3, %v13159_v3  ;;  %v10070_v58 = vld [vmem:[#allocation2 + $0x6d0] sm:$0xff]   ;;  %v12156_v3 = vpop.f32.mrf.mxu0 }
 0x16d   :  { %9580 = vmatpush3.bf16.msra.mxu1 %v10064_v29  ;;  %9801 = vmatprep.subr.bf16.mxu0 %v10065_v4  ;;  %v10071_v29 = vld [vmem:[#allocation2 + $0x688] sm:$0xff]  }
 0x16e   :  { %9581 = vmatprep.subr.bf16.mxu1 %v10066_v43  ;;  %v10072_v43 = vld [vmem:[#allocation2 + $0x708] sm:$0xff]   ;;  %v12162_v41 = vpop.f32.mrf.mxu0 }
 0x16f   :  { %7297 = vmatmul.mubr.bf16.gmra.mxu0 %v6505_v17  ;;  %v6522_v17 = vcombine.high %v13161_v27, %v13161_v27  ;;  %v10076_v27 = vld [vmem:[#allocation2 + $0x6c0] sm:$0xff]  }
 0x170   :  { %7361 = vmatmul.mubr.bf16.gmra.mxu1 %v6521_v0  ;;  %9802 = vmatpush3.bf16.msra.mxu0 %v10065_v4  ;;  %v12154_v0 = vpop.f32.mrf.mxu1  ;;  %v10073_v4 = vld [vmem:[#allocation2 + $0x6c8] sm:$0xff]  }
 0x171   :  { %9582 = vmatpush3.bf16.msra.mxu1 %v10067_v32  ;;  %9803 = vmatprep.subr.bf16.mxu0 %v10068_v62  ;;  %v10074_v32 = vld [vmem:[#allocation2 + $0x680] sm:$0xff]  }
 0x172   :  { %9583 = vmatprep.subr.bf16.mxu1 %v10069_v35  ;;  %7304 = vmatprep.mubr.bf16.mxu0 %v6514_v19  ;;  %v10075_v35 = vld [vmem:[#allocation2 + $0x700] sm:$0xff]   ;;  %v12160_v55 = vpop.f32.mrf.mxu1 }
 0x173   :  { %7368 = vmatprep.mubr.bf16.mxu1 %v6530_v45  ;;  %v13163_v19 = vld [vmem:[#allocation5_spill] sm:$0xff] }
 0x174   :  { %9804 = vmatpush3.bf16.msra.mxu0 %v10068_v62  ;;  %v7448_v45 = vcombine.high %v13163_v19, %v13162_v23  ;;  %v10077_v62 = vld [vmem:[#allocation2 + $0x7b8] sm:$0xff]   ;;  %v13166_v23 = vld [vmem:[#allocation7_spill] sm:$0xff] }
 0x175   :  { %9584 = vmatpush3.bf16.msra.mxu1 %v10070_v58  ;;  %9805 = vmatprep.subr.bf16.mxu0 %v10071_v29  ;;  %v10079_v58 = vld [vmem:[#allocation2 + $0x838] sm:$0xff]  }
 0x176   :  { %9585 = vmatprep.subr.bf16.mxu1 %v10072_v43  ;;  %v13164_v43 = vcombine.high %v13067_v60, %v13066_v59  ;;  %v13167_v59 = vcombine.high %v11590_v48, %v11593_v13  ;;  %v13169_v48 = vcombine.high %v13072_v36, %v13071_v33  ;;  %v13170_v13 = vld [vmem:[#allocation40_spill] sm:$0xff] }
 0x177   :  { %7305 = vmatmul.mubr.bf16.gmra.mxu0 %v6506_v22  ;;  %v7440_v22 = vcombine.high %v13166_v23, %v13165_v28 }
 0x178   :  { %7369 = vmatmul.mubr.bf16.gmra.mxu1 %v6522_v17  ;;  %9806 = vmatpush3.bf16.msra.mxu0 %v10071_v29  ;;  %v12169_v17 = vpop.f32.mrf.mxu1  ;;  %v10078_v29 = vld [vmem:[#allocation2 + $0x778] sm:$0xff]  }
 0x179   :  { %9586 = vmatpush3.bf16.msra.mxu1 %v10073_v4  ;;  %9807 = vmatprep.subr.bf16.mxu0 %v10074_v32  ;;  %v10080_v4 = vld [vmem:[#allocation2 + $0x7f8] sm:$0xff]  }
 0x17a   :  { %9587 = vmatprep.subr.bf16.mxu1 %v10075_v35  ;;  %9809 = vmatprep.mubr.bf16.mxu0 %v13164_v43  ;;  %v12171_v19 = vpop.f32.mrf.mxu0  ;;  %v10081_v35 = vld [vmem:[#allocation2 + $0x7b0] sm:$0xff]   ;;  %v12178_v60 = vpop.f32.mrf.mxu1  ;;  %v6538_v43 = vcombine.high %v13170_v13, %v13170_v13 }
 0x17b   :  { %8121 = vmatprep.mubr.bf16.mxu1 %v7448_v45  ;;  %v10084_v45 = vld [vmem:[#allocation2 + $0x7f0] sm:$0xff]  }
 0x17c   :  { %9808 = vmatpush3.bf16.msra.mxu0 %v10074_v32  ;;  %v12173_v25 = vpop.f32.mrf.mxu0  ;;  %v10082_v32 = vld [vmem:[#allocation2 + $0x770] sm:$0xff]   ;;  %v12190_v23 = vpop.f32.mrf.mxu1 }
 0x17d   :  { %9588 = vmatpush3.bf16.msra.mxu1 %v10076_v27  ;;  %9613 = vmatprep.subr.bf16.mxu0 %v10077_v62  ;;  %v10085_v27 = vld [vmem:[#allocation2 + $0x7a8] sm:$0xff]  }
 0x17e   :  { %9653 = vmatprep.subr.bf16.mxu1 %v10079_v58  ;;  %v12180_v28 = vpop.f32.mrf.mxu0  ;;  %v10087_v62 = vld [vmem:[#allocation2 + $0x828] sm:$0xff]   ;;  %v13168_v58 = vcombine.high %v11650_v5, %v11656_v30  ;;  %v10091_v5 = vld [vmem:[#allocation2 + $0x820] sm:$0xff]   ;;  %v13171_v30 = vcombine.high %v13076_v6, %v13075_v42  ;;  %v13174_v6 = vcombine.high %v13082_v16, %v13081_v46  ;;  %v13176_v46 = vcombine.high %v13080_v20, %v13079_v38 }
 0x17f   :  { %9810 = vmatmul.mubr.bf16.vlgmr.msra.gmra.mxu0 %v13167_v59  ;;  %v10092_v59 = vld [vmem:[#allocation2 + $0x7e0] sm:$0xff]   ;;  %v10102_v38 = vld [vmem:[#allocation2 + $0x748] sm:$0xff]  }
 0x180   :  { %8122 = vmatmul.mubr.bf16.vlgmr.msra.gmra.mxu1 %v7440_v22  ;;  %9614 = vmatpush3.bf16.msra.mxu0 %v10078_v29  ;;  %v12192_v22 = vpop.f32.mrf.mxu0  ;;  %v10088_v29 = vld [vmem:[#allocation2 + $0x7e8] sm:$0xff]  }
 0x181   :  { %9654 = vmatpush3.bf16.msra.mxu1 %v10080_v4  ;;  %9615 = vmatprep.subr.bf16.mxu0 %v10081_v35  ;;  %v10089_v4 = vld [vmem:[#allocation2 + $0x7a0] sm:$0xff]   ;;  %v10104_v20 = vld [vmem:[#allocation2 + $0x7c8] sm:$0xff]  }
 0x182   :  { %9655 = vmatprep.subr.bf16.mxu1 %v10083_v54  ;;  %9813 = vmatprep.mubr.bf16.mxu0 %v13168_v58  ;;  %v10086_v54 = vld [vmem:[#allocation2 + $0x768] sm:$0xff]   ;;  %v10090_v35 = vld [vmem:[#allocation2 + $0x760] sm:$0xff]   ;;  %v13172_v58 = vld [vmem:[#allocation31_spill] sm:$0xff] }
 0x183   :  { %8129 = vmatprep.mubr.bf16.mxu1 %v13169_v48  ;;  %v13173_v42 = vcombine.high %v13078_v39, %v13172_v58  ;;  %v13175_v39 = vld [vmem:[#allocation65_spill] sm:$0xff] }
 0x184   :  { %9616 = vmatpush3.bf16.msra.mxu0 %v10082_v32  ;;  %v10093_v32 = vld [vmem:[#allocation2 + $0x798] sm:$0xff]   ;;  %v7451_v58 = vcombine.high %v13175_v39, %v13175_v39 }
 0x185   :  { %9656 = vmatpush3.bf16.msra.mxu1 %v10084_v45  ;;  %9617 = vmatprep.subr.bf16.mxu0 %v10085_v27  ;;  %v12197_v33 = vpop.f32.mrf.mxu1  ;;  %v12199_v36 = vpop.f32.mrf.mxu0  ;;  %v10095_v45 = vld [vmem:[#allocation2 + $0x818] sm:$0xff]  }
 0x186   :  { %9657 = vmatprep.subr.bf16.mxu1 %v10087_v62 }
 0x187   :  { %9814 = vmatmul.mubr.bf16.gmra.mxu0 %v6538_v43  ;;  %v12201_v27 = vpop.f32.mrf.mxu1  ;;  %v12203_v62 = vpop.f32.mrf.mxu0  ;;  %v10094_v43 = vld [vmem:[#allocation2 + $0x758] sm:$0xff]  }
 0x188   :  { %8130 = vmatmul.mubr.bf16.gmra.mxu1 %v13171_v30  ;;  %9618 = vmatpush3.bf16.msra.mxu0 %v10086_v54  ;;  %v10096_v54 = vld [vmem:[#allocation2 + $0x7d8] sm:$0xff]  }
 0x189   :  { %9658 = vmatpush3.bf16.msra.mxu1 %v10088_v29  ;;  %9619 = vmatprep.subr.bf16.mxu0 %v10089_v4  ;;  %v12211_v48 = vpop.f32.mrf.mxu1  ;;  %v9174_v13 = vpop.f32.mrf.mxu0  ;;  %v10097_v29 = vld [vmem:[#allocation2 + $0x790] sm:$0xff]  }
 0x18a   :  { %9659 = vmatprep.subr.bf16.mxu1 %v10091_v5  ;;  %8137 = vmatprep.mubr.bf16.mxu1 %v13173_v42  ;;  %v10099_v4 = vld [vmem:[#allocation2 + $0x810] sm:$0xff]  }
 0x18b   :  { %8185 = vmatprep.mubr.bf16.mxu0 %v13174_v6  ;;  %v12213_v5 = vpop.f32.mrf.mxu1  ;;  %v9175_v30 = vpop.f32.mrf.mxu0  ;;  %v13177_v6 = vld [vmem:[#allocation14_spill] sm:$0xff] }
 0x18c   :  { %9620 = vmatpush3.bf16.msra.mxu0 %v10090_v35  ;;  %v10098_v35 = vld [vmem:[#allocation2 + $0x750] sm:$0xff]   ;;  %v7443_v13 = vcombine.high %v13177_v6, %v13177_v6 }
 0x18d   :  { %9660 = vmatpush3.bf16.msra.mxu1 %v10092_v59  ;;  %9621 = vmatprep.subr.bf16.mxu0 %v10093_v32  ;;  %v12220_v16 = vpop.f32.mrf.mxu1  ;;  %v10100_v59 = vld [vmem:[#allocation2 + $0x7d0] sm:$0xff]   ;;  %v10101_v32 = vld [vmem:[#allocation2 + $0x788] sm:$0xff]  }
 0x18e   :  { %9661 = vmatprep.subr.bf16.mxu1 %v10095_v45  ;;  %v10103_v45 = vld [vmem:[#allocation2 + $0x808] sm:$0xff]  }
 0x18f   :  { %v12222_v42 = vpop.f32.mrf.mxu1 }
 0x190   :  { %8138 = vmatmul.mubr.bf16.gmra.mxu1 %v13176_v46  ;;  %9622 = vmatpush3.bf16.msra.mxu0 %v10094_v43  ;;  %v10105_v43 = vld [vmem:[#allocation2 + $0x780] sm:$0xff]  }
 0x191   :  { %9662 = vmatpush3.bf16.msra.mxu1 %v10096_v54  ;;  %9623 = vmatprep.subr.bf16.mxu0 %v10097_v29  ;;  %v9214_v30 = vpop.f32.mrf.mxu1  ;;  %v10107_v54 = vld [vmem:[#allocation2 + $0x800] sm:$0xff]   ;;  %v9161_v29 = vadd.f32 %v12148_v40, %v12140_v18  ;;  %v9164_v18 = vadd.f32 %v12162_v41, %v12156_v3  ;;  %v10111_v41 = vld [vmem:[#allocation2 + $0x8b0] sm:$0xff]  }
 0x192   :  { %9663 = vmatprep.subr.bf16.mxu1 %v10099_v4  ;;  %8145 = vmatprep.mubr.bf16.mxu1 %v7451_v58  ;;  %v9155_v4 = vadd.f32 %v12118_v50, %v12112_v9  ;;  %v10106_v58 = vld [vmem:[#allocation2 + $0x740] sm:$0xff]   ;;  %v9158_v9 = vadd.f32 %v12132_v51, %v12124_v61  ;;  %v9204_v61 = vadd.f32 %v12190_v23, %v12178_v60  ;;  %v10115_v3 = vld [vmem:[#allocation2 + $0x8f0] sm:$0xff]  }
 0x193   :  { %v9215_v39 = vpop.f32.mrf.mxu1  ;;  %v10108_v46 = vld [vmem:[#allocation2 + $0x7c0] sm:$0xff]   ;;  %v10113_v23 = vld [vmem:[#allocation2 + $0x870] sm:$0xff]  }
 0x194   :  { %9624 = vmatpush3.bf16.msra.mxu0 %v10098_v35  ;;  %v10109_v35 = vld [vmem:[#allocation2 + $0x8b8] sm:$0xff]   ;;  %v13178_v40 = vld [vmem:[#allocation9_spill] sm:$0xff] }
 0x195   :  { %9664 = vmatpush3.bf16.msra.mxu1 %v10100_v59  ;;  %9625 = vmatprep.subr.bf16.mxu0 %v10101_v32  ;;  %v10112_v59 = vld [vmem:[#allocation2 + $0x8f8] sm:$0xff]   ;;  %v4858_v32 = vadd.f32 %v9161_v29, %v12038_v15  ;;  %v13179_v6 = vcombine.high %v11735_v34, %v13178_v40  ;;  %v9195_v15 = vadd.f32 %v12138_v12, %v12130_v14  ;;  %v13183_v14 = vld [vmem:[#allocation57_spill] sm:$0xff]  ;;  %v10118_v40 = vld [vmem:[#allocation2 + $0x8e8] sm:$0xff]  }
 0x196   :  { %9665 = vmatprep.subr.bf16.mxu1 %v10103_v45  ;;  %v9201_v45 = vadd.f32 %v12169_v17, %v12160_v55  ;;  %v10110_v55 = vld [vmem:[#allocation2 + $0x878] sm:$0xff]   ;;  %v4861_v34 = vadd.f32 %v9164_v18, %v12049_v2  ;;  %v9198_v2 = vadd.f32 %v12154_v0, %v12146_v37  ;;  %v10114_v18 = vld [vmem:[#allocation2 + $0x8a8] sm:$0xff]  }
 0x197   :  { %v13185_v39 = vld [vmem:[#allocation68_spill] sm:$0xff] }
 0x198   :  { %8146 = vmatmul.mubr.bf16.gmra.mxu1 %v7443_v13  ;;  %9626 = vmatpush3.bf16.msra.mxu0 %v10102_v38  ;;  %v13180_v13 = vld [vmem:[#allocation35_spill] sm:$0xff]  ;;  %v4922_v51 = vadd.f32 %v9201_v45, %v4858_v32  ;;  %v13181_v38 = vld [vmem:[#allocation38_spill] sm:$0xff]  ;;  %v13186_v29 = vld [vmem:[#allocation12_spill] sm:$0xff]  ;;  %v13188_v45 = vcombine.high %v11759_v7, %v11762_v1  ;;  %v4925_v0 = vadd.f32 %v9204_v61, %v4861_v34 }
 0x199   :  { %9666 = vmatpush3.bf16.msra.mxu1 %v10104_v20  ;;  %9627 = vmatprep.subr.bf16.mxu0 %v10105_v43  ;;  %v4850_v30 = vadd.f32 %v9155_v4, %v13180_v13  ;;  %v4853_v20 = vadd.f32 %v9158_v9, %v13181_v38  ;;  %v13187_v4 = vcombine.high %v13185_v39, %v13186_v29  ;;  %v10116_v9 = vld [vmem:[#allocation2 + $0x868] sm:$0xff]  }
 0x19a   :  { %9667 = vmatprep.subr.bf16.mxu1 %v10107_v54  ;;  %8249 = vmatprep.mubr.bf16.mxu1 %v13179_v6  ;;  %v12240_v50 = vpop.f32.mrf.mxu1  ;;  %v13182_v54 = vld [vmem:[#allocation58_spill] sm:$0xff]  ;;  %v9210_v34 = vadd.f32 %v12213_v5, %v12211_v48 }
 0x19b   :  { %v13184_v12 = vcombine.high %v13182_v54, %v13183_v14  ;;  %v4914_v60 = vadd.f32 %v9195_v15, %v4850_v30  ;;  %v4917_v1 = vadd.f32 %v9198_v2, %v4853_v20  ;;  %v10121_v30 = vld [vmem:[#allocation2 + $0x8e0] sm:$0xff]   ;;  %v10127_v20 = vld [vmem:[#allocation2 + $0x8d0] sm:$0xff]   ;;  %v13197_v29 = vld [vmem:[#allocation26_spill] sm:$0xff] }
 0x19c   :  { %9628 = vmatpush3.bf16.msra.mxu0 %v10106_v58  ;;  %v12245_v17 = vpop.f32.mrf.mxu1 }
 0x19d   :  { %9668 = vmatpush3.bf16.msra.mxu1 %v10108_v46  ;;  %9693 = vmatprep.subr.bf16.mxu0 %v10109_v35  ;;  %v9173_v35 = vadd.f32 %v12203_v62, %v12199_v36  ;;  %v9167_v36 = vadd.f32 %v12173_v25, %v12171_v19  ;;  %v10117_v25 = vld [vmem:[#allocation2 + $0x8a0] sm:$0xff]  }
 0x19e   :  { %9817 = vmatprep.subr.bf16.mxu1 %v10112_v59  ;;  %v12257_v58 = vpop.f32.mrf.mxu1 }
 0x19f   :  { %v9763_v43 = vpop.f32.mrf.mxu0  ;;  %8186 = vmatmul.mubr.bf16.vlgmr.msra.gmra.mxu0 %v13184_v12  ;;  %v4874_v13 = vadd.f32 %v9173_v35, %v12098_v10  ;;  %v4866_v15 = vadd.f32 %v9167_v36, %v12084_v24  ;;  %v9170_v10 = vadd.f32 %v12192_v22, %v12180_v28  ;;  %v10119_v24 = vld [vmem:[#allocation2 + $0x860] sm:$0xff]   ;;  %v10124_v28 = vld [vmem:[#allocation2 + $0x8d8] sm:$0xff]   ;;  %v13196_v12 = vcombine.high %v11862_v56, %v11867_v11  ;;  %v13200_v56 = vld [vmem:[#allocation87_spill] sm:$0xff] }
 0x1a0   :  { %8250 = vmatmul.mubr.bf16.vlgmr.msra.gmra.mxu1 %v13187_v4  ;;  %v4986_v46 = vadd.f32 %v9763_v43, %v4922_v51  ;;  %9694 = vmatpush3.bf16.msra.mxu0 %v10110_v55  ;;  %v12274_v6 = vpop.f32.mrf.mxu1  ;;  %v9207_v55 = vadd.f32 %v12201_v27, %v12197_v33  ;;  %v13195_v43 = vld [vmem:[#allocation15_spill] sm:$0xff]  ;;  %v7459_v11 = vcombine.high %v13200_v56, %v13200_v56  ;;  %v10129_v36 = vld [vmem:[#allocation2 + $0x880] sm:$0xff]  }
 0x1a1   :  { %9818 = vmatpush3.bf16.msra.mxu1 %v10112_v59  ;;  %v4977_v32 = vpop.f32.mrf.mxu0  ;;  %9695 = vmatprep.subr.bf16.mxu0 %v10111_v41  ;;  %v13189_v59 = vcombine.high %v11775_v31, %v11778_v44  ;;  %v9213_v31 = vadd.f32 %v12222_v42, %v12220_v16  ;;  %v13190_v16 = vcombine.high %v11765_v52, %v11768_v8  ;;  %v10120_v8 = vld [vmem:[#allocation2 + $0x898] sm:$0xff]   ;;  %v13198_v4 = vld [vmem:[#allocation27_spill] sm:$0xff]  ;;  %v13224_v56 = vld [vmem:[#allocation81_spill] sm:$0xff] }
 0x1a2   :  { %8193 = vmatprep.mubr.bf16.mxu0 %v13188_v45  ;;  %8417 = vst [vmem:[%s12591_s2 + $0x40] sm:$0xff] %v4986_v46  ;;  %v4978_v37 = vadd.f32 %v4977_v32, %v4914_v60  ;;  %9819 = vmatprep.subr.bf16.mxu1 %v10115_v3  ;;  %v13191_v41 = vcombine.high %v11793_v26, %v11796_v49  ;;  %v10125_v60 = vld [vmem:[#allocation2 + $0x850] sm:$0xff]   ;;  %v10126_v32 = vld [vmem:[#allocation2 + $0x888] sm:$0xff]  }
 0x1a3   :  { %8257 = vmatprep.mubr.bf16.mxu1 %v13189_v59  ;;  %v9764_v62 = vpop.f32.mrf.mxu0  ;;  %v4938_v33 = vadd.f32 %v9213_v31, %v4874_v13  ;;  %v13192_v52 = vcombine.high %v11814_v63, %v11823_v57  ;;  %v13193_v26 = vcombine.high %v11836_v53, %v11839_v21  ;;  %v4869_v49 = vadd.f32 %v9170_v10, %v12092_v47  ;;  %v10122_v63 = vld [vmem:[#allocation2 + $0x858] sm:$0xff]   ;;  %v10123_v21 = vld [vmem:[#allocation2 + $0x890] sm:$0xff]   ;;  %v10130_v45 = vld [vmem:[#allocation2 + $0x8c8] sm:$0xff]  }
 0x1a4   :  { %8409 = vst [vmem:[%s12591_s2] sm:$0xff] %v4978_v37  ;;  %v4989_v7 = vadd.f32 %v9764_v62, %v4925_v0  ;;  %9696 = vmatpush3.bf16.msra.mxu0 %v10113_v23  ;;  %v4930_v51 = vadd.f32 %v9207_v55, %v4866_v15  ;;  %v13194_v47 = vld [vmem:[#allocation88_spill] sm:$0xff]  ;;  %v7483_v54 = vcombine.high %v13195_v43, %v13195_v43  ;;  %v10128_v0 = vld [vmem:[#allocation2 + $0x848] sm:$0xff]   ;;  %v10132_v62 = vld [vmem:[#allocation2 + $0x8c0] sm:$0xff]  }
 0x1a5   :  { %9820 = vmatpush3.bf16.msra.mxu1 %v10115_v3  ;;  %v4980_v44 = vpop.f32.mrf.mxu0  ;;  %9697 = vmatprep.subr.bf16.mxu0 %v10114_v18  ;;  %v7467_v48 = vcombine.high %v13194_v47, %v13194_v47  ;;  %v4933_v14 = vadd.f32 %v9210_v34, %v4869_v49  ;;  %v13199_v2 = vcombine.high %v13197_v29, %v13198_v4  ;;  %v13201_v18 = vld [vmem:[#allocation37_spill] sm:$0xff]  ;;  %v13207_v55 = vld [vmem:[#allocation50_spill] sm:$0xff]  ;;  %v13208_v10 = vld [vmem:[#allocation47_spill] sm:$0xff] }
 0x1a6   :  { %9821 = vmatprep.subr.bf16.mxu1 %v10118_v40  ;;  %8421 = vst [vmem:[%s12591_s2 + $0x60] sm:$0xff] %v4989_v7  ;;  %v4981_v19 = vadd.f32 %v4980_v44, %v4917_v1  ;;  %v13202_v7 = vld [vmem:[#allocation77_spill] sm:$0xff]  ;;  %v13215_v34 = vld [vmem:[#allocation48_spill] sm:$0xff] }
 0x1a7   :  { %8194 = vmatmul.mubr.bf16.gmra.mxu0 %v13190_v16  ;;  %v13203_v1 = vld [vmem:[#allocation89_spill] sm:$0xff]  ;;  %v7506_v16 = vcombine.high %v13208_v10, %v13207_v55  ;;  %v13221_v29 = vld [vmem:[#allocation60_spill] sm:$0xff] }
 0x1a8   :  { %v12293_v42 = vpop.f32.mrf.mxu1  ;;  %8258 = vmatmul.mubr.bf16.gmra.mxu1 %v13191_v41  ;;  %8413 = vst [vmem:[%s12591_s2 + $0x20] sm:$0xff] %v4981_v19  ;;  %9698 = vmatpush3.bf16.msra.mxu0 %v10116_v9  ;;  %v7504_v9 = vcombine.high %v13203_v1, %v13202_v7  ;;  %v10131_v31 = vld [vmem:[#allocation2 + $0x840] sm:$0xff]   ;;  %v13205_v19 = vld [vmem:[#allocation90_spill] sm:$0xff]  ;;  %v13222_v4 = vld [vmem:[#allocation64_spill] sm:$0xff] }
 0x1a9   :  { %9822 = vmatpush3.bf16.msra.mxu1 %v10118_v40  ;;  %9699 = vmatprep.subr.bf16.mxu0 %v10117_v25  ;;  %v7475_v40 = vcombine.high %v13201_v18, %v13201_v18  ;;  %v13204_v25 = vld [vmem:[#allocation84_spill] sm:$0xff] }
 0x1aa   :  { %v12301_v27 = vpop.f32.mrf.mxu1  ;;  %8201 = vmatprep.mubr.bf16.mxu0 %v13192_v52  ;;  %v9767_v22 = vpop.f32.mrf.mxu0  ;;  %9823 = vmatprep.subr.bf16.mxu1 %v10121_v30  ;;  %v13210_v52 = vld [vmem:[#allocation72_spill] sm:$0xff] }
 0x1ab   :  { %8265 = vmatprep.mubr.bf16.mxu1 %v13193_v26  ;;  %v5002_v61 = vadd.f32 %v9767_v22, %v4938_v33  ;;  %v13209_v33 = vld [vmem:[#allocation13_spill] sm:$0xff]  ;;  %v13212_v22 = vld [vmem:[#allocation24_spill] sm:$0xff] }
 0x1ac   :  { %v12312_v3 = vpop.f32.mrf.mxu1  ;;  %v4993_v38 = vpop.f32.mrf.mxu0  ;;  %9700 = vmatpush3.bf16.msra.mxu0 %v10119_v24  ;;  %v13213_v26 = vld [vmem:[#allocation25_spill] sm:$0xff] }
 0x1ad   :  { %9824 = vmatpush3.bf16.msra.mxu1 %v10121_v30  ;;  %8433 = vst [vmem:[%s12591_s2 + $0xc0] sm:$0x1] %v5002_v61  ;;  %v4994_v57 = vadd.f32 %v4993_v38, %v4930_v51  ;;  %9701 = vmatprep.subr.bf16.mxu0 %v10120_v8  ;;  %v13206_v30 = vcombine.high %v13204_v25, %v13205_v19  ;;  %v13216_v61 = vld [vmem:[#allocation46_spill] sm:$0xff] }
 0x1ae   :  { %v12317_v53 = vpop.f32.mrf.mxu1  ;;  %9825 = vmatprep.subr.bf16.mxu1 %v10124_v28  ;;  %v9768_v5 = vpop.f32.mrf.mxu0  ;;  %v13211_v8 = vcombine.high %v13209_v33, %v13210_v52  ;;  %v13214_v49 = vcombine.high %v13212_v22, %v13213_v26  ;;  %v13217_v51 = vcombine.high %v13215_v34, %v13216_v61  ;;  %v13227_v25 = vld [vmem:[#allocation62_spill] sm:$0xff] }
 0x1af   :  { %8425 = vst [vmem:[%s12591_s2 + $0x80] sm:$0xff] %v4994_v57  ;;  %8202 = vmatmul.mubr.bf16.gmra.mxu0 %v13196_v12  ;;  %v13218_v57 = vld [vmem:[#allocation73_spill] sm:$0xff]  ;;  %v13219_v5 = vld [vmem:[#allocation78_spill] sm:$0xff]  ;;  %v7491_v19 = vcombine.high %v13227_v25, %v13227_v25 }
 0x1b0   :  { %v12329_v39 = vpop.f32.mrf.mxu1  ;;  %8266 = vmatmul.mubr.bf16.gmra.mxu1 %v13199_v2  ;;  %v4996_v46 = vpop.f32.mrf.mxu0  ;;  %9702 = vmatpush3.bf16.msra.mxu0 %v10122_v63  ;;  %v13223_v2 = vcombine.high %v13221_v29, %v13222_v4 }
 0x1b1   :  { %9826 = vmatpush3.bf16.msra.mxu1 %v10124_v28  ;;  %v4997_v23 = vadd.f32 %v4996_v46, %v4933_v14  ;;  %9703 = vmatprep.subr.bf16.mxu0 %v10123_v21  ;;  %v7507_v21 = vcombine.high %v13218_v57, %v13218_v57 }
 0x1b2   :  { %v12334_v35 = vpop.f32.mrf.mxu1  ;;  %8209 = vmatprep.mubr.bf16.mxu0 %v7467_v48  ;;  %9827 = vmatprep.subr.bf16.mxu1 %v10127_v20 }
 0x1b3   :  { %8273 = vmatprep.mubr.bf16.mxu1 %v7483_v54  ;;  %8429 = vst [vmem:[%s12591_s2 + $0xa0] sm:$0xff] %v4997_v23 }
 0x1b4   :  { %v12343_v37 = vpop.f32.mrf.mxu1  ;;  %9704 = vmatpush3.bf16.msra.mxu0 %v10125_v60 }
 0x1b5   :  { %9828 = vmatpush3.bf16.msra.mxu1 %v10127_v20  ;;  %9705 = vmatprep.subr.bf16.mxu0 %v10126_v32  ;;  %v13220_v20 = vld [vmem:[#allocation61_spill] sm:$0xff] }
 0x1b6   :  { %v12345_v59 = vpop.f32.mrf.mxu1  ;;  %9829 = vmatprep.subr.bf16.mxu1 %v10130_v45  ;;  %v7498_v43 = vcombine.high %v13220_v20, %v13219_v5  ;;  %v9250_v5 = vadd.f32 %v12274_v6, %v12257_v58 }
 0x1b7   :  { %8210 = vmatmul.mubr.bf16.gmra.mxu0 %v7459_v11  ;;  %v13225_v11 = vld [vmem:[#allocation74_spill] sm:$0xff] }
 0x1b8   :  { %v12349_v13 = vpop.f32.mrf.mxu1  ;;  %8274 = vmatmul.mubr.bf16.gmra.mxu1 %v7475_v40  ;;  %9706 = vmatpush3.bf16.msra.mxu0 %v10128_v0  ;;  %v7490_v18 = vcombine.high %v13225_v11, %v13224_v56  ;;  %v13226_v40 = vld [vmem:[#allocation118_spill] sm:$0xff] }
 0x1b9   :  { %9830 = vmatpush3.bf16.msra.mxu1 %v10130_v45  ;;  %9707 = vmatprep.subr.bf16.mxu0 %v10129_v36  ;;  %v7499_v0 = vcombine.high %v13226_v40, %v13226_v40 }
 0x1ba   :  { %v12351_v44 = vpop.f32.mrf.mxu1  ;;  %8313 = vmatprep.mubr.bf16.mxu0 %v13206_v30  ;;  %9831 = vmatprep.subr.bf16.mxu1 %v10132_v62 }
 0x1bb   :  { %9833 = vmatprep.mubr.bf16.mxu1 %v7504_v9 }
 0x1bc   :  { %v9266_v15 = vpop.f32.mrf.mxu1  ;;  %9708 = vmatpush3.bf16.msra.mxu0 %v10131_v31 }
 0x1bd   :  { %9832 = vmatpush3.bf16.msra.mxu1 %v10132_v62 }
 0x1be   :  { %v9267_v41 = vpop.f32.mrf.mxu1 }
 0x1bf   :  { %v9285_v24 = vpop.f32.mrf.mxu0  ;;  %8314 = vmatmul.mubr.bf16.vlgmr.msra.gmra.mxu0 %v13211_v8 }
 0x1c0   :  { %v9325_v28 = vpop.f32.mrf.mxu1  ;;  %9834 = vmatmul.mubr.bf16.vlgmr.msra.gmra.mxu1 %v13214_v49  ;;  %8321 = vmatprep.mubr.bf16.mxu0 %v13217_v51  ;;  %v9247_v49 = vadd.f32 %v12245_v17, %v12240_v50  ;;  %v9253_v50 = vadd.f32 %v12301_v27, %v12293_v42 }
 0x1c1   :  { %9837 = vmatprep.mubr.bf16.mxu1 %v7506_v16  ;;  %v9286_v38 = vpop.f32.mrf.mxu0 }
 0x1c2   :  { %v9326_v63 = vpop.f32.mrf.mxu1  ;;  %v9287_v8 = vadd.f32 %v9286_v38, %v9285_v24 }
 0x1c3   :  { %v9288_v47 = vpop.f32.mrf.mxu0 }
 0x1c4   :  { %v9328_v48 = vpop.f32.mrf.mxu1  ;;  %v6250_v57 = vadd.f32 %v9287_v8, %v9247_v49 }
 0x1c5   :  { %v9289_v54 = vpop.f32.mrf.mxu0 }
 0x1c6   :  { %v9329_v14 = vpop.f32.mrf.mxu1  ;;  %v9290_v34 = vadd.f32 %v9289_v54, %v9288_v47 }
 0x1c7   :  { %v9291_v12 = vpop.f32.mrf.mxu0  ;;  %8322 = vmatmul.mubr.bf16.gmra.mxu0 %v13223_v2  ;;  %v9330_v4 = vadd.f32 %v9329_v14, %v9328_v48  ;;  %v9256_v48 = vadd.f32 %v12317_v53, %v12312_v3  ;;  %v9259_v3 = vadd.f32 %v12334_v35, %v12329_v39 }
 0x1c8   :  { %v9331_v46 = vpop.f32.mrf.mxu1  ;;  %9838 = vmatmul.mubr.bf16.gmra.mxu1 %v7507_v21  ;;  %8329 = vmatprep.mubr.bf16.mxu0 %v7498_v43  ;;  %v9327_v21 = vadd.f32 %v9326_v63, %v9325_v28  ;;  %v6253_v29 = vadd.f32 %v9290_v34, %v9250_v5 }
 0x1c9   :  { %v9292_v60 = vpop.f32.mrf.mxu0 }
 0x1ca   :  { %v9332_v23 = vpop.f32.mrf.mxu1  ;;  %v6314_v24 = vadd.f32 %v9327_v21, %v6250_v57  ;;  %v9293_v38 = vadd.f32 %v9292_v60, %v9291_v12  ;;  %v6317_v47 = vadd.f32 %v9330_v4, %v6253_v29 }
 0x1cb   :  { %v9294_v32 = vpop.f32.mrf.mxu0  ;;  %v9333_v6 = vadd.f32 %v9332_v23, %v9331_v46 }
 0x1cc   :  { %v9334_v45 = vpop.f32.mrf.mxu1  ;;  %v6258_v58 = vadd.f32 %v9293_v38, %v9253_v50 }
 0x1cd   :  { %v9295_v36 = vpop.f32.mrf.mxu0 }
 0x1ce   :  { %v9335_v62 = vpop.f32.mrf.mxu1  ;;  %v9296_v28 = vadd.f32 %v9295_v36, %v9294_v32  ;;  %v6322_v36 = vadd.f32 %v9333_v6, %v6258_v58 }
 0x1cf   :  { %v9297_v7 = vpop.f32.mrf.mxu0  ;;  %8330 = vmatmul.mubr.bf16.gmra.mxu0 %v7490_v18  ;;  %v9336_v27 = vadd.f32 %v9335_v62, %v9334_v45 }
 0x1d0   :  { %v12378_v1 = vpop.f32.mrf.mxu1  ;;  %8337 = vmatprep.mubr.bf16.mxu0 %v7499_v0  ;;  %v6261_v42 = vadd.f32 %v9296_v28, %v9256_v48 }
 0x1d1   :  { %v9298_v9 = vpop.f32.mrf.mxu0 }
 0x1d2   :  { %v12380_v31 = vpop.f32.mrf.mxu1  ;;  %v9299_v8 = vadd.f32 %v9298_v9, %v9297_v7  ;;  %v6325_v49 = vadd.f32 %v9336_v27, %v6261_v42 }
 0x1d3   :  { %v9300_v30 = vpop.f32.mrf.mxu0  ;;  %v9339_v62 = vadd.f32 %v12380_v31, %v12378_v1 }
 0x1d4   :  { %v12384_v15 = vpop.f32.mrf.mxu1  ;;  %v6266_v45 = vadd.f32 %v9299_v8, %v9259_v3 }
 0x1d5   :  { %v9301_v55 = vpop.f32.mrf.mxu0 }
 0x1d6   :  { %v12386_v10 = vpop.f32.mrf.mxu1  ;;  %v9302_v34 = vadd.f32 %v9301_v55, %v9300_v30  ;;  %v6330_v21 = vadd.f32 %v9339_v62, %v6266_v45 }
 0x1d7   :  { %v12388_v16 = vpop.f32.mrf.mxu0  ;;  %8338 = vmatmul.mubr.bf16.gmra.mxu0 %v7491_v19  ;;  %v9342_v30 = vadd.f32 %v12386_v10, %v12384_v15 }
 0x1d8   :  { %v12390_v41 = vpop.f32.mrf.mxu1 }
 0x1d9   :  { %v12392_v33 = vpop.f32.mrf.mxu0 }
 0x1da   :  { %v12394_v52 = vpop.f32.mrf.mxu1  ;;  %v9305_v1 = vadd.f32 %v12392_v33, %v12388_v16 }
 0x1db   :  { %v9306_v22 = vpop.f32.mrf.mxu0  ;;  %v9345_v15 = vadd.f32 %v12394_v52, %v12390_v41 }
 0x1dc   :  { %v9346_v26 = vpop.f32.mrf.mxu1 }
 0x1dd   :  { %v9307_v61 = vpop.f32.mrf.mxu0 }
 0x1de   :  { %v9347_v51 = vpop.f32.mrf.mxu1 }
 0x1df   :  { %v9365_v20 = vpop.f32.mrf.mxu0  ;;  %v9262_v51 = vadd.f32 %v12345_v59, %v12343_v37  ;;  %v9265_v37 = vadd.f32 %v12351_v44, %v12349_v13 }
 0x1e0   :  { %v9787_v43 = vpop.f32.mrf.mxu1 }
 0x1e1   :  { %v9366_v2 = vpop.f32.mrf.mxu0  ;;  %v6269_v35 = vadd.f32 %v9302_v34, %v9262_v51  ;;  %v6274_v4 = vadd.f32 %v9305_v1, %v9265_v37 }
 0x1e2   :  { %v6441_v56 = vpop.f32.mrf.mxu1  ;;  %v9367_v11 = vadd.f32 %v9366_v2, %v9365_v20 }
 0x1e3   :  { %v9368_v18 = vpop.f32.mrf.mxu0 }
 0x1e4   :  { %v9788_v40 = vpop.f32.mrf.mxu1  ;;  %v6378_v17 = vadd.f32 %v9367_v11, %v6314_v24 }
 0x1e5   :  { %v9369_v63 = vpop.f32.mrf.mxu0 }
 0x1e6   :  { %v6444_v54 = vpop.f32.mrf.mxu1  ;;  %v9370_v0 = vadd.f32 %v9369_v63, %v9368_v18  ;;  %v6442_v25 = vadd.f32 %v6441_v56, %v6378_v17  ;;  %v6338_v56 = vadd.f32 %v9345_v15, %v6274_v4 }
 0x1e7   :  { %v9371_v14 = vpop.f32.mrf.mxu0 }
 0x1e8   :  { %v9791_v12 = vpop.f32.mrf.mxu1  ;;  %8410 = vst [vmem:[%s12591_s2 + $0x8] sm:$0xff] %v6442_v25  ;;  %v6381_v60 = vadd.f32 %v9370_v0, %v6317_v47 }
 0x1e9   :  { %v9372_v19 = vpop.f32.mrf.mxu0 }
 0x1ea   :  { %v6457_v32 = vpop.f32.mrf.mxu1  ;;  %v9373_v22 = vadd.f32 %v9372_v19, %v9371_v14  ;;  %v6445_v46 = vadd.f32 %v6444_v54, %v6381_v60 }
 0x1eb   :  { %v9374_v23 = vpop.f32.mrf.mxu0 }
 0x1ec   :  { %v9792_v26 = vpop.f32.mrf.mxu1  ;;  %v6386_v53 = vadd.f32 %v9373_v22, %v6322_v36  ;;  %8414 = vst [vmem:[%s12591_s2 + $0x28] sm:$0xff] %v6445_v46 }
 0x1ed   :  { %v9375_v61 = vpop.f32.mrf.mxu0 }
 0x1ee   :  { %v6450_v7 = vadd.f32 %v9787_v43, %v6386_v53  ;;  %v9376_v9 = vadd.f32 %v9375_v61, %v9374_v23  ;;  %v6333_v43 = vadd.f32 %v9342_v30, %v6269_v35  ;;  %v6460_v33 = vpop.f32.mrf.mxu1 }
 0x1ef   :  { %v9377_v57 = vpop.f32.mrf.mxu0 }
 0x1f0   :  { %8418 = vst [vmem:[%s12591_s2 + $0x48] sm:$0xff] %v6450_v7  ;;  %v6389_v39 = vadd.f32 %v9376_v9, %v6325_v49 }
 0x1f1   :  { %v9378_v55 = vpop.f32.mrf.mxu0 }
 0x1f2   :  { %v6453_v31 = vadd.f32 %v9788_v40, %v6389_v39  ;;  %v9379_v5 = vadd.f32 %v9378_v55, %v9377_v57 }
 0x1f3   :  { %v9380_v20 = vpop.f32.mrf.mxu0 }
 0x1f4   :  { %8422 = vst [vmem:[%s12591_s2 + $0x68] sm:$0xff] %v6453_v31  ;;  %v6394_v59 = vadd.f32 %v9379_v5, %v6330_v21 }
 0x1f5   :  { %v9381_v29 = vpop.f32.mrf.mxu0 }
 0x1f6   :  { %v9382_v10 = vadd.f32 %v9381_v29, %v9380_v20  ;;  %v6458_v2 = vadd.f32 %v6457_v32, %v6394_v59 }
 0x1f7   :  { %v9383_v16 = vpop.f32.mrf.mxu0 }
 0x1f8   :  { %8426 = vst [vmem:[%s12591_s2 + $0x88] sm:$0xff] %v6458_v2  ;;  %v6397_v13 = vadd.f32 %v9382_v10, %v6333_v43 }
 0x1f9   :  { %v9384_v44 = vpop.f32.mrf.mxu0 }
 0x1fa   :  { %v9385_v24 = vadd.f32 %v9384_v44, %v9383_v16  ;;  %v6461_v38 = vadd.f32 %v6460_v33, %v6397_v13 }
 0x1fb   :  { %v9386_v11 = vpop.f32.mrf.mxu0 }
 0x1fc   :  { %v6402_v18 = vadd.f32 %v9385_v24, %v6338_v56  ;;  %8430 = vst [vmem:[%s12591_s2 + $0xa8] sm:$0xff] %v6461_v38 }
 0x1fd   :  { %v9387_v41 = vpop.f32.mrf.mxu0 }
 0x1fe   :  { %v6466_v52 = vadd.f32 %v9791_v12, %v6402_v18 }
 0x1ff   :  { %v9417_v40 = vpop.f32.mrf.mxu0 }
 0x200   :  { %v9457_v50 = vpop.f32.mrf.mxu1  ;;  %8434 = vst [vmem:[%s12591_s2 + $0xc8] sm:$0x1] %v6466_v52 }
 0x201   :  { %v9418_v17 = vpop.f32.mrf.mxu0 }
 0x202   :  { %v9458_v47 = vpop.f32.mrf.mxu1  ;;  %v9419_v24 = vadd.f32 %v9418_v17, %v9417_v40 }
 0x203   :  { %v12439_v28 = vpop.f32.mrf.mxu0  ;;  %v9459_v38 = vadd.f32 %v9458_v47, %v9457_v50 }
 0x204   :  { %v12441_v63 = vpop.f32.mrf.mxu1 }
 0x205   :  { %v9421_v54 = vpop.f32.mrf.mxu0 }
 0x206   :  { %v9461_v58 = vpop.f32.mrf.mxu1 }
 0x207   :  { %v9423_v6 = vpop.f32.mrf.mxu0 }
 0x208   :  { %v9463_v0 = vpop.f32.mrf.mxu1 }
 0x209   :  { %v9424_v25 = vpop.f32.mrf.mxu0 }
 0x20a   :  { %v9464_v48 = vpop.f32.mrf.mxu1  ;;  %v9425_v33 = vadd.f32 %v9424_v25, %v9423_v6  ;;  %v7219_v6 = vadd.f32 %v9459_v38, %v9419_v24 }
 0x20b   :  { %v9426_v14 = vpop.f32.mrf.mxu0  ;;  %v9465_v13 = vadd.f32 %v9464_v48, %v9463_v0 }
 0x20c   :  { %v9466_v12 = vpop.f32.mrf.mxu1 }
 0x20d   :  { %v9427_v60 = vpop.f32.mrf.mxu0 }
 0x20e   :  { %v9467_v42 = vpop.f32.mrf.mxu1  ;;  %v9428_v18 = vadd.f32 %v9427_v60, %v9426_v14 }
 0x20f   :  { %v12443_v27 = vpop.f32.mrf.mxu0  ;;  %v9468_v41 = vadd.f32 %v9467_v42, %v9466_v12 }
 0x210   :  { %v12445_v19 = vpop.f32.mrf.mxu1 }
 0x211   :  { %v12447_v32 = vpop.f32.mrf.mxu0 }
 0x212   :  { %v12449_v36 = vpop.f32.mrf.mxu1 }
 0x213   :  { %v12451_v8 = vpop.f32.mrf.mxu0 }
 0x214   :  { %v12453_v22 = vpop.f32.mrf.mxu1 }
 0x215   :  { %v12455_v46 = vpop.f32.mrf.mxu0 }
 0x216   :  { %v12457_v23 = vpop.f32.mrf.mxu1 }
 0x217   :  { %v9435_v26 = vpop.f32.mrf.mxu0 }
 0x218   :  { %v9475_v3 = vpop.f32.mrf.mxu1 }
 0x219   :  { %v9436_v53 = vpop.f32.mrf.mxu0 }
 0x21a   :  { %v9476_v49 = vpop.f32.mrf.mxu1  ;;  %v9437_v47 = vadd.f32 %v9436_v53, %v9435_v26 }
 0x21b   :  { %v9438_v34 = vpop.f32.mrf.mxu0  ;;  %v9477_v14 = vadd.f32 %v9476_v49, %v9475_v3 }
 0x21c   :  { %v9478_v61 = vpop.f32.mrf.mxu1 }
 0x21d   :  { %v9439_v45 = vpop.f32.mrf.mxu0  ;;  %v7227_v61 = vadd.f32 %v9465_v13, %v9425_v33  ;;  %v7243_v3 = vadd.f32 %v9477_v14, %v9437_v47 }
 0x21e   :  { %v9479_v62 = vpop.f32.mrf.mxu1 }
 0x21f   :  { %v9497_v7 = vpop.f32.mrf.mxu0  ;;  %v9422_v62 = vadd.f32 %v9421_v54, %v12439_v28  ;;  %v9431_v28 = vadd.f32 %v12447_v32, %v12443_v27  ;;  %v9434_v27 = vadd.f32 %v12455_v46, %v12451_v8 }
 0x220   :  { %v9537_v9 = vpop.f32.mrf.mxu1 }
 0x221   :  { %v9498_v51 = vpop.f32.mrf.mxu0 }
 0x222   :  { %v9538_v57 = vpop.f32.mrf.mxu1  ;;  %v9499_v45 = vadd.f32 %v9498_v51, %v9497_v7 }
 0x223   :  { %v9500_v39 = vpop.f32.mrf.mxu0  ;;  %v9539_v60 = vadd.f32 %v9538_v57, %v9537_v9 }
 0x224   :  { %v9540_v35 = vpop.f32.mrf.mxu1  ;;  %v7283_v12 = vadd.f32 %v9499_v45, %v7219_v6 }
 0x225   :  { %v9501_v30 = vpop.f32.mrf.mxu0 }
 0x226   :  { %v9541_v55 = vpop.f32.mrf.mxu1  ;;  %v9502_v40 = vadd.f32 %v9501_v30, %v9500_v39  ;;  %v7347_v9 = vadd.f32 %v9539_v60, %v7283_v12 }
 0x227   :  { %v9503_v21 = vpop.f32.mrf.mxu0  ;;  %v9542_v30 = vadd.f32 %v9541_v55, %v9540_v35 }
 0x228   :  { %v9543_v1 = vpop.f32.mrf.mxu1 }
 0x229   :  { %v9504_v31 = vpop.f32.mrf.mxu0 }
 0x22a   :  { %v9544_v5 = vpop.f32.mrf.mxu1  ;;  %v9505_v11 = vadd.f32 %v9504_v31, %v9503_v21 }
 0x22b   :  { %v9506_v20 = vpop.f32.mrf.mxu0  ;;  %v9545_v25 = vadd.f32 %v9544_v5, %v9543_v1 }
 0x22c   :  { %v9546_v37 = vpop.f32.mrf.mxu1  ;;  %v7291_v0 = vadd.f32 %v9505_v11, %v7227_v61 }
 0x22d   :  { %v9507_v59 = vpop.f32.mrf.mxu0 }
 0x22e   :  { %v9547_v43 = vpop.f32.mrf.mxu1  ;;  %v9508_v48 = vadd.f32 %v9507_v59, %v9506_v20  ;;  %v7355_v1 = vadd.f32 %v9545_v25, %v7291_v0 }
 0x22f   :  { %v9509_v29 = vpop.f32.mrf.mxu0  ;;  %v9548_v51 = vadd.f32 %v9547_v43, %v9546_v37 }
 0x230   :  { %v12459_v4 = vpop.f32.mrf.mxu1 }
 0x231   :  { %v9510_v15 = vpop.f32.mrf.mxu0 }
 0x232   :  { %v12461_v10 = vpop.f32.mrf.mxu1  ;;  %v9511_v53 = vadd.f32 %v9510_v15, %v9509_v29 }
 0x233   :  { %13228 = vst [vmem:[#allocation76_spill] sm:$0xff] %v12461_v10  ;;  %v12463_v2 = vpop.f32.mrf.mxu0 }
 0x234   :  { %13229 = vst [vmem:[#allocation130_spill] sm:$0xff] %v12463_v2  ;;  %v12465_v16 = vpop.f32.mrf.mxu1  ;;  %v9462_v2 = vadd.f32 %v9461_v58, %v12441_v63  ;;  %v9471_v63 = vadd.f32 %v12449_v36, %v12445_v19  ;;  %v9474_v19 = vadd.f32 %v12457_v23, %v12453_v22 }
 0x235   :  { %13230 = vst [vmem:[#allocation82_spill] sm:$0xff] %v12465_v16  ;;  %v9513_v44 = vpop.f32.mrf.mxu0 }
 0x236   :  { %v12467_v56 = vpop.f32.mrf.mxu1  ;;  %v7222_v42 = vadd.f32 %v9462_v2, %v9422_v62  ;;  %v7235_v57 = vadd.f32 %v9471_v63, %v9431_v28 }
 0x237   :  { %13231 = vst [vmem:[#allocation98_spill] sm:$0xff] %v12467_v56  ;;  %v9515_v52 = vpop.f32.mrf.mxu0  ;;  %v7230_v56 = vadd.f32 %v9468_v41, %v9428_v18 }
 0x238   :  { %v9555_v34 = vpop.f32.mrf.mxu1  ;;  %v7286_v39 = vadd.f32 %v9502_v40, %v7222_v42  ;;  %v7299_v29 = vadd.f32 %v9511_v53, %v7235_v57 }
 0x239   :  { %v9516_v10 = vpop.f32.mrf.mxu0  ;;  %v7294_v7 = vadd.f32 %v9508_v48, %v7230_v56 }
 0x23a   :  { %v9556_v16 = vpop.f32.mrf.mxu1  ;;  %v9517_v21 = vadd.f32 %v9516_v10, %v9515_v52  ;;  %v7350_v59 = vadd.f32 %v9542_v30, %v7286_v39  ;;  %v13232_v8 = vld [vmem:[#allocation76_spill] sm:$0xff] }
 0x23b   :  { %v9518_v50 = vpop.f32.mrf.mxu0  ;;  %v9557_v20 = vadd.f32 %v9556_v16, %v9555_v34  ;;  %v7358_v55 = vadd.f32 %v9548_v51, %v7294_v7  ;;  %v9551_v46 = vadd.f32 %v13232_v8, %v12459_v4  ;;  %v13233_v22 = vld [vmem:[#allocation130_spill] sm:$0xff]  ;;  %v7238_v16 = vadd.f32 %v9474_v19, %v9434_v27 }
 0x23c   :  { %v9558_v17 = vpop.f32.mrf.mxu1  ;;  %v7307_v5 = vadd.f32 %v9517_v21, %v7243_v3  ;;  %v9514_v23 = vadd.f32 %v9513_v44, %v13233_v22  ;;  %v13234_v44 = vld [vmem:[#allocation82_spill] sm:$0xff] }
 0x23d   :  { %v9519_v54 = vpop.f32.mrf.mxu0  ;;  %v7363_v41 = vadd.f32 %v9551_v46, %v7299_v29 }
 0x23e   :  { %v9559_v58 = vpop.f32.mrf.mxu1  ;;  %v7371_v13 = vadd.f32 %v9557_v20, %v7307_v5  ;;  %v7302_v4 = vadd.f32 %v9514_v23, %v7238_v16  ;;  %v13235_v38 = vld [vmem:[#allocation98_spill] sm:$0xff] }
 0x23f   :  { %v9811_v31 = vpop.f32.mrf.mxu0  ;;  %v9554_v11 = vadd.f32 %v13235_v38, %v13234_v44 }
 0x240   :  { %v12475_v26 = vpop.f32.mrf.mxu1  ;;  %v7419_v49 = vadd.f32 %v9811_v31, %v7355_v1 }
 0x241   :  { %v7410_v32 = vpop.f32.mrf.mxu0  ;;  %v7366_v6 = vadd.f32 %v9554_v11, %v7302_v4 }
 0x242   :  { %v12481_v36 = vpop.f32.mrf.mxu1  ;;  %8419 = vst [vmem:[%s12591_s2 + $0x50] sm:$0xff] %v7419_v49  ;;  %v7411_v35 = vadd.f32 %v7410_v32, %v7347_v9 }
 0x243   :  { %v9812_v37 = vpop.f32.mrf.mxu0 }
 0x244   :  { %v12486_v43 = vpop.f32.mrf.mxu1  ;;  %8411 = vst [vmem:[%s12591_s2 + $0x10] sm:$0xff] %v7411_v35  ;;  %v7422_v15 = vadd.f32 %v9812_v37, %v7358_v55 }
 0x245   :  { %v7413_v10 = vpop.f32.mrf.mxu0 }
 0x246   :  { %v12494_v2 = vpop.f32.mrf.mxu1  ;;  %8423 = vst [vmem:[%s12591_s2 + $0x70] sm:$0xff] %v7422_v15  ;;  %v7414_v33 = vadd.f32 %v7413_v10, %v7350_v59  ;;  %v9591_v10 = vadd.f32 %v12481_v36, %v12475_v26 }
 0x247   :  { %v9815_v56 = vpop.f32.mrf.mxu0  ;;  %v9594_v44 = vadd.f32 %v12494_v2, %v12486_v43 }
 0x248   :  { %v12499_v24 = vpop.f32.mrf.mxu1  ;;  %8415 = vst [vmem:[%s12591_s2 + $0x30] sm:$0xff] %v7414_v33  ;;  %v7435_v18 = vadd.f32 %v9815_v56, %v7371_v13 }
 0x249   :  { %v7426_v52 = vpop.f32.mrf.mxu0 }
 0x24a   :  { %v12506_v34 = vpop.f32.mrf.mxu1  ;;  %8435 = vst [vmem:[%s12591_s2 + $0xd0] sm:$0x1] %v7435_v18  ;;  %v7427_v61 = vadd.f32 %v7426_v52, %v7363_v41 }
 0x24b   :  { %v9816_v45 = vpop.f32.mrf.mxu0  ;;  %v9597_v26 = vadd.f32 %v12506_v34, %v12499_v24 }
 0x24c   :  { %v12511_v62 = vpop.f32.mrf.mxu1  ;;  %8427 = vst [vmem:[%s12591_s2 + $0x90] sm:$0xff] %v7427_v61 }
 0x24d   :  { %v7429_v0 = vpop.f32.mrf.mxu0 }
 0x24e   :  { %v12516_v25 = vpop.f32.mrf.mxu1  ;;  %v7430_v48 = vadd.f32 %v7429_v0, %v7366_v6 }
 0x250   :  { %v12518_v40 = vpop.f32.mrf.mxu1  ;;  %8431 = vst [vmem:[%s12591_s2 + $0xb0] sm:$0xff] %v7430_v48 }
 0x252   :  { %v12523_v50 = vpop.f32.mrf.mxu1 }
 0x254   :  { %v12525_v17 = vpop.f32.mrf.mxu1 }
 0x256   :  { %v12527_v47 = vpop.f32.mrf.mxu1 }
 0x258   :  { %v12529_v14 = vpop.f32.mrf.mxu1 }
 0x25a   :  { %v12531_v12 = vpop.f32.mrf.mxu1 }
 0x25c   :  { %v9610_v60 = vpop.f32.mrf.mxu1 }
 0x25e   :  { %v9611_v42 = vpop.f32.mrf.mxu1 }
 0x25f   :  { %v9629_v28 = vpop.f32.mrf.mxu0 }
 0x260   :  { %v9669_v63 = vpop.f32.mrf.mxu1 }
 0x261   :  { %v9630_v54 = vpop.f32.mrf.mxu0 }
 0x262   :  { %v9670_v58 = vpop.f32.mrf.mxu1  ;;  %v9631_v22 = vadd.f32 %v9630_v54, %v9629_v28 }
 0x263   :  { %v9632_v7 = vpop.f32.mrf.mxu0  ;;  %v9671_v4 = vadd.f32 %v9670_v58, %v9669_v63 }
 0x264   :  { %v9672_v51 = vpop.f32.mrf.mxu1  ;;  %v8188_v56 = vadd.f32 %v9631_v22, %v9591_v10 }
 0x265   :  { %v9633_v21 = vpop.f32.mrf.mxu0 }
 0x266   :  { %v9673_v1 = vpop.f32.mrf.mxu1  ;;  %v9634_v16 = vadd.f32 %v9633_v21, %v9632_v7  ;;  %v8252_v45 = vadd.f32 %v9671_v4, %v8188_v56 }
 0x267   :  { %v9635_v39 = vpop.f32.mrf.mxu0  ;;  %v9674_v41 = vadd.f32 %v9673_v1, %v9672_v51  ;;  %v9600_v51 = vadd.f32 %v12516_v25, %v12511_v62  ;;  %v9603_v62 = vadd.f32 %v12523_v50, %v12518_v40 }
 0x268   :  { %v9675_v30 = vpop.f32.mrf.mxu1  ;;  %v8191_v18 = vadd.f32 %v9634_v16, %v9594_v44 }
 0x269   :  { %v9636_v31 = vpop.f32.mrf.mxu0 }
 0x26a   :  { %v9676_v3 = vpop.f32.mrf.mxu1  ;;  %v9637_v6 = vadd.f32 %v9636_v31, %v9635_v39  ;;  %v8255_v42 = vadd.f32 %v9674_v41, %v8191_v18 }
 0x26b   :  { %v9638_v53 = vpop.f32.mrf.mxu0  ;;  %v9677_v2 = vadd.f32 %v9676_v3, %v9675_v30 }
 0x26c   :  { %v9678_v49 = vpop.f32.mrf.mxu1  ;;  %v8196_v43 = vadd.f32 %v9637_v6, %v9597_v26 }
 0x26d   :  { %v9639_v9 = vpop.f32.mrf.mxu0 }
 0x26e   :  { %v9679_v57 = vpop.f32.mrf.mxu1  ;;  %v9640_v28 = vadd.f32 %v9639_v9, %v9638_v53  ;;  %v8260_v9 = vadd.f32 %v9677_v2, %v8196_v43 }
 0x26f   :  { %v9641_v27 = vpop.f32.mrf.mxu0  ;;  %v9680_v34 = vadd.f32 %v9679_v57, %v9678_v49 }
 0x270   :  { %v12533_v19 = vpop.f32.mrf.mxu1  ;;  %v8199_v24 = vadd.f32 %v9640_v28, %v9600_v51 }
 0x271   :  { %v9642_v32 = vpop.f32.mrf.mxu0 }
 0x272   :  { %v9682_v5 = vpop.f32.mrf.mxu1  ;;  %v9643_v22 = vadd.f32 %v9642_v32, %v9641_v27  ;;  %v8263_v10 = vadd.f32 %v9680_v34, %v8199_v24  ;;  %v9606_v32 = vadd.f32 %v12527_v47, %v12525_v17  ;;  %v9609_v17 = vadd.f32 %v12531_v12, %v12529_v14 }
 0x273   :  { %v9644_v20 = vpop.f32.mrf.mxu0  ;;  %v9683_v57 = vadd.f32 %v9682_v5, %v12533_v19 }
 0x274   :  { %v12535_v35 = vpop.f32.mrf.mxu1  ;;  %v8204_v49 = vadd.f32 %v9643_v22, %v9603_v62 }
 0x275   :  { %v9645_v55 = vpop.f32.mrf.mxu0 }
 0x276   :  { %v12537_v37 = vpop.f32.mrf.mxu1  ;;  %v9646_v16 = vadd.f32 %v9645_v55, %v9644_v20  ;;  %v8268_v55 = vadd.f32 %v9683_v57, %v8204_v49 }
 0x277   :  { %v12539_v59 = vpop.f32.mrf.mxu0  ;;  %v9686_v4 = vadd.f32 %v12537_v37, %v12535_v35 }
 0x278   :  { %v12541_v29 = vpop.f32.mrf.mxu1  ;;  %v8207_v50 = vadd.f32 %v9646_v16, %v9606_v32 }
 0x279   :  { %v12543_v8 = vpop.f32.mrf.mxu0 }
 0x27a   :  { %v12545_v46 = vpop.f32.mrf.mxu1  ;;  %v9649_v19 = vadd.f32 %v12543_v8, %v12539_v59 }
 0x27b   :  { %v9650_v23 = vpop.f32.mrf.mxu0  ;;  %v9689_v35 = vadd.f32 %v12545_v46, %v12541_v29 }
 0x27c   :  { %v9690_v15 = vpop.f32.mrf.mxu1  ;;  %v8212_v41 = vadd.f32 %v9649_v19, %v9609_v17 }
 0x27d   :  { %v9651_v33 = vpop.f32.mrf.mxu0 }
 0x27e   :  { %v9691_v13 = vpop.f32.mrf.mxu1 }
 0x27f   :  { %v9709_v38 = vpop.f32.mrf.mxu0 }
 0x280   :  { %v9835_v11 = vpop.f32.mrf.mxu1 }
 0x281   :  { %v9710_v52 = vpop.f32.mrf.mxu0 }
 0x282   :  { %v8379_v61 = vpop.f32.mrf.mxu1  ;;  %v9711_v0 = vadd.f32 %v9710_v52, %v9709_v38 }
 0x283   :  { %v9712_v48 = vpop.f32.mrf.mxu0 }
 0x284   :  { %v9836_v60 = vpop.f32.mrf.mxu1  ;;  %v8316_v36 = vadd.f32 %v9711_v0, %v8252_v45 }
 0x285   :  { %v9713_v63 = vpop.f32.mrf.mxu0 }
 0x286   :  { %v8382_v54 = vpop.f32.mrf.mxu1  ;;  %v9714_v58 = vadd.f32 %v9713_v63, %v9712_v48  ;;  %v8380_v7 = vadd.f32 %v8379_v61, %v8316_v36  ;;  %v8276_v61 = vadd.f32 %v9689_v35, %v8212_v41 }
 0x287   :  { %v9715_v21 = vpop.f32.mrf.mxu0 }
 0x288   :  { %v9839_v1 = vpop.f32.mrf.mxu1  ;;  %8412 = vst [vmem:[%s12591_s2 + $0x18] sm:$0xff] %v8380_v7  ;;  %v8319_v39 = vadd.f32 %v9714_v58, %v8255_v42 }
 0x289   :  { %v9716_v31 = vpop.f32.mrf.mxu0 }
 0x28a   :  { %v8395_v53 = vpop.f32.mrf.mxu1  ;;  %v9717_v23 = vadd.f32 %v9716_v31, %v9715_v21  ;;  %v8383_v30 = vadd.f32 %v8382_v54, %v8319_v39 }
 0x28b   :  { %v9718_v3 = vpop.f32.mrf.mxu0 }
 0x28c   :  { %v9840_v15 = vpop.f32.mrf.mxu1  ;;  %v8324_v25 = vadd.f32 %v9717_v23, %v8260_v9  ;;  %8416 = vst [vmem:[%s12591_s2 + $0x38] sm:$0xff] %v8383_v30 }
 0x28d   :  { %v9719_v33 = vpop.f32.mrf.mxu0 }
 0x28e   :  { %v8388_v13 = vadd.f32 %v9835_v11, %v8324_v25  ;;  %v9720_v27 = vadd.f32 %v9719_v33, %v9718_v3  ;;  %v8271_v11 = vadd.f32 %v9686_v4, %v8207_v50  ;;  %v8398_v14 = vpop.f32.mrf.mxu1 }
 0x28f   :  { %v9721_v56 = vpop.f32.mrf.mxu0 }
 0x290   :  { %8420 = vst [vmem:[%s12591_s2 + $0x58] sm:$0xff] %v8388_v13  ;;  %v8327_v40 = vadd.f32 %v9720_v27, %v8263_v10 }
 0x291   :  { %v9722_v20 = vpop.f32.mrf.mxu0 }
 0x292   :  { %v8391_v5 = vadd.f32 %v9836_v60, %v8327_v40  ;;  %v9723_v44 = vadd.f32 %v9722_v20, %v9721_v56 }
 0x293   :  { %v9724_v38 = vpop.f32.mrf.mxu0 }
 0x294   :  { %8424 = vst [vmem:[%s12591_s2 + $0x78] sm:$0xff] %v8391_v5  ;;  %v8332_v47 = vadd.f32 %v9723_v44, %v8268_v55 }
 0x295   :  { %v9725_v18 = vpop.f32.mrf.mxu0 }
 0x296   :  { %v8396_v37 = vadd.f32 %v8395_v53, %v8332_v47  ;;  %v9726_v52 = vadd.f32 %v9725_v18, %v9724_v38 }
 0x297   :  { %v9727_v59 = vpop.f32.mrf.mxu0 }
 0x298   :  { %8428 = vst [vmem:[%s12591_s2 + $0x98] sm:$0xff] %v8396_v37  ;;  %v8335_v8 = vadd.f32 %v9726_v52, %v8271_v11 }
 0x299   :  { %v9728_v12 = vpop.f32.mrf.mxu0 }
 0x29a   :  { %v8399_v45 = vadd.f32 %v8398_v14, %v8335_v8  ;;  %v9729_v6 = vadd.f32 %v9728_v12, %v9727_v59 }
 0x29b   :  { %v9730_v0 = vpop.f32.mrf.mxu0 }
 0x29c   :  { %8432 = vst [vmem:[%s12591_s2 + $0xb8] sm:$0xff] %v8399_v45  ;;  %v8340_v48 = vadd.f32 %v9729_v6, %v8276_v61 }
 0x29d   :  { %v9731_v29 = vpop.f32.mrf.mxu0 }
 0x29e   :  { %v8404_v46 = vadd.f32 %v9839_v1, %v8340_v48 }
 0x2a0   :  { %8436 = vst [vmem:[%s12591_s2 + $0xd8] sm:$0x1] %v8404_v46 }
 0x2a1   :  { %8441 = vsyncpa [#allocation3], 1 }

</bundles_post_ra>
